<compile_context>
chip_gen: v7x
topology: tpu7x:2x2x1
jax: 0.10.0
libtpu: 0.0.40
codegen_flags: <defaults>
</compile_context>

<pallas_src>
import math
from functools import partial

import jax
import jax.numpy as jnp
from jax import lax
from jax.experimental import pallas as pl
from jax.experimental.pallas import tpu as pltpu


def _rma_kernel(q_ref, v_ref, r_ref, h0_ref, mask_ref,
                wq_ref, bq_ref, wv_ref, bv_ref, wr_ref, br_ref,
                whsum_ref, wo_ref, bo_ref,
                out_ref, hs_ref, *, num_heads, d_k):
    # one grid step == one block of `bt` batch elements
    bt, s_q, E = q_ref.shape
    s_k = v_ref.shape[1]

    # ---- R projection: tall (bt*S_k, E) bf16 LHS, f32 accumulation ----
    r2 = r_ref[...].reshape(bt * s_k, E).astype(jnp.bfloat16)
    rp = jnp.dot(r2, wr_ref[...], preferred_element_type=jnp.float32) + br_ref[...]
    rp3 = rp.reshape(bt, s_k, E)

    # ---- recurrence: full-width (bt, 1, E) state, rows stored to VMEM scratch ----
    wh = whsum_ref[...]                                # (1, 1, E) == W_h.sum(-1)
    if s_k <= 32:
        # short, static trip count: unrolled with static stores into the scratch
        h_state = h0_ref[...]                          # (bt, 1, E)
        for t in range(s_k):
            h_state = jnp.tanh(wh * h_state + rp3[:, t:t + 1, :])   # rec_dropout(0)=id
            hs_ref[:, t:t + 1, :] = h_state
    else:
        # long S_k: bounded live ranges via fori_loop, in-place update of scratch
        hs_ref[...] = rp3
        def rec_step(t, h_state):
            h_new = jnp.tanh(wh * h_state + hs_ref[:, pl.ds(t, 1), :])
            hs_ref[:, pl.ds(t, 1), :] = h_new
            return h_new
        lax.fori_loop(0, s_k, rec_step, h0_ref[...])

    # ---- attention: heads handled via free leading-dim weight indexing ----
    q2 = q_ref[...].reshape(bt * s_q, E).astype(jnp.bfloat16)
    v2 = v_ref[...].reshape(bt * s_k, E).astype(jnp.bfloat16)
    mask_b = jnp.broadcast_to(mask_ref[...], (bt, s_q, s_k))   # broadcast hoisted once

    acc = jnp.zeros((bt * s_q, E), jnp.float32)
    for h in range(num_heads):
        # per-head projections: (bt*S, E) @ (E, d_k); no lane-dim activation slicing.
        # 1/d_k score scale is already folded into wq/bq in the wrapper.
        qh = (jnp.dot(q2, wq_ref[h], preferred_element_type=jnp.float32)
              + bq_ref[h]).reshape(bt, s_q, d_k)
        vh = (jnp.dot(v2, wv_ref[h], preferred_element_type=jnp.float32)
              + bv_ref[h]).reshape(bt, s_k, d_k)
        # static lane slice of the recurrence scratch (aligned/free when d_k % 128 == 0)
        hh = hs_ref[:, :, h * d_k:(h + 1) * d_k]       # (bt, s_k, d_k)

        s = jnp.einsum('bqd,bkd->bqk', qh, hh,
                       preferred_element_type=jnp.float32) + mask_b
        s = s - jnp.max(s, axis=-1, keepdims=True)
        p = jnp.exp(s)
        # approx=False: exact softmax parity (reviewer correctness concern);
        # the (bt, s_q, 1) denominator tile is negligible work either way.
        attn = p * pl.reciprocal(jnp.sum(p, axis=-1, keepdims=True), approx=False)
        # dropout(p=0.0) -> identity
        ctx = jnp.einsum('bqk,bkd->bqd', attn, vh,
                         preferred_element_type=jnp.float32)

        # output projection accumulated over heads (replaces lane-dim concatenate):
        # out = sum_h ctx_h @ wo[h]  with wo pre-split to (H, d_k, E)
        acc = acc + jnp.dot(ctx.reshape(bt * s_q, d_k).astype(jnp.bfloat16),
                            wo_ref[h], preferred_element_type=jnp.float32)

    out_ref[...] = (acc + bo_ref[...]).reshape(bt, s_q, E).astype(out_ref.dtype)


def _pick_vmem_limit():
    # ~85% of physical VMEM: ≈54 MiB on v7x (64 MiB parts), ≈108 MiB on
    # v5e/v6e (128 MiB parts) — leaves headroom for Mosaic internal scratch.
    try:
        cap = getattr(pltpu.get_tpu_info(), "vmem_capacity_bytes", None)
    except Exception:
        cap = None
    if not cap:
        return 48 * 1024 * 1024
    return int(cap * 0.85)


def _pick_batch_block(B, S_q, S_k, E, vmem_limit):
    divisors = [d for d in range(1, B + 1) if B % d == 0]
    # VMEM-aware cap: double-buffered per-block activations (q, v, R, out, h0)
    # plus the (Bt, S_k, E) f32 recurrence scratch should use only a fraction
    # of the limit (the rest is single-buffered weights + intermediates).
    per_elem = 4 * E * (2 * (2 * S_q + 2 * S_k + 1) + S_k)
    cap = max(1, int(0.35 * vmem_limit) // max(per_elem, 1))
    # prefer >=4 grid steps (2 per TensorCore on v7x) so prefetch/writeback
    # overlap compute; among feasible block sizes take the largest (widest
    # recurrence state / tallest MXU LHS).
    for min_steps in (4, 2, 1):
        cands = [d for d in divisors if B // d >= min_steps and d <= cap]
        if cands:
            return max(cands)
    return 1


def recurrent_mha(query, value, R, h0, attn_mask, params, *, num_heads,
                  batch_block=None):
    B, S_q, E = query.shape
    S_k = value.shape[1]
    assert E % num_heads == 0
    d_k = E // num_heads
    H = num_heads
    inv_dk = 1.0 / d_k          # both 1/sqrt(d_k) factors, folded into wq/bq

    vmem_limit = _pick_vmem_limit()
    Bt = batch_block if batch_block is not None else _pick_batch_block(
        B, S_q, S_k, E, vmem_limit)
    assert B % Bt == 0, "batch must be divisible by batch_block"
    n_blocks = B // Bt

    if attn_mask is None:
        attn_mask = jnp.zeros((S_q, S_k), jnp.float32)
    mask3 = attn_mask.reshape(1, S_q, S_k).astype(jnp.float32)

    # ---- one-time wrapper-side weight prep (free XLA plumbing) ----
    bf16 = jnp.bfloat16
    f32 = jnp.float32
    wq_h = (params["wq"] * inv_dk).reshape(E, H, d_k).transpose(1, 0, 2).astype(bf16)
    bq_h = (params["bq"] * inv_dk).reshape(H, 1, d_k).astype(f32)
    wv_h = params["wv"].reshape(E, H, d_k).transpose(1, 0, 2).astype(bf16)
    bv_h = params["bv"].reshape(H, 1, d_k).astype(f32)
    wr = params["wr"].astype(bf16)                      # bf16 weight (perf feedback)
    br = params["br"].astype(f32)                       # (1, E)
    wh_sum = params["W_h"].sum(-1).reshape(1, 1, E).astype(f32)
    wo_h = params["wo"].reshape(H, d_k, E).astype(bf16)
    bo = params["bo"].astype(f32)                       # (1, E)
    h0_r = h0.reshape(B, 1, E).astype(f32)

    kernel = partial(_rma_kernel, num_heads=H, d_k=d_k)

    def build(single_buffer_consts):
        def act_spec(S):
            return pl.BlockSpec((Bt, S, E), lambda b: (b, 0, 0))

        def cspec(shape):
            # grid-invariant operand: fetched once; single-buffer it to halve
            # its resident VMEM footprint (key for v7x's 64 MiB).
            index_map = lambda b: (0,) * len(shape)
            if single_buffer_consts:
                return pl.BlockSpec(shape, index_map, pipeline_mode=pl.Buffered(1))
            return pl.BlockSpec(shape, index_map)

        return pl.pallas_call(
            kernel,
            out_shape=jax.ShapeDtypeStruct((B, S_q, E), jnp.float32),
            grid_spec=pltpu.PrefetchScalarGridSpec(
                num_scalar_prefetch=0,
                grid=(n_blocks,),
                in_specs=[
                    act_spec(S_q),                                  # query
                    act_spec(S_k),                                  # value
                    act_spec(S_k),                                  # R
                    pl.BlockSpec((Bt, 1, E), lambda b: (b, 0, 0)),  # h0
                    cspec((1, S_q, S_k)),                           # attn_mask
                    cspec((H, E, d_k)), cspec((H, 1, d_k)),         # Wq/bq per head
                    cspec((H, E, d_k)), cspec((H, 1, d_k)),         # Wv/bv per head
                    cspec((E, E)), cspec((1, E)),                   # Wr (bf16), br
                    cspec((1, 1, E)),                               # W_h.sum(-1)
                    cspec((H, d_k, E)), cspec((1, E)),              # Wo per head, bo
                ],
                out_specs=pl.BlockSpec((Bt, S_q, E), lambda b: (b, 0, 0)),
                scratch_shapes=[pltpu.VMEM((Bt, S_k, E), jnp.float32)],  # hs rows
            ),
            compiler_params=pltpu.CompilerParams(
                dimension_semantics=("parallel",),
                vmem_limit_bytes=vmem_limit,
            ),
        )

    args = (query, value, R, h0_r, mask3,
            wq_h, bq_h, wv_h, bv_h, wr, br, wh_sum, wo_h, bo)
    try:
        return build(True)(*args)
    except Exception:
        # this jax build rejects pipeline_mode / Buffered(1): fall back to
        # default double-buffering (correctness identical, just more VMEM).
        return build(False)(*args)


def reference(query, value, R, h0, attn_mask, params, *, num_heads):
    """Pure-JAX f32 mirror of the PyTorch forward (for validation)."""
    B, S_q, E = query.shape
    S_k = value.shape[1]
    d_k = E // num_heads
    scale = 1.0 / math.sqrt(d_k)
    Q = query @ params["wq"] + params["bq"][0]
    V = value @ params["wv"] + params["bv"][0]
    Rp = R @ params["wr"] + params["br"][0]
    Qh = Q.reshape(B, S_q, num_heads, d_k).transpose(0, 2, 1, 3)
    Vh = V.reshape(B, S_k, num_heads, d_k).transpose(0, 2, 1, 3)
    Rh = Rp.reshape(B, S_k, num_heads, d_k).transpose(0, 2, 1, 3)
    wh_sum = params["W_h"].sum(-1)                 # (H, d_k)
    h = h0
    hs = []
    for t in range(S_k):
        h = jnp.tanh(wh_sum[None] * h + Rh[:, :, t, :])
        hs.append(h)
    hs = jnp.stack(hs, axis=2) * scale
    scores = jnp.einsum("bhqd,bhkd->bhqk", Qh, hs) * scale
    if attn_mask is not None:
        scores = scores + attn_mask
    attn = jax.nn.softmax(scores, axis=-1)
    ctx = jnp.einsum("bhqk,bhkd->bhqd", attn, Vh)
    ctx = ctx.transpose(0, 2, 1, 3).reshape(B, S_q, E)
    return ctx @ params["wo"] + params["bo"][0]


def init_params(key, embed_dim, num_heads):
    d_k = embed_dim // num_heads
    ks = jax.random.split(key, 6)

    def xavier(k, shape, fan_in, fan_out):
        bound = math.sqrt(6.0 / (fan_in + fan_out))
        return jax.random.uniform(k, shape, jnp.float32, -bound, bound)

    return {
        # linear weights pre-transposed to (in, out)
        "wq": xavier(ks[0], (embed_dim, embed_dim), embed_dim, embed_dim),
        "bq": jnp.zeros((1, embed_dim), jnp.float32),
        "wv": xavier(ks[1], (embed_dim, embed_dim), embed_dim, embed_dim),
        "bv": jnp.zeros((1, embed_dim), jnp.float32),
        "wr": xavier(ks[2], (embed_dim, embed_dim), embed_dim, embed_dim),
        "br": jnp.zeros((1, embed_dim), jnp.float32),
        "W_h": xavier(ks[3], (num_heads, d_k, d_k), d_k, d_k),
        "wo": xavier(ks[4], (embed_dim, embed_dim), embed_dim, embed_dim),
        "bo": 0.01 * jax.random.normal(ks[5], (1, embed_dim), jnp.float32),
    }


if __name__ == "__main__":
    # small shapes; B=8 folds into 4 grid blocks of 2 batch elements
    B, S, E, H = 8, 8, 32, 4
    d_k = E // H

    key = jax.random.PRNGKey(0)
    k_q, k_v, k_r, k_h, k_p = jax.random.split(key, 5)
    query = jax.random.normal(k_q, (B, S, E), jnp.float32)
    value = jax.random.normal(k_v, (B, S, E), jnp.float32)
    R = jax.random.normal(k_r, (B, S, E), jnp.float32)
    # torch code: h_0 = torch.randn(B, H, d_k) * 0.01 (made deterministic here)
    h0 = jax.random.normal(k_h, (B, H, d_k), jnp.float32) * 0.01
    # causal additive mask (S_q, S_k)
    causal = jnp.tril(jnp.ones((S, S), jnp.bool_))
    attn_mask = jnp.where(causal, 0.0, -1e9).astype(jnp.float32)

    params = init_params(k_p, E, H)

    out = recurrent_mha(query, value, R, h0, attn_mask, params, num_heads=H)
    out = jax.block_until_ready(out)

    ref = reference(query, value, R, h0, attn_mask, params, num_heads=H)
    assert out.shape == (B, S, E)
    max_err = float(jnp.max(jnp.abs(out - ref)))
    # bf16 weights/activations on the MXU (f32 accumulate) and a bf16 R
    # projection feeding the 8-step tanh recurrence, vs a pure-f32 reference.
    assert max_err < 8e-2, f"max abs diff {max_err}"

    print("KERNEL_OK")
</pallas_src>

<mosaic_0001>
module attributes {stable_mosaic.version = 11 : i64} {
  func.func @_rma_kernel(%arg0: i32, %arg1: memref<2x8x32xf32, #tpu.memory_space<vmem>>, %arg2: memref<2x8x32xf32, #tpu.memory_space<vmem>>, %arg3: memref<2x8x32xf32, #tpu.memory_space<vmem>>, %arg4: memref<2x1x32xf32, #tpu.memory_space<vmem>>, %arg5: memref<1x8x8xf32, #tpu.memory_space<vmem>>, %arg6: memref<4x32x8xbf16, #tpu.memory_space<vmem>>, %arg7: memref<4x1x8xf32, #tpu.memory_space<vmem>>, %arg8: memref<4x32x8xbf16, #tpu.memory_space<vmem>>, %arg9: memref<4x1x8xf32, #tpu.memory_space<vmem>>, %arg10: memref<32x32xbf16, #tpu.memory_space<vmem>>, %arg11: memref<1x32xf32, #tpu.memory_space<vmem>>, %arg12: memref<1x1x32xf32, #tpu.memory_space<vmem>>, %arg13: memref<4x8x32xbf16, #tpu.memory_space<vmem>>, %arg14: memref<1x32xf32, #tpu.memory_space<vmem>>, %arg15: memref<2x8x32xf32, #tpu.memory_space<vmem>>, %arg16: memref<2x8x32xf32, #tpu.memory_space<vmem>>) attributes {dimension_semantics = [#tpu.dimension_semantics<parallel>], iteration_bounds = array<i64: 4>, scalar_prefetch = 0 : i64, scratch_operands = 1 : i64, tpu.core_type = #tpu.core_type<tc>, window_params = [{transform_indices = @transform_0, window_bounds = array<i64: 2, 8, 32>}, {transform_indices = @transform_1, window_bounds = array<i64: 2, 8, 32>}, {transform_indices = @transform_2, window_bounds = array<i64: 2, 8, 32>}, {transform_indices = @transform_3, window_bounds = array<i64: 2, 1, 32>}, {pipeline_mode = #tpu.pipeline_mode<synchronous>, transform_indices = @transform_4, window_bounds = array<i64: 1, 8, 8>}, {pipeline_mode = #tpu.pipeline_mode<synchronous>, transform_indices = @transform_5, window_bounds = array<i64: 4, 32, 8>}, {pipeline_mode = #tpu.pipeline_mode<synchronous>, transform_indices = @transform_6, window_bounds = array<i64: 4, 1, 8>}, {pipeline_mode = #tpu.pipeline_mode<synchronous>, transform_indices = @transform_7, window_bounds = array<i64: 4, 32, 8>}, {pipeline_mode = #tpu.pipeline_mode<synchronous>, transform_indices = @transform_8, window_bounds = array<i64: 4, 1, 8>}, {pipeline_mode = #tpu.pipeline_mode<synchronous>, transform_indices = @transform_9, window_bounds = array<i64: 32, 32>}, {pipeline_mode = #tpu.pipeline_mode<synchronous>, transform_indices = @transform_10, window_bounds = array<i64: 1, 32>}, {pipeline_mode = #tpu.pipeline_mode<synchronous>, transform_indices = @transform_11, window_bounds = array<i64: 1, 1, 32>}, {pipeline_mode = #tpu.pipeline_mode<synchronous>, transform_indices = @transform_12, window_bounds = array<i64: 4, 8, 32>}, {pipeline_mode = #tpu.pipeline_mode<synchronous>, transform_indices = @transform_13, window_bounds = array<i64: 1, 32>}, {transform_indices = @transform_14, window_bounds = array<i64: 2, 8, 32>}]} {
    %c0 = arith.constant 0 : index
    %c0_0 = arith.constant 0 : index
    %c0_1 = arith.constant 0 : index
    %0 = vector.load %arg3[%c0, %c0_0, %c0_1] : memref<2x8x32xf32, #tpu.memory_space<vmem>>, vector<2x8x32xf32>
    %1 = vector.shape_cast %0 : vector<2x8x32xf32> to vector<16x32xf32>
    %2 = arith.truncf %1 : vector<16x32xf32> to vector<16x32xbf16>
    %c0_2 = arith.constant 0 : index
    %c0_3 = arith.constant 0 : index
    %3 = vector.load %arg10[%c0_2, %c0_3] : memref<32x32xbf16, #tpu.memory_space<vmem>>, vector<32x32xbf16>
    %cst = arith.constant dense<0.000000e+00> : vector<16x32xf32>
    %4 = tpu.matmul %2, %3, %cst {dimension_numbers = #tpu.dot_dimension_numbers<[1], [0], [0], [1], [0, 0, 1, 1], [], []>} : vector<16x32xbf16>, vector<32x32xbf16>, vector<16x32xf32> -> vector<16x32xf32>
    %c0_4 = arith.constant 0 : index
    %c0_5 = arith.constant 0 : index
    %5 = vector.load %arg11[%c0_4, %c0_5] : memref<1x32xf32, #tpu.memory_space<vmem>>, vector<1x32xf32>
    %6 = vector.broadcast %5 : vector<1x32xf32> to vector<16x32xf32>
    %7 = arith.addf %4, %6 : vector<16x32xf32>
    %8 = vector.shape_cast %7 : vector<16x32xf32> to vector<2x8x32xf32>
    %c0_6 = arith.constant 0 : index
    %c0_7 = arith.constant 0 : index
    %c0_8 = arith.constant 0 : index
    %9 = vector.load %arg12[%c0_6, %c0_7, %c0_8] : memref<1x1x32xf32, #tpu.memory_space<vmem>>, vector<1x1x32xf32>
    %c0_9 = arith.constant 0 : index
    %c0_10 = arith.constant 0 : index
    %c0_11 = arith.constant 0 : index
    %10 = vector.load %arg4[%c0_9, %c0_10, %c0_11] : memref<2x1x32xf32, #tpu.memory_space<vmem>>, vector<2x1x32xf32>
    %11 = vector.broadcast %9 : vector<1x1x32xf32> to vector<2x1x32xf32>
    %12 = arith.mulf %11, %10 : vector<2x1x32xf32>
    %13 = vector.extract_strided_slice %8 {offsets = [0, 0, 0], sizes = [2, 1, 32], strides = [1, 1, 1]} : vector<2x8x32xf32> to vector<2x1x32xf32>
    %14 = arith.addf %12, %13 : vector<2x1x32xf32>
    %15 = math.tanh %14 : vector<2x1x32xf32>
    %c0_12 = arith.constant 0 : index
    %c0_13 = arith.constant 0 : index
    %c0_14 = arith.constant 0 : index
    %16 = vector.load %arg16[%c0_12, %c0_13, %c0_14] : memref<2x8x32xf32, #tpu.memory_space<vmem>>, vector<2x1x32xf32>
    tpu.vector_store %arg16[%c0_12, %c0_13, %c0_14], %15 {strides = array<i32>} : memref<2x8x32xf32, #tpu.memory_space<vmem>>, vector<2x1x32xf32>,
    %17 = vector.broadcast %9 : vector<1x1x32xf32> to vector<2x1x32xf32>
    %18 = arith.mulf %17, %15 : vector<2x1x32xf32>
    %19 = vector.extract_strided_slice %8 {offsets = [0, 1, 0], sizes = [2, 1, 32], strides = [1, 1, 1]} : vector<2x8x32xf32> to vector<2x1x32xf32>
    %20 = arith.addf %18, %19 : vector<2x1x32xf32>
    %21 = math.tanh %20 : vector<2x1x32xf32>
    %c0_15 = arith.constant 0 : index
    %c1 = arith.constant 1 : index
    %c0_16 = arith.constant 0 : index
    %22 = vector.load %arg16[%c0_15, %c1, %c0_16] : memref<2x8x32xf32, #tpu.memory_space<vmem>>, vector<2x1x32xf32>
    tpu.vector_store %arg16[%c0_15, %c1, %c0_16], %21 {strides = array<i32>} : memref<2x8x32xf32, #tpu.memory_space<vmem>>, vector<2x1x32xf32>,
    %23 = vector.broadcast %9 : vector<1x1x32xf32> to vector<2x1x32xf32>
    %24 = arith.mulf %23, %21 : vector<2x1x32xf32>
    %25 = vector.extract_strided_slice %8 {offsets = [0, 2, 0], sizes = [2, 1, 32], strides = [1, 1, 1]} : vector<2x8x32xf32> to vector<2x1x32xf32>
    %26 = arith.addf %24, %25 : vector<2x1x32xf32>
    %27 = math.tanh %26 : vector<2x1x32xf32>
    %c0_17 = arith.constant 0 : index
    %c2 = arith.constant 2 : index
    %c0_18 = arith.constant 0 : index
    %28 = vector.load %arg16[%c0_17, %c2, %c0_18] : memref<2x8x32xf32, #tpu.memory_space<vmem>>, vector<2x1x32xf32>
    tpu.vector_store %arg16[%c0_17, %c2, %c0_18], %27 {strides = array<i32>} : memref<2x8x32xf32, #tpu.memory_space<vmem>>, vector<2x1x32xf32>,
    %29 = vector.broadcast %9 : vector<1x1x32xf32> to vector<2x1x32xf32>
    %30 = arith.mulf %29, %27 : vector<2x1x32xf32>
    %31 = vector.extract_strided_slice %8 {offsets = [0, 3, 0], sizes = [2, 1, 32], strides = [1, 1, 1]} : vector<2x8x32xf32> to vector<2x1x32xf32>
    %32 = arith.addf %30, %31 : vector<2x1x32xf32>
    %33 = math.tanh %32 : vector<2x1x32xf32>
    %c0_19 = arith.constant 0 : index
    %c3 = arith.constant 3 : index
    %c0_20 = arith.constant 0 : index
    %34 = vector.load %arg16[%c0_19, %c3, %c0_20] : memref<2x8x32xf32, #tpu.memory_space<vmem>>, vector<2x1x32xf32>
    tpu.vector_store %arg16[%c0_19, %c3, %c0_20], %33 {strides = array<i32>} : memref<2x8x32xf32, #tpu.memory_space<vmem>>, vector<2x1x32xf32>,
    %35 = vector.broadcast %9 : vector<1x1x32xf32> to vector<2x1x32xf32>
    %36 = arith.mulf %35, %33 : vector<2x1x32xf32>
    %37 = vector.extract_strided_slice %8 {offsets = [0, 4, 0], sizes = [2, 1, 32], strides = [1, 1, 1]} : vector<2x8x32xf32> to vector<2x1x32xf32>
    %38 = arith.addf %36, %37 : vector<2x1x32xf32>
    %39 = math.tanh %38 : vector<2x1x32xf32>
    %c0_21 = arith.constant 0 : index
    %c4 = arith.constant 4 : index
    %c0_22 = arith.constant 0 : index
    %40 = vector.load %arg16[%c0_21, %c4, %c0_22] : memref<2x8x32xf32, #tpu.memory_space<vmem>>, vector<2x1x32xf32>
    tpu.vector_store %arg16[%c0_21, %c4, %c0_22], %39 {strides = array<i32>} : memref<2x8x32xf32, #tpu.memory_space<vmem>>, vector<2x1x32xf32>,
    %41 = vector.broadcast %9 : vector<1x1x32xf32> to vector<2x1x32xf32>
    %42 = arith.mulf %41, %39 : vector<2x1x32xf32>
    %43 = vector.extract_strided_slice %8 {offsets = [0, 5, 0], sizes = [2, 1, 32], strides = [1, 1, 1]} : vector<2x8x32xf32> to vector<2x1x32xf32>
    %44 = arith.addf %42, %43 : vector<2x1x32xf32>
    %45 = math.tanh %44 : vector<2x1x32xf32>
    %c0_23 = arith.constant 0 : index
    %c5 = arith.constant 5 : index
    %c0_24 = arith.constant 0 : index
    %46 = vector.load %arg16[%c0_23, %c5, %c0_24] : memref<2x8x32xf32, #tpu.memory_space<vmem>>, vector<2x1x32xf32>
    tpu.vector_store %arg16[%c0_23, %c5, %c0_24], %45 {strides = array<i32>} : memref<2x8x32xf32, #tpu.memory_space<vmem>>, vector<2x1x32xf32>,
    %47 = vector.broadcast %9 : vector<1x1x32xf32> to vector<2x1x32xf32>
    %48 = arith.mulf %47, %45 : vector<2x1x32xf32>
    %49 = vector.extract_strided_slice %8 {offsets = [0, 6, 0], sizes = [2, 1, 32], strides = [1, 1, 1]} : vector<2x8x32xf32> to vector<2x1x32xf32>
    %50 = arith.addf %48, %49 : vector<2x1x32xf32>
    %51 = math.tanh %50 : vector<2x1x32xf32>
    %c0_25 = arith.constant 0 : index
    %c6 = arith.constant 6 : index
    %c0_26 = arith.constant 0 : index
    %52 = vector.load %arg16[%c0_25, %c6, %c0_26] : memref<2x8x32xf32, #tpu.memory_space<vmem>>, vector<2x1x32xf32>
    tpu.vector_store %arg16[%c0_25, %c6, %c0_26], %51 {strides = array<i32>} : memref<2x8x32xf32, #tpu.memory_space<vmem>>, vector<2x1x32xf32>,
    %53 = vector.broadcast %9 : vector<1x1x32xf32> to vector<2x1x32xf32>
    %54 = arith.mulf %53, %51 : vector<2x1x32xf32>
    %55 = vector.extract_strided_slice %8 {offsets = [0, 7, 0], sizes = [2, 1, 32], strides = [1, 1, 1]} : vector<2x8x32xf32> to vector<2x1x32xf32>
    %56 = arith.addf %54, %55 : vector<2x1x32xf32>
    %57 = math.tanh %56 : vector<2x1x32xf32>
    %c0_27 = arith.constant 0 : index
    %c7 = arith.constant 7 : index
    %c0_28 = arith.constant 0 : index
    %58 = vector.load %arg16[%c0_27, %c7, %c0_28] : memref<2x8x32xf32, #tpu.memory_space<vmem>>, vector<2x1x32xf32>
    tpu.vector_store %arg16[%c0_27, %c7, %c0_28], %57 {strides = array<i32>} : memref<2x8x32xf32, #tpu.memory_space<vmem>>, vector<2x1x32xf32>,
    %c0_29 = arith.constant 0 : index
    %c0_30 = arith.constant 0 : index
    %c0_31 = arith.constant 0 : index
    %59 = vector.load %arg1[%c0_29, %c0_30, %c0_31] : memref<2x8x32xf32, #tpu.memory_space<vmem>>, vector<2x8x32xf32>
    %60 = vector.shape_cast %59 : vector<2x8x32xf32> to vector<16x32xf32>
    %61 = arith.truncf %60 : vector<16x32xf32> to vector<16x32xbf16>
    %c0_32 = arith.constant 0 : index
    %c0_33 = arith.constant 0 : index
    %c0_34 = arith.constant 0 : index
    %62 = vector.load %arg2[%c0_32, %c0_33, %c0_34] : memref<2x8x32xf32, #tpu.memory_space<vmem>>, vector<2x8x32xf32>
    %63 = vector.shape_cast %62 : vector<2x8x32xf32> to vector<16x32xf32>
    %64 = arith.truncf %63 : vector<16x32xf32> to vector<16x32xbf16>
    %c0_35 = arith.constant 0 : index
    %c0_36 = arith.constant 0 : index
    %c0_37 = arith.constant 0 : index
    %65 = vector.load %arg5[%c0_35, %c0_36, %c0_37] : memref<1x8x8xf32, #tpu.memory_space<vmem>>, vector<1x8x8xf32>
    %66 = vector.shape_cast %65 : vector<1x8x8xf32> to vector<1x8x8xf32>
    %67 = vector.broadcast %66 : vector<1x8x8xf32> to vector<2x8x8xf32>
    %cst_38 = arith.constant 0.000000e+00 : f32
    %68 = vector.broadcast %cst_38 : f32 to vector<16x32xf32>
    %c0_39 = arith.constant 0 : index
    %c0_40 = arith.constant 0 : index
    %c0_41 = arith.constant 0 : index
    %69 = vector.load %arg6[%c0_39, %c0_40, %c0_41] : memref<4x32x8xbf16, #tpu.memory_space<vmem>>, vector<1x32x8xbf16>
    %70 = vector.shape_cast %69 : vector<1x32x8xbf16> to vector<32x8xbf16>
    %cst_42 = arith.constant dense<0.000000e+00> : vector<16x8xf32>
    %71 = tpu.matmul %61, %70, %cst_42 {dimension_numbers = #tpu.dot_dimension_numbers<[1], [0], [0], [1], [0, 0, 1, 1], [], []>} : vector<16x32xbf16>, vector<32x8xbf16>, vector<16x8xf32> -> vector<16x8xf32>
    %c0_43 = arith.constant 0 : index
    %c0_44 = arith.constant 0 : index
    %c0_45 = arith.constant 0 : index
    %72 = vector.load %arg7[%c0_43, %c0_44, %c0_45] : memref<4x1x8xf32, #tpu.memory_space<vmem>>, vector<1x1x8xf32>
    %73 = vector.shape_cast %72 : vector<1x1x8xf32> to vector<1x8xf32>
    %74 = vector.broadcast %73 : vector<1x8xf32> to vector<16x8xf32>
    %75 = arith.addf %71, %74 : vector<16x8xf32>
    %76 = vector.shape_cast %75 : vector<16x8xf32> to vector<2x8x8xf32>
    %c0_46 = arith.constant 0 : index
    %c0_47 = arith.constant 0 : index
    %c0_48 = arith.constant 0 : index
    %77 = vector.load %arg8[%c0_46, %c0_47, %c0_48] : memref<4x32x8xbf16, #tpu.memory_space<vmem>>, vector<1x32x8xbf16>
    %78 = vector.shape_cast %77 : vector<1x32x8xbf16> to vector<32x8xbf16>
    %cst_49 = arith.constant dense<0.000000e+00> : vector<16x8xf32>
    %79 = tpu.matmul %64, %78, %cst_49 {dimension_numbers = #tpu.dot_dimension_numbers<[1], [0], [0], [1], [0, 0, 1, 1], [], []>} : vector<16x32xbf16>, vector<32x8xbf16>, vector<16x8xf32> -> vector<16x8xf32>
    %c0_50 = arith.constant 0 : index
    %c0_51 = arith.constant 0 : index
    %c0_52 = arith.constant 0 : index
    %80 = vector.load %arg9[%c0_50, %c0_51, %c0_52] : memref<4x1x8xf32, #tpu.memory_space<vmem>>, vector<1x1x8xf32>
    %81 = vector.shape_cast %80 : vector<1x1x8xf32> to vector<1x8xf32>
    %82 = vector.broadcast %81 : vector<1x8xf32> to vector<16x8xf32>
    %83 = arith.addf %79, %82 : vector<16x8xf32>
    %84 = vector.shape_cast %83 : vector<16x8xf32> to vector<2x8x8xf32>
    %c0_53 = arith.constant 0 : index
    %c0_54 = arith.constant 0 : index
    %c0_55 = arith.constant 0 : index
    %85 = vector.load %arg16[%c0_53, %c0_54, %c0_55] : memref<2x8x32xf32, #tpu.memory_space<vmem>>, vector<2x8x8xf32>
    "tpu.trace_start"() <{level = 10 : i32, message = "bqd,bkd->bqk"}> : () -> ()
    %cst_56 = arith.constant dense<0.000000e+00> : vector<2x8x8xf32>
    %86 = tpu.matmul %76, %85, %cst_56 {dimension_numbers = #tpu.dot_dimension_numbers<[2], [2], [1], [1], [0, 0, 0, 1, 1, 1], [0], [0]>} : vector<2x8x8xf32>, vector<2x8x8xf32>, vector<2x8x8xf32> -> vector<2x8x8xf32>
    "tpu.trace_stop"() : () -> ()
    %87 = arith.addf %86, %67 : vector<2x8x8xf32>
    %cst_57 = arith.constant dense<0xFF800000> : vector<2x8xf32>
    %88 = vector.multi_reduction <maximumf>, %87, %cst_57 [2] : vector<2x8x8xf32> to vector<2x8xf32>
    %89 = vector.shape_cast %88 : vector<2x8xf32> to vector<2x8x1xf32>
    %90 = vector.broadcast %89 : vector<2x8x1xf32> to vector<2x8x8xf32>
    %91 = arith.subf %87, %90 : vector<2x8x8xf32>
    %92 = math.exp %91 : vector<2x8x8xf32>
    %cst_58 = arith.constant dense<0.000000e+00> : vector<2x8xf32>
    %93 = vector.multi_reduction <add>, %92, %cst_58 [2] : vector<2x8x8xf32> to vector<2x8xf32>
    %94 = vector.shape_cast %93 : vector<2x8xf32> to vector<2x8x1xf32>
    %95 = tpu.reciprocal %94 : vector<2x8x1xf32> -> vector<2x8x1xf32>
    %96 = vector.broadcast %95 : vector<2x8x1xf32> to vector<2x8x8xf32>
    %97 = arith.mulf %92, %96 : vector<2x8x8xf32>
    "tpu.trace_start"() <{level = 10 : i32, message = "bqk,bkd->bqd"}> : () -> ()
    %cst_59 = arith.constant dense<0.000000e+00> : vector<2x8x8xf32>
    %98 = tpu.matmul %97, %84, %cst_59 {dimension_numbers = #tpu.dot_dimension_numbers<[2], [1], [1], [2], [0, 0, 0, 1, 1, 2], [0], [0]>} : vector<2x8x8xf32>, vector<2x8x8xf32>, vector<2x8x8xf32> -> vector<2x8x8xf32>
    "tpu.trace_stop"() : () -> ()
    %99 = vector.shape_cast %98 : vector<2x8x8xf32> to vector<16x8xf32>
    %100 = arith.truncf %99 : vector<16x8xf32> to vector<16x8xbf16>
    %c0_60 = arith.constant 0 : index
    %c0_61 = arith.constant 0 : index
    %c0_62 = arith.constant 0 : index
    %101 = vector.load %arg13[%c0_60, %c0_61, %c0_62] : memref<4x8x32xbf16, #tpu.memory_space<vmem>>, vector<1x8x32xbf16>
    %102 = vector.shape_cast %101 : vector<1x8x32xbf16> to vector<8x32xbf16>
    %cst_63 = arith.constant dense<0.000000e+00> : vector<16x32xf32>
    %103 = tpu.matmul %100, %102, %cst_63 {dimension_numbers = #tpu.dot_dimension_numbers<[1], [0], [0], [1], [0, 0, 1, 1], [], []>} : vector<16x8xbf16>, vector<8x32xbf16>, vector<16x32xf32> -> vector<16x32xf32>
    %104 = arith.addf %68, %103 : vector<16x32xf32>
    %c1_64 = arith.constant 1 : index
    %c0_65 = arith.constant 0 : index
    %c0_66 = arith.constant 0 : index
    %105 = vector.load %arg6[%c1_64, %c0_65, %c0_66] : memref<4x32x8xbf16, #tpu.memory_space<vmem>>, vector<1x32x8xbf16>
    %106 = vector.shape_cast %105 : vector<1x32x8xbf16> to vector<32x8xbf16>
    %cst_67 = arith.constant dense<0.000000e+00> : vector<16x8xf32>
    %107 = tpu.matmul %61, %106, %cst_67 {dimension_numbers = #tpu.dot_dimension_numbers<[1], [0], [0], [1], [0, 0, 1, 1], [], []>} : vector<16x32xbf16>, vector<32x8xbf16>, vector<16x8xf32> -> vector<16x8xf32>
    %c1_68 = arith.constant 1 : index
    %c0_69 = arith.constant 0 : index
    %c0_70 = arith.constant 0 : index
    %108 = vector.load %arg7[%c1_68, %c0_69, %c0_70] : memref<4x1x8xf32, #tpu.memory_space<vmem>>, vector<1x1x8xf32>
    %109 = vector.shape_cast %108 : vector<1x1x8xf32> to vector<1x8xf32>
    %110 = vector.broadcast %109 : vector<1x8xf32> to vector<16x8xf32>
    %111 = arith.addf %107, %110 : vector<16x8xf32>
    %112 = vector.shape_cast %111 : vector<16x8xf32> to vector<2x8x8xf32>
    %c1_71 = arith.constant 1 : index
    %c0_72 = arith.constant 0 : index
    %c0_73 = arith.constant 0 : index
    %113 = vector.load %arg8[%c1_71, %c0_72, %c0_73] : memref<4x32x8xbf16, #tpu.memory_space<vmem>>, vector<1x32x8xbf16>
    %114 = vector.shape_cast %113 : vector<1x32x8xbf16> to vector<32x8xbf16>
    %cst_74 = arith.constant dense<0.000000e+00> : vector<16x8xf32>
    %115 = tpu.matmul %64, %114, %cst_74 {dimension_numbers = #tpu.dot_dimension_numbers<[1], [0], [0], [1], [0, 0, 1, 1], [], []>} : vector<16x32xbf16>, vector<32x8xbf16>, vector<16x8xf32> -> vector<16x8xf32>
    %c1_75 = arith.constant 1 : index
    %c0_76 = arith.constant 0 : index
    %c0_77 = arith.constant 0 : index
    %116 = vector.load %arg9[%c1_75, %c0_76, %c0_77] : memref<4x1x8xf32, #tpu.memory_space<vmem>>, vector<1x1x8xf32>
    %117 = vector.shape_cast %116 : vector<1x1x8xf32> to vector<1x8xf32>
    %118 = vector.broadcast %117 : vector<1x8xf32> to vector<16x8xf32>
    %119 = arith.addf %115, %118 : vector<16x8xf32>
    %120 = vector.shape_cast %119 : vector<16x8xf32> to vector<2x8x8xf32>
    %c0_78 = arith.constant 0 : index
    %c0_79 = arith.constant 0 : index
    %c8 = arith.constant 8 : index
    %121 = vector.load %arg16[%c0_78, %c0_79, %c8] : memref<2x8x32xf32, #tpu.memory_space<vmem>>, vector<2x8x8xf32>
    "tpu.trace_start"() <{level = 10 : i32, message = "bqd,bkd->bqk"}> : () -> ()
    %cst_80 = arith.constant dense<0.000000e+00> : vector<2x8x8xf32>
    %122 = tpu.matmul %112, %121, %cst_80 {dimension_numbers = #tpu.dot_dimension_numbers<[2], [2], [1], [1], [0, 0, 0, 1, 1, 1], [0], [0]>} : vector<2x8x8xf32>, vector<2x8x8xf32>, vector<2x8x8xf32> -> vector<2x8x8xf32>
    "tpu.trace_stop"() : () -> ()
    %123 = arith.addf %122, %67 : vector<2x8x8xf32>
    %cst_81 = arith.constant dense<0xFF800000> : vector<2x8xf32>
    %124 = vector.multi_reduction <maximumf>, %123, %cst_81 [2] : vector<2x8x8xf32> to vector<2x8xf32>
    %125 = vector.shape_cast %124 : vector<2x8xf32> to vector<2x8x1xf32>
    %126 = vector.broadcast %125 : vector<2x8x1xf32> to vector<2x8x8xf32>
    %127 = arith.subf %123, %126 : vector<2x8x8xf32>
    %128 = math.exp %127 : vector<2x8x8xf32>
    %cst_82 = arith.constant dense<0.000000e+00> : vector<2x8xf32>
    %129 = vector.multi_reduction <add>, %128, %cst_82 [2] : vector<2x8x8xf32> to vector<2x8xf32>
    %130 = vector.shape_cast %129 : vector<2x8xf32> to vector<2x8x1xf32>
    %131 = tpu.reciprocal %130 : vector<2x8x1xf32> -> vector<2x8x1xf32>
    %132 = vector.broadcast %131 : vector<2x8x1xf32> to vector<2x8x8xf32>
    %133 = arith.mulf %128, %132 : vector<2x8x8xf32>
    "tpu.trace_start"() <{level = 10 : i32, message = "bqk,bkd->bqd"}> : () -> ()
    %cst_83 = arith.constant dense<0.000000e+00> : vector<2x8x8xf32>
    %134 = tpu.matmul %133, %120, %cst_83 {dimension_numbers = #tpu.dot_dimension_numbers<[2], [1], [1], [2], [0, 0, 0, 1, 1, 2], [0], [0]>} : vector<2x8x8xf32>, vector<2x8x8xf32>, vector<2x8x8xf32> -> vector<2x8x8xf32>
    "tpu.trace_stop"() : () -> ()
    %135 = vector.shape_cast %134 : vector<2x8x8xf32> to vector<16x8xf32>
    %136 = arith.truncf %135 : vector<16x8xf32> to vector<16x8xbf16>
    %c1_84 = arith.constant 1 : index
    %c0_85 = arith.constant 0 : index
    %c0_86 = arith.constant 0 : index
    %137 = vector.load %arg13[%c1_84, %c0_85, %c0_86] : memref<4x8x32xbf16, #tpu.memory_space<vmem>>, vector<1x8x32xbf16>
    %138 = vector.shape_cast %137 : vector<1x8x32xbf16> to vector<8x32xbf16>
    %cst_87 = arith.constant dense<0.000000e+00> : vector<16x32xf32>
    %139 = tpu.matmul %136, %138, %cst_87 {dimension_numbers = #tpu.dot_dimension_numbers<[1], [0], [0], [1], [0, 0, 1, 1], [], []>} : vector<16x8xbf16>, vector<8x32xbf16>, vector<16x32xf32> -> vector<16x32xf32>
    %140 = arith.addf %104, %139 : vector<16x32xf32>
    %c2_88 = arith.constant 2 : index
    %c0_89 = arith.constant 0 : index
    %c0_90 = arith.constant 0 : index
    %141 = vector.load %arg6[%c2_88, %c0_89, %c0_90] : memref<4x32x8xbf16, #tpu.memory_space<vmem>>, vector<1x32x8xbf16>
    %142 = vector.shape_cast %141 : vector<1x32x8xbf16> to vector<32x8xbf16>
    %cst_91 = arith.constant dense<0.000000e+00> : vector<16x8xf32>
    %143 = tpu.matmul %61, %142, %cst_91 {dimension_numbers = #tpu.dot_dimension_numbers<[1], [0], [0], [1], [0, 0, 1, 1], [], []>} : vector<16x32xbf16>, vector<32x8xbf16>, vector<16x8xf32> -> vector<16x8xf32>
    %c2_92 = arith.constant 2 : index
    %c0_93 = arith.constant 0 : index
    %c0_94 = arith.constant 0 : index
    %144 = vector.load %arg7[%c2_92, %c0_93, %c0_94] : memref<4x1x8xf32, #tpu.memory_space<vmem>>, vector<1x1x8xf32>
    %145 = vector.shape_cast %144 : vector<1x1x8xf32> to vector<1x8xf32>
    %146 = vector.broadcast %145 : vector<1x8xf32> to vector<16x8xf32>
    %147 = arith.addf %143, %146 : vector<16x8xf32>
    %148 = vector.shape_cast %147 : vector<16x8xf32> to vector<2x8x8xf32>
    %c2_95 = arith.constant 2 : index
    %c0_96 = arith.constant 0 : index
    %c0_97 = arith.constant 0 : index
    %149 = vector.load %arg8[%c2_95, %c0_96, %c0_97] : memref<4x32x8xbf16, #tpu.memory_space<vmem>>, vector<1x32x8xbf16>
    %150 = vector.shape_cast %149 : vector<1x32x8xbf16> to vector<32x8xbf16>
    %cst_98 = arith.constant dense<0.000000e+00> : vector<16x8xf32>
    %151 = tpu.matmul %64, %150, %cst_98 {dimension_numbers = #tpu.dot_dimension_numbers<[1], [0], [0], [1], [0, 0, 1, 1], [], []>} : vector<16x32xbf16>, vector<32x8xbf16>, vector<16x8xf32> -> vector<16x8xf32>
    %c2_99 = arith.constant 2 : index
    %c0_100 = arith.constant 0 : index
    %c0_101 = arith.constant 0 : index
    %152 = vector.load %arg9[%c2_99, %c0_100, %c0_101] : memref<4x1x8xf32, #tpu.memory_space<vmem>>, vector<1x1x8xf32>
    %153 = vector.shape_cast %152 : vector<1x1x8xf32> to vector<1x8xf32>
    %154 = vector.broadcast %153 : vector<1x8xf32> to vector<16x8xf32>
    %155 = arith.addf %151, %154 : vector<16x8xf32>
    %156 = vector.shape_cast %155 : vector<16x8xf32> to vector<2x8x8xf32>
    %c0_102 = arith.constant 0 : index
    %c0_103 = arith.constant 0 : index
    %c16 = arith.constant 16 : index
    %157 = vector.load %arg16[%c0_102, %c0_103, %c16] : memref<2x8x32xf32, #tpu.memory_space<vmem>>, vector<2x8x8xf32>
    "tpu.trace_start"() <{level = 10 : i32, message = "bqd,bkd->bqk"}> : () -> ()
    %cst_104 = arith.constant dense<0.000000e+00> : vector<2x8x8xf32>
    %158 = tpu.matmul %148, %157, %cst_104 {dimension_numbers = #tpu.dot_dimension_numbers<[2], [2], [1], [1], [0, 0, 0, 1, 1, 1], [0], [0]>} : vector<2x8x8xf32>, vector<2x8x8xf32>, vector<2x8x8xf32> -> vector<2x8x8xf32>
    "tpu.trace_stop"() : () -> ()
    %159 = arith.addf %158, %67 : vector<2x8x8xf32>
    %cst_105 = arith.constant dense<0xFF800000> : vector<2x8xf32>
    %160 = vector.multi_reduction <maximumf>, %159, %cst_105 [2] : vector<2x8x8xf32> to vector<2x8xf32>
    %161 = vector.shape_cast %160 : vector<2x8xf32> to vector<2x8x1xf32>
    %162 = vector.broadcast %161 : vector<2x8x1xf32> to vector<2x8x8xf32>
    %163 = arith.subf %159, %162 : vector<2x8x8xf32>
    %164 = math.exp %163 : vector<2x8x8xf32>
    %cst_106 = arith.constant dense<0.000000e+00> : vector<2x8xf32>
    %165 = vector.multi_reduction <add>, %164, %cst_106 [2] : vector<2x8x8xf32> to vector<2x8xf32>
    %166 = vector.shape_cast %165 : vector<2x8xf32> to vector<2x8x1xf32>
    %167 = tpu.reciprocal %166 : vector<2x8x1xf32> -> vector<2x8x1xf32>
    %168 = vector.broadcast %167 : vector<2x8x1xf32> to vector<2x8x8xf32>
    %169 = arith.mulf %164, %168 : vector<2x8x8xf32>
    "tpu.trace_start"() <{level = 10 : i32, message = "bqk,bkd->bqd"}> : () -> ()
    %cst_107 = arith.constant dense<0.000000e+00> : vector<2x8x8xf32>
    %170 = tpu.matmul %169, %156, %cst_107 {dimension_numbers = #tpu.dot_dimension_numbers<[2], [1], [1], [2], [0, 0, 0, 1, 1, 2], [0], [0]>} : vector<2x8x8xf32>, vector<2x8x8xf32>, vector<2x8x8xf32> -> vector<2x8x8xf32>
    "tpu.trace_stop"() : () -> ()
    %171 = vector.shape_cast %170 : vector<2x8x8xf32> to vector<16x8xf32>
    %172 = arith.truncf %171 : vector<16x8xf32> to vector<16x8xbf16>
    %c2_108 = arith.constant 2 : index
    %c0_109 = arith.constant 0 : index
    %c0_110 = arith.constant 0 : index
    %173 = vector.load %arg13[%c2_108, %c0_109, %c0_110] : memref<4x8x32xbf16, #tpu.memory_space<vmem>>, vector<1x8x32xbf16>
    %174 = vector.shape_cast %173 : vector<1x8x32xbf16> to vector<8x32xbf16>
    %cst_111 = arith.constant dense<0.000000e+00> : vector<16x32xf32>
    %175 = tpu.matmul %172, %174, %cst_111 {dimension_numbers = #tpu.dot_dimension_numbers<[1], [0], [0], [1], [0, 0, 1, 1], [], []>} : vector<16x8xbf16>, vector<8x32xbf16>, vector<16x32xf32> -> vector<16x32xf32>
    %176 = arith.addf %140, %175 : vector<16x32xf32>
    %c3_112 = arith.constant 3 : index
    %c0_113 = arith.constant 0 : index
    %c0_114 = arith.constant 0 : index
    %177 = vector.load %arg6[%c3_112, %c0_113, %c0_114] : memref<4x32x8xbf16, #tpu.memory_space<vmem>>, vector<1x32x8xbf16>
    %178 = vector.shape_cast %177 : vector<1x32x8xbf16> to vector<32x8xbf16>
    %cst_115 = arith.constant dense<0.000000e+00> : vector<16x8xf32>
    %179 = tpu.matmul %61, %178, %cst_115 {dimension_numbers = #tpu.dot_dimension_numbers<[1], [0], [0], [1], [0, 0, 1, 1], [], []>} : vector<16x32xbf16>, vector<32x8xbf16>, vector<16x8xf32> -> vector<16x8xf32>
    %c3_116 = arith.constant 3 : index
    %c0_117 = arith.constant 0 : index
    %c0_118 = arith.constant 0 : index
    %180 = vector.load %arg7[%c3_116, %c0_117, %c0_118] : memref<4x1x8xf32, #tpu.memory_space<vmem>>, vector<1x1x8xf32>
    %181 = vector.shape_cast %180 : vector<1x1x8xf32> to vector<1x8xf32>
    %182 = vector.broadcast %181 : vector<1x8xf32> to vector<16x8xf32>
    %183 = arith.addf %179, %182 : vector<16x8xf32>
    %184 = vector.shape_cast %183 : vector<16x8xf32> to vector<2x8x8xf32>
    %c3_119 = arith.constant 3 : index
    %c0_120 = arith.constant 0 : index
    %c0_121 = arith.constant 0 : index
    %185 = vector.load %arg8[%c3_119, %c0_120, %c0_121] : memref<4x32x8xbf16, #tpu.memory_space<vmem>>, vector<1x32x8xbf16>
    %186 = vector.shape_cast %185 : vector<1x32x8xbf16> to vector<32x8xbf16>
    %cst_122 = arith.constant dense<0.000000e+00> : vector<16x8xf32>
    %187 = tpu.matmul %64, %186, %cst_122 {dimension_numbers = #tpu.dot_dimension_numbers<[1], [0], [0], [1], [0, 0, 1, 1], [], []>} : vector<16x32xbf16>, vector<32x8xbf16>, vector<16x8xf32> -> vector<16x8xf32>
    %c3_123 = arith.constant 3 : index
    %c0_124 = arith.constant 0 : index
    %c0_125 = arith.constant 0 : index
    %188 = vector.load %arg9[%c3_123, %c0_124, %c0_125] : memref<4x1x8xf32, #tpu.memory_space<vmem>>, vector<1x1x8xf32>
    %189 = vector.shape_cast %188 : vector<1x1x8xf32> to vector<1x8xf32>
    %190 = vector.broadcast %189 : vector<1x8xf32> to vector<16x8xf32>
    %191 = arith.addf %187, %190 : vector<16x8xf32>
    %192 = vector.shape_cast %191 : vector<16x8xf32> to vector<2x8x8xf32>
    %c0_126 = arith.constant 0 : index
    %c0_127 = arith.constant 0 : index
    %c24 = arith.constant 24 : index
    %193 = vector.load %arg16[%c0_126, %c0_127, %c24] : memref<2x8x32xf32, #tpu.memory_space<vmem>>, vector<2x8x8xf32>
    "tpu.trace_start"() <{level = 10 : i32, message = "bqd,bkd->bqk"}> : () -> ()
    %cst_128 = arith.constant dense<0.000000e+00> : vector<2x8x8xf32>
    %194 = tpu.matmul %184, %193, %cst_128 {dimension_numbers = #tpu.dot_dimension_numbers<[2], [2], [1], [1], [0, 0, 0, 1, 1, 1], [0], [0]>} : vector<2x8x8xf32>, vector<2x8x8xf32>, vector<2x8x8xf32> -> vector<2x8x8xf32>
    "tpu.trace_stop"() : () -> ()
    %195 = arith.addf %194, %67 : vector<2x8x8xf32>
    %cst_129 = arith.constant dense<0xFF800000> : vector<2x8xf32>
    %196 = vector.multi_reduction <maximumf>, %195, %cst_129 [2] : vector<2x8x8xf32> to vector<2x8xf32>
    %197 = vector.shape_cast %196 : vector<2x8xf32> to vector<2x8x1xf32>
    %198 = vector.broadcast %197 : vector<2x8x1xf32> to vector<2x8x8xf32>
    %199 = arith.subf %195, %198 : vector<2x8x8xf32>
    %200 = math.exp %199 : vector<2x8x8xf32>
    %cst_130 = arith.constant dense<0.000000e+00> : vector<2x8xf32>
    %201 = vector.multi_reduction <add>, %200, %cst_130 [2] : vector<2x8x8xf32> to vector<2x8xf32>
    %202 = vector.shape_cast %201 : vector<2x8xf32> to vector<2x8x1xf32>
    %203 = tpu.reciprocal %202 : vector<2x8x1xf32> -> vector<2x8x1xf32>
    %204 = vector.broadcast %203 : vector<2x8x1xf32> to vector<2x8x8xf32>
    %205 = arith.mulf %200, %204 : vector<2x8x8xf32>
    "tpu.trace_start"() <{level = 10 : i32, message = "bqk,bkd->bqd"}> : () -> ()
    %cst_131 = arith.constant dense<0.000000e+00> : vector<2x8x8xf32>
    %206 = tpu.matmul %205, %192, %cst_131 {dimension_numbers = #tpu.dot_dimension_numbers<[2], [1], [1], [2], [0, 0, 0, 1, 1, 2], [0], [0]>} : vector<2x8x8xf32>, vector<2x8x8xf32>, vector<2x8x8xf32> -> vector<2x8x8xf32>
    "tpu.trace_stop"() : () -> ()
    %207 = vector.shape_cast %206 : vector<2x8x8xf32> to vector<16x8xf32>
    %208 = arith.truncf %207 : vector<16x8xf32> to vector<16x8xbf16>
    %c3_132 = arith.constant 3 : index
    %c0_133 = arith.constant 0 : index
    %c0_134 = arith.constant 0 : index
    %209 = vector.load %arg13[%c3_132, %c0_133, %c0_134] : memref<4x8x32xbf16, #tpu.memory_space<vmem>>, vector<1x8x32xbf16>
    %210 = vector.shape_cast %209 : vector<1x8x32xbf16> to vector<8x32xbf16>
    %cst_135 = arith.constant dense<0.000000e+00> : vector<16x32xf32>
    %211 = tpu.matmul %208, %210, %cst_135 {dimension_numbers = #tpu.dot_dimension_numbers<[1], [0], [0], [1], [0, 0, 1, 1], [], []>} : vector<16x8xbf16>, vector<8x32xbf16>, vector<16x32xf32> -> vector<16x32xf32>
    %212 = arith.addf %176, %211 : vector<16x32xf32>
    %c0_136 = arith.constant 0 : index
    %c0_137 = arith.constant 0 : index
    %213 = vector.load %arg14[%c0_136, %c0_137] : memref<1x32xf32, #tpu.memory_space<vmem>>, vector<1x32xf32>
    %214 = vector.broadcast %213 : vector<1x32xf32> to vector<16x32xf32>
    %215 = arith.addf %212, %214 : vector<16x32xf32>
    %216 = vector.shape_cast %215 : vector<16x32xf32> to vector<2x8x32xf32>
    %c0_138 = arith.constant 0 : index
    %c0_139 = arith.constant 0 : index
    %c0_140 = arith.constant 0 : index
    %217 = vector.load %arg15[%c0_138, %c0_139, %c0_140] : memref<2x8x32xf32, #tpu.memory_space<vmem>>, vector<2x8x32xf32>
    tpu.vector_store %arg15[%c0_138, %c0_139, %c0_140], %216 {strides = array<i32>} : memref<2x8x32xf32, #tpu.memory_space<vmem>>, vector<2x8x32xf32>,
    return
  }
  func.func @transform_0(%arg0: i32) -> (i32, i32, i32) {
    %c0_i32 = arith.constant 0 : i32
    %c0_i32_0 = arith.constant 0 : i32
    %c0_i32_1 = arith.constant 0 : i32
    return %arg0, %c0_i32, %c0_i32_0 : i32, i32, i32
  }
  func.func @transform_1(%arg0: i32) -> (i32, i32, i32) {
    %c0_i32 = arith.constant 0 : i32
    %c0_i32_0 = arith.constant 0 : i32
    %c0_i32_1 = arith.constant 0 : i32
    return %arg0, %c0_i32, %c0_i32_0 : i32, i32, i32
  }
  func.func @transform_2(%arg0: i32) -> (i32, i32, i32) {
    %c0_i32 = arith.constant 0 : i32
    %c0_i32_0 = arith.constant 0 : i32
    %c0_i32_1 = arith.constant 0 : i32
    return %arg0, %c0_i32, %c0_i32_0 : i32, i32, i32
  }
  func.func @transform_3(%arg0: i32) -> (i32, i32, i32) {
    %c0_i32 = arith.constant 0 : i32
    %c0_i32_0 = arith.constant 0 : i32
    %c0_i32_1 = arith.constant 0 : i32
    return %arg0, %c0_i32, %c0_i32_0 : i32, i32, i32
  }
  func.func @transform_4(%arg0: i32) -> (i32, i32, i32) {
    %c0_i32 = arith.constant 0 : i32
    %c0_i32_0 = arith.constant 0 : i32
    %c0_i32_1 = arith.constant 0 : i32
    %c0_i32_2 = arith.constant 0 : i32
    return %c0_i32, %c0_i32_0, %c0_i32_1 : i32, i32, i32
  }
  func.func @transform_5(%arg0: i32) -> (i32, i32, i32) {
    %c0_i32 = arith.constant 0 : i32
    %c0_i32_0 = arith.constant 0 : i32
    %c0_i32_1 = arith.constant 0 : i32
    %c0_i32_2 = arith.constant 0 : i32
    return %c0_i32, %c0_i32_0, %c0_i32_1 : i32, i32, i32
  }
  func.func @transform_6(%arg0: i32) -> (i32, i32, i32) {
    %c0_i32 = arith.constant 0 : i32
    %c0_i32_0 = arith.constant 0 : i32
    %c0_i32_1 = arith.constant 0 : i32
    %c0_i32_2 = arith.constant 0 : i32
    return %c0_i32, %c0_i32_0, %c0_i32_1 : i32, i32, i32
  }
  func.func @transform_7(%arg0: i32) -> (i32, i32, i32) {
    %c0_i32 = arith.constant 0 : i32
    %c0_i32_0 = arith.constant 0 : i32
    %c0_i32_1 = arith.constant 0 : i32
    %c0_i32_2 = arith.constant 0 : i32
    return %c0_i32, %c0_i32_0, %c0_i32_1 : i32, i32, i32
  }
  func.func @transform_8(%arg0: i32) -> (i32, i32, i32) {
    %c0_i32 = arith.constant 0 : i32
    %c0_i32_0 = arith.constant 0 : i32
    %c0_i32_1 = arith.constant 0 : i32
    %c0_i32_2 = arith.constant 0 : i32
    return %c0_i32, %c0_i32_0, %c0_i32_1 : i32, i32, i32
  }
  func.func @transform_9(%arg0: i32) -> (i32, i32) {
    %c0_i32 = arith.constant 0 : i32
    %c0_i32_0 = arith.constant 0 : i32
    %c0_i32_1 = arith.constant 0 : i32
    return %c0_i32, %c0_i32_0 : i32, i32
  }
  func.func @transform_10(%arg0: i32) -> (i32, i32) {
    %c0_i32 = arith.constant 0 : i32
    %c0_i32_0 = arith.constant 0 : i32
    %c0_i32_1 = arith.constant 0 : i32
    return %c0_i32, %c0_i32_0 : i32, i32
  }
  func.func @transform_11(%arg0: i32) -> (i32, i32, i32) {
    %c0_i32 = arith.constant 0 : i32
    %c0_i32_0 = arith.constant 0 : i32
    %c0_i32_1 = arith.constant 0 : i32
    %c0_i32_2 = arith.constant 0 : i32
    return %c0_i32, %c0_i32_0, %c0_i32_1 : i32, i32, i32
  }
  func.func @transform_12(%arg0: i32) -> (i32, i32, i32) {
    %c0_i32 = arith.constant 0 : i32
    %c0_i32_0 = arith.constant 0 : i32
    %c0_i32_1 = arith.constant 0 : i32
    %c0_i32_2 = arith.constant 0 : i32
    return %c0_i32, %c0_i32_0, %c0_i32_1 : i32, i32, i32
  }
  func.func @transform_13(%arg0: i32) -> (i32, i32) {
    %c0_i32 = arith.constant 0 : i32
    %c0_i32_0 = arith.constant 0 : i32
    %c0_i32_1 = arith.constant 0 : i32
    return %c0_i32, %c0_i32_0 : i32, i32
  }
  func.func @transform_14(%arg0: i32) -> (i32, i32, i32) {
    %c0_i32 = arith.constant 0 : i32
    %c0_i32_0 = arith.constant 0 : i32
    %c0_i32_1 = arith.constant 0 : i32
    return %arg0, %c0_i32, %c0_i32_0 : i32, i32, i32
  }
}

module attributes {stable_mosaic.version = 11 : i64} {
  func.func @_rma_kernel(%arg0: i32, %arg1: memref<2x8x32xf32, #tpu.memory_space<vmem>>, %arg2: memref<2x8x32xf32, #tpu.memory_space<vmem>>, %arg3: memref<2x8x32xf32, #tpu.memory_space<vmem>>, %arg4: memref<2x1x32xf32, #tpu.memory_space<vmem>>, %arg5: memref<1x8x8xf32, #tpu.memory_space<vmem>>, %arg6: memref<4x32x8xbf16, #tpu.memory_space<vmem>>, %arg7: memref<4x1x8xf32, #tpu.memory_space<vmem>>, %arg8: memref<4x32x8xbf16, #tpu.memory_space<vmem>>, %arg9: memref<4x1x8xf32, #tpu.memory_space<vmem>>, %arg10: memref<32x32xbf16, #tpu.memory_space<vmem>>, %arg11: memref<1x32xf32, #tpu.memory_space<vmem>>, %arg12: memref<1x1x32xf32, #tpu.memory_space<vmem>>, %arg13: memref<4x8x32xbf16, #tpu.memory_space<vmem>>, %arg14: memref<1x32xf32, #tpu.memory_space<vmem>>, %arg15: memref<2x8x32xf32, #tpu.memory_space<vmem>>, %arg16: memref<2x8x32xf32, #tpu.memory_space<vmem>>) attributes {dimension_semantics = [#tpu.dimension_semantics<parallel>], iteration_bounds = array<i64: 4>, scalar_prefetch = 0 : i64, scratch_operands = 1 : i64, tpu.core_type = #tpu.core_type<tc>, window_params = [{transform_indices = @transform_0, window_bounds = array<i64: 2, 8, 32>}, {transform_indices = @transform_1, window_bounds = array<i64: 2, 8, 32>}, {transform_indices = @transform_2, window_bounds = array<i64: 2, 8, 32>}, {transform_indices = @transform_3, window_bounds = array<i64: 2, 1, 32>}, {pipeline_mode = #tpu.pipeline_mode<synchronous>, transform_indices = @transform_4, window_bounds = array<i64: 1, 8, 8>}, {pipeline_mode = #tpu.pipeline_mode<synchronous>, transform_indices = @transform_5, window_bounds = array<i64: 4, 32, 8>}, {pipeline_mode = #tpu.pipeline_mode<synchronous>, transform_indices = @transform_6, window_bounds = array<i64: 4, 1, 8>}, {pipeline_mode = #tpu.pipeline_mode<synchronous>, transform_indices = @transform_7, window_bounds = array<i64: 4, 32, 8>}, {pipeline_mode = #tpu.pipeline_mode<synchronous>, transform_indices = @transform_8, window_bounds = array<i64: 4, 1, 8>}, {pipeline_mode = #tpu.pipeline_mode<synchronous>, transform_indices = @transform_9, window_bounds = array<i64: 32, 32>}, {pipeline_mode = #tpu.pipeline_mode<synchronous>, transform_indices = @transform_10, window_bounds = array<i64: 1, 32>}, {pipeline_mode = #tpu.pipeline_mode<synchronous>, transform_indices = @transform_11, window_bounds = array<i64: 1, 1, 32>}, {pipeline_mode = #tpu.pipeline_mode<synchronous>, transform_indices = @transform_12, window_bounds = array<i64: 4, 8, 32>}, {pipeline_mode = #tpu.pipeline_mode<synchronous>, transform_indices = @transform_13, window_bounds = array<i64: 1, 32>}, {transform_indices = @transform_14, window_bounds = array<i64: 2, 8, 32>}]} {
    %c0 = arith.constant 0 : index
    %c0_0 = arith.constant 0 : index
    %c0_1 = arith.constant 0 : index
    %0 = vector.load %arg3[%c0, %c0_0, %c0_1] : memref<2x8x32xf32, #tpu.memory_space<vmem>>, vector<2x8x32xf32>
    %1 = vector.shape_cast %0 : vector<2x8x32xf32> to vector<16x32xf32>
    %2 = arith.truncf %1 : vector<16x32xf32> to vector<16x32xbf16>
    %c0_2 = arith.constant 0 : index
    %c0_3 = arith.constant 0 : index
    %3 = vector.load %arg10[%c0_2, %c0_3] : memref<32x32xbf16, #tpu.memory_space<vmem>>, vector<32x32xbf16>
    %cst = arith.constant dense<0.000000e+00> : vector<16x32xf32>
    %4 = tpu.matmul %2, %3, %cst {dimension_numbers = #tpu.dot_dimension_numbers<[1], [0], [0], [1], [0, 0, 1, 1], [], []>} : vector<16x32xbf16>, vector<32x32xbf16>, vector<16x32xf32> -> vector<16x32xf32>
    %c0_4 = arith.constant 0 : index
    %c0_5 = arith.constant 0 : index
    %5 = vector.load %arg11[%c0_4, %c0_5] : memref<1x32xf32, #tpu.memory_space<vmem>>, vector<1x32xf32>
    %6 = vector.broadcast %5 : vector<1x32xf32> to vector<16x32xf32>
    %7 = arith.addf %4, %6 : vector<16x32xf32>
    %8 = vector.shape_cast %7 : vector<16x32xf32> to vector<2x8x32xf32>
    %c0_6 = arith.constant 0 : index
    %c0_7 = arith.constant 0 : index
    %c0_8 = arith.constant 0 : index
    %9 = vector.load %arg12[%c0_6, %c0_7, %c0_8] : memref<1x1x32xf32, #tpu.memory_space<vmem>>, vector<1x1x32xf32>
    %c0_9 = arith.constant 0 : index
    %c0_10 = arith.constant 0 : index
    %c0_11 = arith.constant 0 : index
    %10 = vector.load %arg4[%c0_9, %c0_10, %c0_11] : memref<2x1x32xf32, #tpu.memory_space<vmem>>, vector<2x1x32xf32>
    %11 = vector.broadcast %9 : vector<1x1x32xf32> to vector<2x1x32xf32>
    %12 = arith.mulf %11, %10 : vector<2x1x32xf32>
    %13 = vector.extract_strided_slice %8 {offsets = [0, 0, 0], sizes = [2, 1, 32], strides = [1, 1, 1]} : vector<2x8x32xf32> to vector<2x1x32xf32>
    %14 = arith.addf %12, %13 : vector<2x1x32xf32>
    %15 = math.tanh %14 : vector<2x1x32xf32>
    %c0_12 = arith.constant 0 : index
    %c0_13 = arith.constant 0 : index
    %c0_14 = arith.constant 0 : index
    %16 = vector.load %arg16[%c0_12, %c0_13, %c0_14] : memref<2x8x32xf32, #tpu.memory_space<vmem>>, vector<2x1x32xf32>
    tpu.vector_store %arg16[%c0_12, %c0_13, %c0_14], %15 {strides = array<i32>} : memref<2x8x32xf32, #tpu.memory_space<vmem>>, vector<2x1x32xf32>,
    %17 = vector.broadcast %9 : vector<1x1x32xf32> to vector<2x1x32xf32>
    %18 = arith.mulf %17, %15 : vector<2x1x32xf32>
    %19 = vector.extract_strided_slice %8 {offsets = [0, 1, 0], sizes = [2, 1, 32], strides = [1, 1, 1]} : vector<2x8x32xf32> to vector<2x1x32xf32>
    %20 = arith.addf %18, %19 : vector<2x1x32xf32>
    %21 = math.tanh %20 : vector<2x1x32xf32>
    %c0_15 = arith.constant 0 : index
    %c1 = arith.constant 1 : index
    %c0_16 = arith.constant 0 : index
    %22 = vector.load %arg16[%c0_15, %c1, %c0_16] : memref<2x8x32xf32, #tpu.memory_space<vmem>>, vector<2x1x32xf32>
    tpu.vector_store %arg16[%c0_15, %c1, %c0_16], %21 {strides = array<i32>} : memref<2x8x32xf32, #tpu.memory_space<vmem>>, vector<2x1x32xf32>,
    %23 = vector.broadcast %9 : vector<1x1x32xf32> to vector<2x1x32xf32>
    %24 = arith.mulf %23, %21 : vector<2x1x32xf32>
    %25 = vector.extract_strided_slice %8 {offsets = [0, 2, 0], sizes = [2, 1, 32], strides = [1, 1, 1]} : vector<2x8x32xf32> to vector<2x1x32xf32>
    %26 = arith.addf %24, %25 : vector<2x1x32xf32>
    %27 = math.tanh %26 : vector<2x1x32xf32>
    %c0_17 = arith.constant 0 : index
    %c2 = arith.constant 2 : index
    %c0_18 = arith.constant 0 : index
    %28 = vector.load %arg16[%c0_17, %c2, %c0_18] : memref<2x8x32xf32, #tpu.memory_space<vmem>>, vector<2x1x32xf32>
    tpu.vector_store %arg16[%c0_17, %c2, %c0_18], %27 {strides = array<i32>} : memref<2x8x32xf32, #tpu.memory_space<vmem>>, vector<2x1x32xf32>,
    %29 = vector.broadcast %9 : vector<1x1x32xf32> to vector<2x1x32xf32>
    %30 = arith.mulf %29, %27 : vector<2x1x32xf32>
    %31 = vector.extract_strided_slice %8 {offsets = [0, 3, 0], sizes = [2, 1, 32], strides = [1, 1, 1]} : vector<2x8x32xf32> to vector<2x1x32xf32>
    %32 = arith.addf %30, %31 : vector<2x1x32xf32>
    %33 = math.tanh %32 : vector<2x1x32xf32>
    %c0_19 = arith.constant 0 : index
    %c3 = arith.constant 3 : index
    %c0_20 = arith.constant 0 : index
    %34 = vector.load %arg16[%c0_19, %c3, %c0_20] : memref<2x8x32xf32, #tpu.memory_space<vmem>>, vector<2x1x32xf32>
    tpu.vector_store %arg16[%c0_19, %c3, %c0_20], %33 {strides = array<i32>} : memref<2x8x32xf32, #tpu.memory_space<vmem>>, vector<2x1x32xf32>,
    %35 = vector.broadcast %9 : vector<1x1x32xf32> to vector<2x1x32xf32>
    %36 = arith.mulf %35, %33 : vector<2x1x32xf32>
    %37 = vector.extract_strided_slice %8 {offsets = [0, 4, 0], sizes = [2, 1, 32], strides = [1, 1, 1]} : vector<2x8x32xf32> to vector<2x1x32xf32>
    %38 = arith.addf %36, %37 : vector<2x1x32xf32>
    %39 = math.tanh %38 : vector<2x1x32xf32>
    %c0_21 = arith.constant 0 : index
    %c4 = arith.constant 4 : index
    %c0_22 = arith.constant 0 : index
    %40 = vector.load %arg16[%c0_21, %c4, %c0_22] : memref<2x8x32xf32, #tpu.memory_space<vmem>>, vector<2x1x32xf32>
    tpu.vector_store %arg16[%c0_21, %c4, %c0_22], %39 {strides = array<i32>} : memref<2x8x32xf32, #tpu.memory_space<vmem>>, vector<2x1x32xf32>,
    %41 = vector.broadcast %9 : vector<1x1x32xf32> to vector<2x1x32xf32>
    %42 = arith.mulf %41, %39 : vector<2x1x32xf32>
    %43 = vector.extract_strided_slice %8 {offsets = [0, 5, 0], sizes = [2, 1, 32], strides = [1, 1, 1]} : vector<2x8x32xf32> to vector<2x1x32xf32>
    %44 = arith.addf %42, %43 : vector<2x1x32xf32>
    %45 = math.tanh %44 : vector<2x1x32xf32>
    %c0_23 = arith.constant 0 : index
    %c5 = arith.constant 5 : index
    %c0_24 = arith.constant 0 : index
    %46 = vector.load %arg16[%c0_23, %c5, %c0_24] : memref<2x8x32xf32, #tpu.memory_space<vmem>>, vector<2x1x32xf32>
    tpu.vector_store %arg16[%c0_23, %c5, %c0_24], %45 {strides = array<i32>} : memref<2x8x32xf32, #tpu.memory_space<vmem>>, vector<2x1x32xf32>,
    %47 = vector.broadcast %9 : vector<1x1x32xf32> to vector<2x1x32xf32>
    %48 = arith.mulf %47, %45 : vector<2x1x32xf32>
    %49 = vector.extract_strided_slice %8 {offsets = [0, 6, 0], sizes = [2, 1, 32], strides = [1, 1, 1]} : vector<2x8x32xf32> to vector<2x1x32xf32>
    %50 = arith.addf %48, %49 : vector<2x1x32xf32>
    %51 = math.tanh %50 : vector<2x1x32xf32>
    %c0_25 = arith.constant 0 : index
    %c6 = arith.constant 6 : index
    %c0_26 = arith.constant 0 : index
    %52 = vector.load %arg16[%c0_25, %c6, %c0_26] : memref<2x8x32xf32, #tpu.memory_space<vmem>>, vector<2x1x32xf32>
    tpu.vector_store %arg16[%c0_25, %c6, %c0_26], %51 {strides = array<i32>} : memref<2x8x32xf32, #tpu.memory_space<vmem>>, vector<2x1x32xf32>,
    %53 = vector.broadcast %9 : vector<1x1x32xf32> to vector<2x1x32xf32>
    %54 = arith.mulf %53, %51 : vector<2x1x32xf32>
    %55 = vector.extract_strided_slice %8 {offsets = [0, 7, 0], sizes = [2, 1, 32], strides = [1, 1, 1]} : vector<2x8x32xf32> to vector<2x1x32xf32>
    %56 = arith.addf %54, %55 : vector<2x1x32xf32>
    %57 = math.tanh %56 : vector<2x1x32xf32>
    %c0_27 = arith.constant 0 : index
    %c7 = arith.constant 7 : index
    %c0_28 = arith.constant 0 : index
    %58 = vector.load %arg16[%c0_27, %c7, %c0_28] : memref<2x8x32xf32, #tpu.memory_space<vmem>>, vector<2x1x32xf32>
    tpu.vector_store %arg16[%c0_27, %c7, %c0_28], %57 {strides = array<i32>} : memref<2x8x32xf32, #tpu.memory_space<vmem>>, vector<2x1x32xf32>,
    %c0_29 = arith.constant 0 : index
    %c0_30 = arith.constant 0 : index
    %c0_31 = arith.constant 0 : index
    %59 = vector.load %arg1[%c0_29, %c0_30, %c0_31] : memref<2x8x32xf32, #tpu.memory_space<vmem>>, vector<2x8x32xf32>
    %60 = vector.shape_cast %59 : vector<2x8x32xf32> to vector<16x32xf32>
    %61 = arith.truncf %60 : vector<16x32xf32> to vector<16x32xbf16>
    %c0_32 = arith.constant 0 : index
    %c0_33 = arith.constant 0 : index
    %c0_34 = arith.constant 0 : index
    %62 = vector.load %arg2[%c0_32, %c0_33, %c0_34] : memref<2x8x32xf32, #tpu.memory_space<vmem>>, vector<2x8x32xf32>
    %63 = vector.shape_cast %62 : vector<2x8x32xf32> to vector<16x32xf32>
    %64 = arith.truncf %63 : vector<16x32xf32> to vector<16x32xbf16>
    %c0_35 = arith.constant 0 : index
    %c0_36 = arith.constant 0 : index
    %c0_37 = arith.constant 0 : index
    %65 = vector.load %arg5[%c0_35, %c0_36, %c0_37] : memref<1x8x8xf32, #tpu.memory_space<vmem>>, vector<1x8x8xf32>
    %66 = vector.shape_cast %65 : vector<1x8x8xf32> to vector<1x8x8xf32>
    %67 = vector.broadcast %66 : vector<1x8x8xf32> to vector<2x8x8xf32>
    %cst_38 = arith.constant 0.000000e+00 : f32
    %68 = vector.broadcast %cst_38 : f32 to vector<16x32xf32>
    %c0_39 = arith.constant 0 : index
    %c0_40 = arith.constant 0 : index
    %c0_41 = arith.constant 0 : index
    %69 = vector.load %arg6[%c0_39, %c0_40, %c0_41] : memref<4x32x8xbf16, #tpu.memory_space<vmem>>, vector<1x32x8xbf16>
    %70 = vector.shape_cast %69 : vector<1x32x8xbf16> to vector<32x8xbf16>
    %cst_42 = arith.constant dense<0.000000e+00> : vector<16x8xf32>
    %71 = tpu.matmul %61, %70, %cst_42 {dimension_numbers = #tpu.dot_dimension_numbers<[1], [0], [0], [1], [0, 0, 1, 1], [], []>} : vector<16x32xbf16>, vector<32x8xbf16>, vector<16x8xf32> -> vector<16x8xf32>
    %c0_43 = arith.constant 0 : index
    %c0_44 = arith.constant 0 : index
    %c0_45 = arith.constant 0 : index
    %72 = vector.load %arg7[%c0_43, %c0_44, %c0_45] : memref<4x1x8xf32, #tpu.memory_space<vmem>>, vector<1x1x8xf32>
    %73 = vector.shape_cast %72 : vector<1x1x8xf32> to vector<1x8xf32>
    %74 = vector.broadcast %73 : vector<1x8xf32> to vector<16x8xf32>
    %75 = arith.addf %71, %74 : vector<16x8xf32>
    %76 = vector.shape_cast %75 : vector<16x8xf32> to vector<2x8x8xf32>
    %c0_46 = arith.constant 0 : index
    %c0_47 = arith.constant 0 : index
    %c0_48 = arith.constant 0 : index
    %77 = vector.load %arg8[%c0_46, %c0_47, %c0_48] : memref<4x32x8xbf16, #tpu.memory_space<vmem>>, vector<1x32x8xbf16>
    %78 = vector.shape_cast %77 : vector<1x32x8xbf16> to vector<32x8xbf16>
    %cst_49 = arith.constant dense<0.000000e+00> : vector<16x8xf32>
    %79 = tpu.matmul %64, %78, %cst_49 {dimension_numbers = #tpu.dot_dimension_numbers<[1], [0], [0], [1], [0, 0, 1, 1], [], []>} : vector<16x32xbf16>, vector<32x8xbf16>, vector<16x8xf32> -> vector<16x8xf32>
    %c0_50 = arith.constant 0 : index
    %c0_51 = arith.constant 0 : index
    %c0_52 = arith.constant 0 : index
    %80 = vector.load %arg9[%c0_50, %c0_51, %c0_52] : memref<4x1x8xf32, #tpu.memory_space<vmem>>, vector<1x1x8xf32>
    %81 = vector.shape_cast %80 : vector<1x1x8xf32> to vector<1x8xf32>
    %82 = vector.broadcast %81 : vector<1x8xf32> to vector<16x8xf32>
    %83 = arith.addf %79, %82 : vector<16x8xf32>
    %84 = vector.shape_cast %83 : vector<16x8xf32> to vector<2x8x8xf32>
    %c0_53 = arith.constant 0 : index
    %c0_54 = arith.constant 0 : index
    %c0_55 = arith.constant 0 : index
    %85 = vector.load %arg16[%c0_53, %c0_54, %c0_55] : memref<2x8x32xf32, #tpu.memory_space<vmem>>, vector<2x8x8xf32>
    "tpu.trace_start"() <{level = 10 : i32, message = "bqd,bkd->bqk"}> : () -> ()
    %cst_56 = arith.constant dense<0.000000e+00> : vector<2x8x8xf32>
    %86 = tpu.matmul %76, %85, %cst_56 {dimension_numbers = #tpu.dot_dimension_numbers<[2], [2], [1], [1], [0, 0, 0, 1, 1, 1], [0], [0]>} : vector<2x8x8xf32>, vector<2x8x8xf32>, vector<2x8x8xf32> -> vector<2x8x8xf32>
    "tpu.trace_stop"() : () -> ()
    %87 = arith.addf %86, %67 : vector<2x8x8xf32>
    %cst_57 = arith.constant dense<0xFF800000> : vector<2x8xf32>
    %88 = vector.multi_reduction <maximumf>, %87, %cst_57 [2] : vector<2x8x8xf32> to vector<2x8xf32>
    %89 = vector.shape_cast %88 : vector<2x8xf32> to vector<2x8x1xf32>
    %90 = vector.broadcast %89 : vector<2x8x1xf32> to vector<2x8x8xf32>
    %91 = arith.subf %87, %90 : vector<2x8x8xf32>
    %92 = math.exp %91 : vector<2x8x8xf32>
    %cst_58 = arith.constant dense<0.000000e+00> : vector<2x8xf32>
    %93 = vector.multi_reduction <add>, %92, %cst_58 [2] : vector<2x8x8xf32> to vector<2x8xf32>
    %94 = vector.shape_cast %93 : vector<2x8xf32> to vector<2x8x1xf32>
    %95 = tpu.reciprocal %94 : vector<2x8x1xf32> -> vector<2x8x1xf32>
    %96 = vector.broadcast %95 : vector<2x8x1xf32> to vector<2x8x8xf32>
    %97 = arith.mulf %92, %96 : vector<2x8x8xf32>
    "tpu.trace_start"() <{level = 10 : i32, message = "bqk,bkd->bqd"}> : () -> ()
    %cst_59 = arith.constant dense<0.000000e+00> : vector<2x8x8xf32>
    %98 = tpu.matmul %97, %84, %cst_59 {dimension_numbers = #tpu.dot_dimension_numbers<[2], [1], [1], [2], [0, 0, 0, 1, 1, 2], [0], [0]>} : vector<2x8x8xf32>, vector<2x8x8xf32>, vector<2x8x8xf32> -> vector<2x8x8xf32>
    "tpu.trace_stop"() : () -> ()
    %99 = vector.shape_cast %98 : vector<2x8x8xf32> to vector<16x8xf32>
    %100 = arith.truncf %99 : vector<16x8xf32> to vector<16x8xbf16>
    %c0_60 = arith.constant 0 : index
    %c0_61 = arith.constant 0 : index
    %c0_62 = arith.constant 0 : index
    %101 = vector.load %arg13[%c0_60, %c0_61, %c0_62] : memref<4x8x32xbf16, #tpu.memory_space<vmem>>, vector<1x8x32xbf16>
    %102 = vector.shape_cast %101 : vector<1x8x32xbf16> to vector<8x32xbf16>
    %cst_63 = arith.constant dense<0.000000e+00> : vector<16x32xf32>
    %103 = tpu.matmul %100, %102, %cst_63 {dimension_numbers = #tpu.dot_dimension_numbers<[1], [0], [0], [1], [0, 0, 1, 1], [], []>} : vector<16x8xbf16>, vector<8x32xbf16>, vector<16x32xf32> -> vector<16x32xf32>
    %104 = arith.addf %68, %103 : vector<16x32xf32>
    %c1_64 = arith.constant 1 : index
    %c0_65 = arith.constant 0 : index
    %c0_66 = arith.constant 0 : index
    %105 = vector.load %arg6[%c1_64, %c0_65, %c0_66] : memref<4x32x8xbf16, #tpu.memory_space<vmem>>, vector<1x32x8xbf16>
    %106 = vector.shape_cast %105 : vector<1x32x8xbf16> to vector<32x8xbf16>
    %cst_67 = arith.constant dense<0.000000e+00> : vector<16x8xf32>
    %107 = tpu.matmul %61, %106, %cst_67 {dimension_numbers = #tpu.dot_dimension_numbers<[1], [0], [0], [1], [0, 0, 1, 1], [], []>} : vector<16x32xbf16>, vector<32x8xbf16>, vector<16x8xf32> -> vector<16x8xf32>
    %c1_68 = arith.constant 1 : index
    %c0_69 = arith.constant 0 : index
    %c0_70 = arith.constant 0 : index
    %108 = vector.load %arg7[%c1_68, %c0_69, %c0_70] : memref<4x1x8xf32, #tpu.memory_space<vmem>>, vector<1x1x8xf32>
    %109 = vector.shape_cast %108 : vector<1x1x8xf32> to vector<1x8xf32>
    %110 = vector.broadcast %109 : vector<1x8xf32> to vector<16x8xf32>
    %111 = arith.addf %107, %110 : vector<16x8xf32>
    %112 = vector.shape_cast %111 : vector<16x8xf32> to vector<2x8x8xf32>
    %c1_71 = arith.constant 1 : index
    %c0_72 = arith.constant 0 : index
    %c0_73 = arith.constant 0 : index
    %113 = vector.load %arg8[%c1_71, %c0_72, %c0_73] : memref<4x32x8xbf16, #tpu.memory_space<vmem>>, vector<1x32x8xbf16>
    %114 = vector.shape_cast %113 : vector<1x32x8xbf16> to vector<32x8xbf16>
    %cst_74 = arith.constant dense<0.000000e+00> : vector<16x8xf32>
    %115 = tpu.matmul %64, %114, %cst_74 {dimension_numbers = #tpu.dot_dimension_numbers<[1], [0], [0], [1], [0, 0, 1, 1], [], []>} : vector<16x32xbf16>, vector<32x8xbf16>, vector<16x8xf32> -> vector<16x8xf32>
    %c1_75 = arith.constant 1 : index
    %c0_76 = arith.constant 0 : index
    %c0_77 = arith.constant 0 : index
    %116 = vector.load %arg9[%c1_75, %c0_76, %c0_77] : memref<4x1x8xf32, #tpu.memory_space<vmem>>, vector<1x1x8xf32>
    %117 = vector.shape_cast %116 : vector<1x1x8xf32> to vector<1x8xf32>
    %118 = vector.broadcast %117 : vector<1x8xf32> to vector<16x8xf32>
    %119 = arith.addf %115, %118 : vector<16x8xf32>
    %120 = vector.shape_cast %119 : vector<16x8xf32> to vector<2x8x8xf32>
    %c0_78 = arith.constant 0 : index
    %c0_79 = arith.constant 0 : index
    %c8 = arith.constant 8 : index
    %121 = vector.load %arg16[%c0_78, %c0_79, %c8] : memref<2x8x32xf32, #tpu.memory_space<vmem>>, vector<2x8x8xf32>
    "tpu.trace_start"() <{level = 10 : i32, message = "bqd,bkd->bqk"}> : () -> ()
    %cst_80 = arith.constant dense<0.000000e+00> : vector<2x8x8xf32>
    %122 = tpu.matmul %112, %121, %cst_80 {dimension_numbers = #tpu.dot_dimension_numbers<[2], [2], [1], [1], [0, 0, 0, 1, 1, 1], [0], [0]>} : vector<2x8x8xf32>, vector<2x8x8xf32>, vector<2x8x8xf32> -> vector<2x8x8xf32>
    "tpu.trace_stop"() : () -> ()
    %123 = arith.addf %122, %67 : vector<2x8x8xf32>
    %cst_81 = arith.constant dense<0xFF800000> : vector<2x8xf32>
    %124 = vector.multi_reduction <maximumf>, %123, %cst_81 [2] : vector<2x8x8xf32> to vector<2x8xf32>
    %125 = vector.shape_cast %124 : vector<2x8xf32> to vector<2x8x1xf32>
    %126 = vector.broadcast %125 : vector<2x8x1xf32> to vector<2x8x8xf32>
    %127 = arith.subf %123, %126 : vector<2x8x8xf32>
    %128 = math.exp %127 : vector<2x8x8xf32>
    %cst_82 = arith.constant dense<0.000000e+00> : vector<2x8xf32>
    %129 = vector.multi_reduction <add>, %128, %cst_82 [2] : vector<2x8x8xf32> to vector<2x8xf32>
    %130 = vector.shape_cast %129 : vector<2x8xf32> to vector<2x8x1xf32>
    %131 = tpu.reciprocal %130 : vector<2x8x1xf32> -> vector<2x8x1xf32>
    %132 = vector.broadcast %131 : vector<2x8x1xf32> to vector<2x8x8xf32>
    %133 = arith.mulf %128, %132 : vector<2x8x8xf32>
    "tpu.trace_start"() <{level = 10 : i32, message = "bqk,bkd->bqd"}> : () -> ()
    %cst_83 = arith.constant dense<0.000000e+00> : vector<2x8x8xf32>
    %134 = tpu.matmul %133, %120, %cst_83 {dimension_numbers = #tpu.dot_dimension_numbers<[2], [1], [1], [2], [0, 0, 0, 1, 1, 2], [0], [0]>} : vector<2x8x8xf32>, vector<2x8x8xf32>, vector<2x8x8xf32> -> vector<2x8x8xf32>
    "tpu.trace_stop"() : () -> ()
    %135 = vector.shape_cast %134 : vector<2x8x8xf32> to vector<16x8xf32>
    %136 = arith.truncf %135 : vector<16x8xf32> to vector<16x8xbf16>
    %c1_84 = arith.constant 1 : index
    %c0_85 = arith.constant 0 : index
    %c0_86 = arith.constant 0 : index
    %137 = vector.load %arg13[%c1_84, %c0_85, %c0_86] : memref<4x8x32xbf16, #tpu.memory_space<vmem>>, vector<1x8x32xbf16>
    %138 = vector.shape_cast %137 : vector<1x8x32xbf16> to vector<8x32xbf16>
    %cst_87 = arith.constant dense<0.000000e+00> : vector<16x32xf32>
    %139 = tpu.matmul %136, %138, %cst_87 {dimension_numbers = #tpu.dot_dimension_numbers<[1], [0], [0], [1], [0, 0, 1, 1], [], []>} : vector<16x8xbf16>, vector<8x32xbf16>, vector<16x32xf32> -> vector<16x32xf32>
    %140 = arith.addf %104, %139 : vector<16x32xf32>
    %c2_88 = arith.constant 2 : index
    %c0_89 = arith.constant 0 : index
    %c0_90 = arith.constant 0 : index
    %141 = vector.load %arg6[%c2_88, %c0_89, %c0_90] : memref<4x32x8xbf16, #tpu.memory_space<vmem>>, vector<1x32x8xbf16>
    %142 = vector.shape_cast %141 : vector<1x32x8xbf16> to vector<32x8xbf16>
    %cst_91 = arith.constant dense<0.000000e+00> : vector<16x8xf32>
    %143 = tpu.matmul %61, %142, %cst_91 {dimension_numbers = #tpu.dot_dimension_numbers<[1], [0], [0], [1], [0, 0, 1, 1], [], []>} : vector<16x32xbf16>, vector<32x8xbf16>, vector<16x8xf32> -> vector<16x8xf32>
    %c2_92 = arith.constant 2 : index
    %c0_93 = arith.constant 0 : index
    %c0_94 = arith.constant 0 : index
    %144 = vector.load %arg7[%c2_92, %c0_93, %c0_94] : memref<4x1x8xf32, #tpu.memory_space<vmem>>, vector<1x1x8xf32>
    %145 = vector.shape_cast %144 : vector<1x1x8xf32> to vector<1x8xf32>
    %146 = vector.broadcast %145 : vector<1x8xf32> to vector<16x8xf32>
    %147 = arith.addf %143, %146 : vector<16x8xf32>
    %148 = vector.shape_cast %147 : vector<16x8xf32> to vector<2x8x8xf32>
    %c2_95 = arith.constant 2 : index
    %c0_96 = arith.constant 0 : index
    %c0_97 = arith.constant 0 : index
    %149 = vector.load %arg8[%c2_95, %c0_96, %c0_97] : memref<4x32x8xbf16, #tpu.memory_space<vmem>>, vector<1x32x8xbf16>
    %150 = vector.shape_cast %149 : vector<1x32x8xbf16> to vector<32x8xbf16>
    %cst_98 = arith.constant dense<0.000000e+00> : vector<16x8xf32>
    %151 = tpu.matmul %64, %150, %cst_98 {dimension_numbers = #tpu.dot_dimension_numbers<[1], [0], [0], [1], [0, 0, 1, 1], [], []>} : vector<16x32xbf16>, vector<32x8xbf16>, vector<16x8xf32> -> vector<16x8xf32>
    %c2_99 = arith.constant 2 : index
    %c0_100 = arith.constant 0 : index
    %c0_101 = arith.constant 0 : index
    %152 = vector.load %arg9[%c2_99, %c0_100, %c0_101] : memref<4x1x8xf32, #tpu.memory_space<vmem>>, vector<1x1x8xf32>
    %153 = vector.shape_cast %152 : vector<1x1x8xf32> to vector<1x8xf32>
    %154 = vector.broadcast %153 : vector<1x8xf32> to vector<16x8xf32>
    %155 = arith.addf %151, %154 : vector<16x8xf32>
    %156 = vector.shape_cast %155 : vector<16x8xf32> to vector<2x8x8xf32>
    %c0_102 = arith.constant 0 : index
    %c0_103 = arith.constant 0 : index
    %c16 = arith.constant 16 : index
    %157 = vector.load %arg16[%c0_102, %c0_103, %c16] : memref<2x8x32xf32, #tpu.memory_space<vmem>>, vector<2x8x8xf32>
    "tpu.trace_start"() <{level = 10 : i32, message = "bqd,bkd->bqk"}> : () -> ()
    %cst_104 = arith.constant dense<0.000000e+00> : vector<2x8x8xf32>
    %158 = tpu.matmul %148, %157, %cst_104 {dimension_numbers = #tpu.dot_dimension_numbers<[2], [2], [1], [1], [0, 0, 0, 1, 1, 1], [0], [0]>} : vector<2x8x8xf32>, vector<2x8x8xf32>, vector<2x8x8xf32> -> vector<2x8x8xf32>
    "tpu.trace_stop"() : () -> ()
    %159 = arith.addf %158, %67 : vector<2x8x8xf32>
    %cst_105 = arith.constant dense<0xFF800000> : vector<2x8xf32>
    %160 = vector.multi_reduction <maximumf>, %159, %cst_105 [2] : vector<2x8x8xf32> to vector<2x8xf32>
    %161 = vector.shape_cast %160 : vector<2x8xf32> to vector<2x8x1xf32>
    %162 = vector.broadcast %161 : vector<2x8x1xf32> to vector<2x8x8xf32>
    %163 = arith.subf %159, %162 : vector<2x8x8xf32>
    %164 = math.exp %163 : vector<2x8x8xf32>
    %cst_106 = arith.constant dense<0.000000e+00> : vector<2x8xf32>
    %165 = vector.multi_reduction <add>, %164, %cst_106 [2] : vector<2x8x8xf32> to vector<2x8xf32>
    %166 = vector.shape_cast %165 : vector<2x8xf32> to vector<2x8x1xf32>
    %167 = tpu.reciprocal %166 : vector<2x8x1xf32> -> vector<2x8x1xf32>
    %168 = vector.broadcast %167 : vector<2x8x1xf32> to vector<2x8x8xf32>
    %169 = arith.mulf %164, %168 : vector<2x8x8xf32>
    "tpu.trace_start"() <{level = 10 : i32, message = "bqk,bkd->bqd"}> : () -> ()
    %cst_107 = arith.constant dense<0.000000e+00> : vector<2x8x8xf32>
    %170 = tpu.matmul %169, %156, %cst_107 {dimension_numbers = #tpu.dot_dimension_numbers<[2], [1], [1], [2], [0, 0, 0, 1, 1, 2], [0], [0]>} : vector<2x8x8xf32>, vector<2x8x8xf32>, vector<2x8x8xf32> -> vector<2x8x8xf32>
    "tpu.trace_stop"() : () -> ()
    %171 = vector.shape_cast %170 : vector<2x8x8xf32> to vector<16x8xf32>
    %172 = arith.truncf %171 : vector<16x8xf32> to vector<16x8xbf16>
    %c2_108 = arith.constant 2 : index
    %c0_109 = arith.constant 0 : index
    %c0_110 = arith.constant 0 : index
    %173 = vector.load %arg13[%c2_108, %c0_109, %c0_110] : memref<4x8x32xbf16, #tpu.memory_space<vmem>>, vector<1x8x32xbf16>
    %174 = vector.shape_cast %173 : vector<1x8x32xbf16> to vector<8x32xbf16>
    %cst_111 = arith.constant dense<0.000000e+00> : vector<16x32xf32>
    %175 = tpu.matmul %172, %174, %cst_111 {dimension_numbers = #tpu.dot_dimension_numbers<[1], [0], [0], [1], [0, 0, 1, 1], [], []>} : vector<16x8xbf16>, vector<8x32xbf16>, vector<16x32xf32> -> vector<16x32xf32>
    %176 = arith.addf %140, %175 : vector<16x32xf32>
    %c3_112 = arith.constant 3 : index
    %c0_113 = arith.constant 0 : index
    %c0_114 = arith.constant 0 : index
    %177 = vector.load %arg6[%c3_112, %c0_113, %c0_114] : memref<4x32x8xbf16, #tpu.memory_space<vmem>>, vector<1x32x8xbf16>
    %178 = vector.shape_cast %177 : vector<1x32x8xbf16> to vector<32x8xbf16>
    %cst_115 = arith.constant dense<0.000000e+00> : vector<16x8xf32>
    %179 = tpu.matmul %61, %178, %cst_115 {dimension_numbers = #tpu.dot_dimension_numbers<[1], [0], [0], [1], [0, 0, 1, 1], [], []>} : vector<16x32xbf16>, vector<32x8xbf16>, vector<16x8xf32> -> vector<16x8xf32>
    %c3_116 = arith.constant 3 : index
    %c0_117 = arith.constant 0 : index
    %c0_118 = arith.constant 0 : index
    %180 = vector.load %arg7[%c3_116, %c0_117, %c0_118] : memref<4x1x8xf32, #tpu.memory_space<vmem>>, vector<1x1x8xf32>
    %181 = vector.shape_cast %180 : vector<1x1x8xf32> to vector<1x8xf32>
    %182 = vector.broadcast %181 : vector<1x8xf32> to vector<16x8xf32>
    %183 = arith.addf %179, %182 : vector<16x8xf32>
    %184 = vector.shape_cast %183 : vector<16x8xf32> to vector<2x8x8xf32>
    %c3_119 = arith.constant 3 : index
    %c0_120 = arith.constant 0 : index
    %c0_121 = arith.constant 0 : index
    %185 = vector.load %arg8[%c3_119, %c0_120, %c0_121] : memref<4x32x8xbf16, #tpu.memory_space<vmem>>, vector<1x32x8xbf16>
    %186 = vector.shape_cast %185 : vector<1x32x8xbf16> to vector<32x8xbf16>
    %cst_122 = arith.constant dense<0.000000e+00> : vector<16x8xf32>
    %187 = tpu.matmul %64, %186, %cst_122 {dimension_numbers = #tpu.dot_dimension_numbers<[1], [0], [0], [1], [0, 0, 1, 1], [], []>} : vector<16x32xbf16>, vector<32x8xbf16>, vector<16x8xf32> -> vector<16x8xf32>
    %c3_123 = arith.constant 3 : index
    %c0_124 = arith.constant 0 : index
    %c0_125 = arith.constant 0 : index
    %188 = vector.load %arg9[%c3_123, %c0_124, %c0_125] : memref<4x1x8xf32, #tpu.memory_space<vmem>>, vector<1x1x8xf32>
    %189 = vector.shape_cast %188 : vector<1x1x8xf32> to vector<1x8xf32>
    %190 = vector.broadcast %189 : vector<1x8xf32> to vector<16x8xf32>
    %191 = arith.addf %187, %190 : vector<16x8xf32>
    %192 = vector.shape_cast %191 : vector<16x8xf32> to vector<2x8x8xf32>
    %c0_126 = arith.constant 0 : index
    %c0_127 = arith.constant 0 : index
    %c24 = arith.constant 24 : index
    %193 = vector.load %arg16[%c0_126, %c0_127, %c24] : memref<2x8x32xf32, #tpu.memory_space<vmem>>, vector<2x8x8xf32>
    "tpu.trace_start"() <{level = 10 : i32, message = "bqd,bkd->bqk"}> : () -> ()
    %cst_128 = arith.constant dense<0.000000e+00> : vector<2x8x8xf32>
    %194 = tpu.matmul %184, %193, %cst_128 {dimension_numbers = #tpu.dot_dimension_numbers<[2], [2], [1], [1], [0, 0, 0, 1, 1, 1], [0], [0]>} : vector<2x8x8xf32>, vector<2x8x8xf32>, vector<2x8x8xf32> -> vector<2x8x8xf32>
    "tpu.trace_stop"() : () -> ()
    %195 = arith.addf %194, %67 : vector<2x8x8xf32>
    %cst_129 = arith.constant dense<0xFF800000> : vector<2x8xf32>
    %196 = vector.multi_reduction <maximumf>, %195, %cst_129 [2] : vector<2x8x8xf32> to vector<2x8xf32>
    %197 = vector.shape_cast %196 : vector<2x8xf32> to vector<2x8x1xf32>
    %198 = vector.broadcast %197 : vector<2x8x1xf32> to vector<2x8x8xf32>
    %199 = arith.subf %195, %198 : vector<2x8x8xf32>
    %200 = math.exp %199 : vector<2x8x8xf32>
    %cst_130 = arith.constant dense<0.000000e+00> : vector<2x8xf32>
    %201 = vector.multi_reduction <add>, %200, %cst_130 [2] : vector<2x8x8xf32> to vector<2x8xf32>
    %202 = vector.shape_cast %201 : vector<2x8xf32> to vector<2x8x1xf32>
    %203 = tpu.reciprocal %202 : vector<2x8x1xf32> -> vector<2x8x1xf32>
    %204 = vector.broadcast %203 : vector<2x8x1xf32> to vector<2x8x8xf32>
    %205 = arith.mulf %200, %204 : vector<2x8x8xf32>
    "tpu.trace_start"() <{level = 10 : i32, message = "bqk,bkd->bqd"}> : () -> ()
    %cst_131 = arith.constant dense<0.000000e+00> : vector<2x8x8xf32>
    %206 = tpu.matmul %205, %192, %cst_131 {dimension_numbers = #tpu.dot_dimension_numbers<[2], [1], [1], [2], [0, 0, 0, 1, 1, 2], [0], [0]>} : vector<2x8x8xf32>, vector<2x8x8xf32>, vector<2x8x8xf32> -> vector<2x8x8xf32>
    "tpu.trace_stop"() : () -> ()
    %207 = vector.shape_cast %206 : vector<2x8x8xf32> to vector<16x8xf32>
    %208 = arith.truncf %207 : vector<16x8xf32> to vector<16x8xbf16>
    %c3_132 = arith.constant 3 : index
    %c0_133 = arith.constant 0 : index
    %c0_134 = arith.constant 0 : index
    %209 = vector.load %arg13[%c3_132, %c0_133, %c0_134] : memref<4x8x32xbf16, #tpu.memory_space<vmem>>, vector<1x8x32xbf16>
    %210 = vector.shape_cast %209 : vector<1x8x32xbf16> to vector<8x32xbf16>
    %cst_135 = arith.constant dense<0.000000e+00> : vector<16x32xf32>
    %211 = tpu.matmul %208, %210, %cst_135 {dimension_numbers = #tpu.dot_dimension_numbers<[1], [0], [0], [1], [0, 0, 1, 1], [], []>} : vector<16x8xbf16>, vector<8x32xbf16>, vector<16x32xf32> -> vector<16x32xf32>
    %212 = arith.addf %176, %211 : vector<16x32xf32>
    %c0_136 = arith.constant 0 : index
    %c0_137 = arith.constant 0 : index
    %213 = vector.load %arg14[%c0_136, %c0_137] : memref<1x32xf32, #tpu.memory_space<vmem>>, vector<1x32xf32>
    %214 = vector.broadcast %213 : vector<1x32xf32> to vector<16x32xf32>
    %215 = arith.addf %212, %214 : vector<16x32xf32>
    %216 = vector.shape_cast %215 : vector<16x32xf32> to vector<2x8x32xf32>
    %c0_138 = arith.constant 0 : index
    %c0_139 = arith.constant 0 : index
    %c0_140 = arith.constant 0 : index
    %217 = vector.load %arg15[%c0_138, %c0_139, %c0_140] : memref<2x8x32xf32, #tpu.memory_space<vmem>>, vector<2x8x32xf32>
    tpu.vector_store %arg15[%c0_138, %c0_139, %c0_140], %216 {strides = array<i32>} : memref<2x8x32xf32, #tpu.memory_space<vmem>>, vector<2x8x32xf32>,
    return
  }
  func.func @transform_0(%arg0: i32) -> (i32, i32, i32) {
    %c0_i32 = arith.constant 0 : i32
    %c0_i32_0 = arith.constant 0 : i32
    %c0_i32_1 = arith.constant 0 : i32
    return %arg0, %c0_i32, %c0_i32_0 : i32, i32, i32
  }
  func.func @transform_1(%arg0: i32) -> (i32, i32, i32) {
    %c0_i32 = arith.constant 0 : i32
    %c0_i32_0 = arith.constant 0 : i32
    %c0_i32_1 = arith.constant 0 : i32
    return %arg0, %c0_i32, %c0_i32_0 : i32, i32, i32
  }
  func.func @transform_2(%arg0: i32) -> (i32, i32, i32) {
    %c0_i32 = arith.constant 0 : i32
    %c0_i32_0 = arith.constant 0 : i32
    %c0_i32_1 = arith.constant 0 : i32
    return %arg0, %c0_i32, %c0_i32_0 : i32, i32, i32
  }
  func.func @transform_3(%arg0: i32) -> (i32, i32, i32) {
    %c0_i32 = arith.constant 0 : i32
    %c0_i32_0 = arith.constant 0 : i32
    %c0_i32_1 = arith.constant 0 : i32
    return %arg0, %c0_i32, %c0_i32_0 : i32, i32, i32
  }
  func.func @transform_4(%arg0: i32) -> (i32, i32, i32) {
    %c0_i32 = arith.constant 0 : i32
    %c0_i32_0 = arith.constant 0 : i32
    %c0_i32_1 = arith.constant 0 : i32
    %c0_i32_2 = arith.constant 0 : i32
    return %c0_i32, %c0_i32_0, %c0_i32_1 : i32, i32, i32
  }
  func.func @transform_5(%arg0: i32) -> (i32, i32, i32) {
    %c0_i32 = arith.constant 0 : i32
    %c0_i32_0 = arith.constant 0 : i32
    %c0_i32_1 = arith.constant 0 : i32
    %c0_i32_2 = arith.constant 0 : i32
    return %c0_i32, %c0_i32_0, %c0_i32_1 : i32, i32, i32
  }
  func.func @transform_6(%arg0: i32) -> (i32, i32, i32) {
    %c0_i32 = arith.constant 0 : i32
    %c0_i32_0 = arith.constant 0 : i32
    %c0_i32_1 = arith.constant 0 : i32
    %c0_i32_2 = arith.constant 0 : i32
    return %c0_i32, %c0_i32_0, %c0_i32_1 : i32, i32, i32
  }
  func.func @transform_7(%arg0: i32) -> (i32, i32, i32) {
    %c0_i32 = arith.constant 0 : i32
    %c0_i32_0 = arith.constant 0 : i32
    %c0_i32_1 = arith.constant 0 : i32
    %c0_i32_2 = arith.constant 0 : i32
    return %c0_i32, %c0_i32_0, %c0_i32_1 : i32, i32, i32
  }
  func.func @transform_8(%arg0: i32) -> (i32, i32, i32) {
    %c0_i32 = arith.constant 0 : i32
    %c0_i32_0 = arith.constant 0 : i32
    %c0_i32_1 = arith.constant 0 : i32
    %c0_i32_2 = arith.constant 0 : i32
    return %c0_i32, %c0_i32_0, %c0_i32_1 : i32, i32, i32
  }
  func.func @transform_9(%arg0: i32) -> (i32, i32) {
    %c0_i32 = arith.constant 0 : i32
    %c0_i32_0 = arith.constant 0 : i32
    %c0_i32_1 = arith.constant 0 : i32
    return %c0_i32, %c0_i32_0 : i32, i32
  }
  func.func @transform_10(%arg0: i32) -> (i32, i32) {
    %c0_i32 = arith.constant 0 : i32
    %c0_i32_0 = arith.constant 0 : i32
    %c0_i32_1 = arith.constant 0 : i32
    return %c0_i32, %c0_i32_0 : i32, i32
  }
  func.func @transform_11(%arg0: i32) -> (i32, i32, i32) {
    %c0_i32 = arith.constant 0 : i32
    %c0_i32_0 = arith.constant 0 : i32
    %c0_i32_1 = arith.constant 0 : i32
    %c0_i32_2 = arith.constant 0 : i32
    return %c0_i32, %c0_i32_0, %c0_i32_1 : i32, i32, i32
  }
  func.func @transform_12(%arg0: i32) -> (i32, i32, i32) {
    %c0_i32 = arith.constant 0 : i32
    %c0_i32_0 = arith.constant 0 : i32
    %c0_i32_1 = arith.constant 0 : i32
    %c0_i32_2 = arith.constant 0 : i32
    return %c0_i32, %c0_i32_0, %c0_i32_1 : i32, i32, i32
  }
  func.func @transform_13(%arg0: i32) -> (i32, i32) {
    %c0_i32 = arith.constant 0 : i32
    %c0_i32_0 = arith.constant 0 : i32
    %c0_i32_1 = arith.constant 0 : i32
    return %c0_i32, %c0_i32_0 : i32, i32
  }
  func.func @transform_14(%arg0: i32) -> (i32, i32, i32) {
    %c0_i32 = arith.constant 0 : i32
    %c0_i32_0 = arith.constant 0 : i32
    %c0_i32_1 = arith.constant 0 : i32
    return %arg0, %c0_i32, %c0_i32_0 : i32, i32, i32
  }
}

</mosaic_0001>

<bundles_post_ra>
// kernel: tpu_custom_call.1
= control target key start
LH: loop header
LB: loop body
LE: loop exit
PB: predicated region body
PF: predicated region fallthrough
CT: control target
= control target key end

     0   :  { %s4447_s0 = inlined_call_operand.vmem [shape: f32[8,8,32], index: 0, kind: input, shape index: {}]   ;;  %s4448_s1 = inlined_call_operand.vmem [shape: f32[8,8,32], index: 1, kind: input, shape index: {}]   ;;  %s4449_s2 = inlined_call_operand.hbm [shape: f32[8,8,32], index: 2, kind: input, shape index: {}]   ;;  %s4450_s3 = inlined_call_operand.hbm [shape: f32[8,1,32], index: 3, kind: input, shape index: {}]   ;;  %s4451_s4 = inlined_call_operand.hbm [shape: f32[1,8,8], index: 4, kind: input, shape index: {}]   ;;  %s4452_s5 = inlined_call_operand.vmem [shape: bf16[4,32,8], index: 5, kind: input, shape index: {}]   ;;  %s4453_s6 = inlined_call_operand.vmem [shape: f32[4,1,8], index: 6, kind: input, shape index: {}]   ;;  %s4454_s7 = inlined_call_operand.vmem [shape: bf16[4,32,8], index: 7, kind: input, shape index: {}]   ;;  %s4455_s8 = inlined_call_operand.vmem [shape: f32[4,1,8], index: 8, kind: input, shape index: {}]   ;;  %s4456_s9 = inlined_call_operand.vmem [shape: bf16[32,32], index: 9, kind: input, shape index: {}]   ;;  %s4457_s10 = inlined_call_operand.vmem [shape: f32[1,32], index: 10, kind: input, shape index: {}]   ;;  %s4458_s11 = inlined_call_operand.vmem [shape: f32[1,1,32], index: 11, kind: input, shape index: {}]   ;;  %s4459_s12 = inlined_call_operand.vmem [shape: bf16[4,8,32], index: 12, kind: input, shape index: {}]   ;;  %s4460_s13 = inlined_call_operand.vmem [shape: f32[1,32], index: 13, kind: input, shape index: {}]   ;;  %s4461_s14 = inlined_call_operand.hbm [shape: f32[8,8,32], index: 14, kind: output, shape index: {}]  }
   0x1   :  { %4477 = sst [smem:[#allocation20_spill]] %s4449_s2 }
   0x2   :  { %4478 = sst [smem:[#allocation21_spill]] %s4451_s4 }
   0x3   :  { %4479 = sst [smem:[#allocation22_spill]] %s4455_s8 }
   0x4   :  { %4480 = sst [smem:[#allocation23_spill]] %s4459_s12 }
   0x5   :  { %4481 = sst [smem:[#allocation24_spill]] %s4460_s13 }
   0x6   :  { %4482 = sst [smem:[#allocation25_spill]] %s4461_s14 }
   0x7   :  { %19 = vsyncpa [#allocation4], 0 }
   0x8   :  { %21 = vsyncpa [#allocation4 + $0x1], 0 }
   0x9   :  { %22 = vsyncpa [#allocation7], 0 }
   0xa   :  { %24 = vsyncpa [#allocation7 + $0x1], 0 }
   0xb   :  { %25 = vsyncpa [#allocation5], 0 }
   0xc   :  { %27 = vsyncpa [#allocation5 + $0x1], 0  ;;  %s3814_s29 = smov 0   ;;  %s3816_s30 = smov 0  }
   0xd   :  { %s3818_s15 = smov 0   ;;  %s3820_s16 = smov 0  }
   0xe LB: > { %4483 = sst [smem:[#allocation14_spill]] %s3709_s29  ;;  %s3835_s17 = sadd.s32 4294967295, %s3721_s16   ;;  %s3721_s16 = sphi %s3820_s16, %s4512_s16   ;;  %s3717_s15 = sphi %s3818_s15, %s4514_s15   ;;  %s3713_s30 = sphi %s3816_s30, %s4516_s30   ;;  %s3709_s29 = sphi %s3814_s29, %s4515_s29  }
   0xf   : > { %4484 = sst [smem:[#allocation15_spill]] %s3717_s15  ;;  %s3035_s18 = sadd.s32 4294967294, %s3721_s16  }
  0x10   : > { %s3839_s19 = sadd.s32 1, %s3721_s16   ;;  %s92_s20 = sadd.s32 1, %s3717_s15 }
  0x11   : > { %4485 = sst [smem:[#allocation16_spill]] %s3839_s19  ;;  %s89_s21 = ssub.s32 %s3721_s16, %s3839_s19 }
  0x12   : > { %p99_p0 = scmp.ne.s32.totalorder %s3717_s15, %s3713_s30  ;;  %p90_p1 = scmp.eq.s32.totalorder %s89_s21, 0 }
  0x13   : > { %p100_p2 = scmp.eq.s32.totalorder %s3721_s16, 0  ;;  %p105_p3 = scmp.ne.s32.totalorder %s3713_s30, %s3709_s29 }
  0x14   : > { %p4470_p4 = scmp.eq.s32.totalorder %s3835_s17, 0  ;;  %p365_p7 = scmp.eq.s32.totalorder %s3835_s17, 3 }
  0x15   : > { %s3851_s22 = scalar_select %p90_p1, %s3717_s15, %s92_s20  }
  0x16   : > { %p3853_p5 = por %p100_p2, %p99_p0  ;;  %p3859_p6 = por %p4470_p4, %p105_p3 }
  0x17   : > { %4486 = sst [smem:[#allocation17_spill]] %s3851_s22  ;;  %p371_p8 = scmp.eq.s32.totalorder %s3035_s18, 3 }
  0x18   : > { %s4488_s24 = scalar_select %p3859_p6, 1, 0 }
  0x19   : > { %p3036_p9 = scmp.ge.s32.totalorder %s3721_s16, 1  ;;  %p378_p10 = scmp.lt.s32.totalorder %s3721_s16, 5 }
  0x1a   : > { %p3866_p11 = por %p365_p7, %p99_p0  ;;  %p3870_p12 = por %p371_p8, %p105_p3 }
  0x1b   : > { %p3874_p13 = pnand %p3036_p9, %p378_p10  ;;  %s3723_s28 = smov [#allocation8]  }
  0x1c   : > { %s4489_s25 = scalar_select %p3866_p11, 1, 0 }
  0x1d   : > { %s4491_s26 = scalar_select %p3870_p12, 1, 0 }
  0x1e   : > { %4490 = sst [smem:[#allocation18_spill]] %s4489_s25  ;;  %p3413_p1 = pneg %p3874_p13 }
  0x1f   : > { %4492 = sst [smem:[#allocation19_spill]] %s4491_s26  ;;  %s391_s20 = sshll.u32 %s3723_s28, 4  ;;  %s392_s20 = int_to_ptr.vmem [resolvable:$true] %s391_s20 }
  0x20   : > { %s4493_s27 = scalar_select %p3874_p13, 1, 0 }
  0x21   : > { %p3429_p2 = scmp.lt.s32.totalorder %s3721_s16, 4  ;;  %p3883_p0 = pnand %p3413_p1, %p4470_p4 }
  0x22   : > { %s3888_s21 = sand.u32 1, %s3717_s15   ;;  %s4496_s4 = sld [smem:[#allocation21_spill]] }
  0x23   : > { %p3892_p3 = pnand %p3429_p2, %p3853_p5  ;;  %s3039_s19 = sshll.u32 %s3888_s21, 4 }
  0x24   : > { %p3561_p8 = pneg %p3883_p0 }
  0x25   : > { %s4495_s22 = scalar_select %p3892_p3, 1, 0 }
  0x28   : > { %s3559_s28 = scalar_lea.hbm %s4496_s4, 128 }
  0x29   : > { %p3560_p7 = scmp.ne.s32.totalorder %s4496_s4, %s3559_s28  ;;  %p3566_p5 = scmp.lt.u32.totalorder %s3559_s28, %s4496_s4 }
  0x2b   : > { %p3562_p9 = pnand %p3561_p8, %p3560_p7 }
  0x2d   : > { %p3563_p10 = pneg %p3562_p9 }
  0x2f   : > { %p3568_p1 = pnand %p3566_p5, %p3563_p10 }
  0x31   : > { %3571 = shalt.err (!%p3568_p1)
}
  0x32   : > { %s3572_s13 = scalar_lea.vmem %s392_s20, 128  ;;  %p3580_p11 = scmp.lt.s32.totalorder %s392_s20, %s392_s20 }
  0x33   : > { %p3573_p2 = scmp.ne.s32.totalorder %s392_s20, %s3572_s13  ;;  %p3581_p6 = scmp.lt.s32.totalorder %s3572_s13, %s3572_s13 }
  0x35   : > { %p3575_p4 = pnand %p3573_p2, %p3561_p8  ;;  %p3582_p13 = por %p3581_p6, %p3580_p11 }
  0x37   : > { %p3576_p12 = pneg %p3575_p4 }
  0x39   : > { %p3583_p3 = pnand %p3582_p13, %p3576_p12 }
  0x3b   : > { %3586 = shalt.err (!%p3583_p3)
}
  0x3c   : > { %3416 = dma.hbm_to_vmem [thread:$0]  (!%p3883_p0), %s4496_s4, 128, %s392_s20, [#allocation7]  }
  0x3d   : > { %s3157_s15 = sshll.u32 %s3721_s16, 8  ;;  %s451_s25 = scalar_lea.vmem [#allocation3], %s3039_s19 }
  0x3e   : > { %s458_s26 = sshll.u32 %s451_s25, 4  ;;  %s4497_s2 = sld [smem:[#allocation20_spill]]  ;;  %s3919_s26 = int_to_ptr.vmem [resolvable:$true] %s458_s26 }
  0x3f   : > { %s448_s18 = scalar_lea.sflag [#allocation4], %s3888_s21  ;;  %p4498_p6 = scmp.ne.s32.totalorder %s4495_s22, 0 }
  0x41   : > { %p3589_p11 = pneg %p4498_p6 }
  0x44   : > { %s3917_s13 = scalar_lea.hbm %s4497_s2, %s3157_s15  ;;  %s3592_s29 = scalar_lea.hbm %s4497_s2, 1024 }
  0x45   : > { %s3587_s14 = scalar_lea.hbm %s3917_s13, 256  ;;  %p3593_p0 = scmp.lt.u32.totalorder %s3917_s13, %s4497_s2 }
  0x46   : > { %p3588_p4 = scmp.ne.s32.totalorder %s3917_s13, %s3587_s14  ;;  %p3594_p3 = scmp.lt.u32.totalorder %s3592_s29, %s3587_s14 }
  0x47   : > { %p3596_p8 = scmp.lt.u32.totalorder %s3587_s14, %s3917_s13 }
  0x48   : > { %p3590_p12 = pnand %p3589_p11, %p3588_p4  ;;  %p3595_p7 = por %p3594_p3, %p3593_p0 }
  0x4a   : > { %p3591_p13 = pneg %p3590_p12  ;;  %p3597_p9 = por %p3596_p8, %p3595_p7 }
  0x4c   : > { %p3598_p10 = pnand %p3597_p9, %p3591_p13 }
  0x4e   : > { %3601 = shalt.err (!%p3598_p10)
}
  0x4f   : > { %s3602_s28 = scalar_lea.vmem %s3919_s26, 256  ;;  %s3724_s23 = smov [#allocation3]  }
  0x50   : > { %p3603_p5 = scmp.ne.s32.totalorder %s3919_s26, %s3602_s28  ;;  %s3607_s19 = sshll.u32 %s3724_s23, 4  ;;  %s3608_s19 = int_to_ptr.vmem [resolvable:$false] %s3607_s19 }
  0x51   : > { %s3609_s20 = scalar_lea.vmem %s3608_s19, 512  ;;  %p3610_p4 = scmp.lt.s32.totalorder %s3919_s26, %s3608_s19 }
  0x52   : > { %p3605_p1 = pnand %p3603_p5, %p3589_p11  ;;  %p3611_p12 = scmp.lt.s32.totalorder %s3609_s20, %s3602_s28 }
  0x54   : > { %p3606_p2 = pneg %p3605_p1  ;;  %p3612_p0 = por %p3611_p12, %p3610_p4 }
  0x56   : > { %p3613_p3 = pnand %p3612_p0, %p3606_p2 }
  0x58   : > { %3616 = shalt.err (!%p3613_p3)
}
  0x59   : > { %s3725_s14 = smov 128   ;;  %s3726_s29 = smov 8  }
  0x5a   : > { %3420 = dma.hbm_to_vmem [thread:$0]  (!%p4498_p6), %s3917_s13, 256, %s3919_s26, %s448_s18, %s3725_s14, %s3725_s14, %s3726_s29  }
  0x5b   : > { %s468_s15 = sand.u32 1, %s3721_s16   ;;  %s3042_s25 = sshll.u32 %s3888_s21, 1 }
  0x5c   : > { %s3158_s23 = sshll.u32 %s3721_s16, 5  ;;  %s472_s28 = scalar_lea.vmem [#allocation6], %s3042_s25 }
  0x5d   : > { %s479_s19 = sshll.u32 %s472_s28, 4  ;;  %s3955_s4 = scalar_lea.hbm %s4450_s3, %s3158_s23  ;;  %s3957_s19 = int_to_ptr.vmem [resolvable:$true] %s479_s19 }
  0x5e   : > { %s3959_s12 = scalar_lea.sflag [#allocation7], %s468_s15  ;;  %s3617_s8 = scalar_lea.hbm %s3955_s4, 32 }
  0x5f   : > { %p3618_p13 = scmp.ne.s32.totalorder %s3955_s4, %s3617_s8  ;;  %s3622_s2 = scalar_lea.hbm %s4450_s3, 128 }
  0x60   : > { %p3623_p9 = scmp.lt.u32.totalorder %s3955_s4, %s4450_s3  ;;  %p3624_p10 = scmp.lt.u32.totalorder %s3622_s2, %s3617_s8 }
  0x61   : > { %p3620_p7 = pnand %p3618_p13, %p3589_p11  ;;  %p3626_p1 = scmp.lt.u32.totalorder %s3617_s8, %s3955_s4 }
  0x62   : > { %p3625_p5 = por %p3624_p10, %p3623_p9 }
  0x63   : > { %p3621_p8 = pneg %p3620_p7 }
  0x64   : > { %p3627_p2 = por %p3626_p1, %p3625_p5 }
  0x66   : > { %p3628_p4 = pnand %p3627_p2, %p3621_p8 }
  0x68   : > { %3631 = shalt.err (!%p3628_p4)
}
  0x69   : > { %s3632_s14 = scalar_lea.vmem %s3957_s19, 32  ;;  %s3727_s29 = smov [#allocation6]  }
  0x6a   : > { %p3633_p12 = scmp.ne.s32.totalorder %s3957_s19, %s3632_s14  ;;  %s3637_s15 = sshll.u32 %s3727_s29, 4  ;;  %s3638_s15 = int_to_ptr.vmem [resolvable:$false] %s3637_s15 }
  0x6b   : > { %s3639_s25 = scalar_lea.vmem %s3638_s15, 64  ;;  %p3640_p13 = scmp.lt.s32.totalorder %s3957_s19, %s3638_s15 }
  0x6c   : > { %p3635_p0 = pnand %p3633_p12, %p3589_p11  ;;  %p3641_p7 = scmp.lt.s32.totalorder %s3639_s25, %s3632_s14 }
  0x6e   : > { %p3636_p3 = pneg %p3635_p0  ;;  %p3642_p9 = por %p3641_p7, %p3640_p13 }
  0x70   : > { %p3643_p10 = pnand %p3642_p9, %p3636_p3 }
  0x72   : > { %3646 = shalt.err (!%p3643_p10)
}
  0x73   : > { %s3728_s8 = smov 16   ;;  %s3729_s23 = smov 1  }
  0x74   : > { %3423 = dma.hbm_to_vmem [thread:$0]  (!%p4498_p6), %s3955_s4, 32, %s3957_s19, %s3959_s12, %s3728_s8, %s3728_s8, %s3729_s23  }
  0x75   : > { %p4499_p11 = scmp.ne.s32.totalorder %s4493_s27, 0 }
  0x76   : > { %s3988_s28 = sand.u32 (!%p4499_p11), 1, %s3713_s30   ;;  %p4500_p8 = scmp.ne.s32.totalorder (!%p4499_p11), %s4488_s24, 0 }
  0x77   : > { %491 = sbr.rel (%p4499_p11) target bundleno = 3938 (0xf62), region = 76  ;;  %s3046_s20 = sshll.u32 (!%p4499_p11), %s3988_s28, 4 }
  0x78   : > { %s494_s21 = scalar_lea.sflag (!%p4499_p11), [#allocation4], %s3988_s28  ;;  %s497_s26 = scalar_lea.vmem (!%p4499_p11), [#allocation3], %s3046_s20 }
  0x7e   : > { %3692 = dma.done.wait (%p4500_p8), %s494_s21, 256  }
  0x7f   : > { %3694 = vsyncadd (%p4500_p8), %s494_s21, 4294967040  ;;  %s502_s4 = sand.u32 1, %s3835_s17   ;;  %s3047_s12 = sshll.u32 %s3988_s28, 1 }
  0x80   : > { %s503_s22 = scalar_lea.sflag [#allocation7], %s502_s4  ;;  %s4000_s27 = scalar_lea.vmem [#allocation6], %s3047_s12 }
  0x81   : > { %3696 = dma.done.wait (%p4500_p8), %s503_s22, 32  }
  0x82   : > { %3698 = vsyncadd (%p4500_p8), %s503_s22, 4294967264  ;;  %p4501_p6 = scmp.eq.s32.totalorder %s3835_s17, 0 }
  0x84   : > { %3700 = dma.done.wait (%p4501_p6), [#allocation7], 128   ;;  %p4502_p5 = pmov %p4501_p6 }
  0x85   : > { %s3050_s19 = sshll.u32 %s3835_s17, 1  ;;  %v3730_v0 = vmov 0.0   ;;  %vm3731_vm0 = vmmov 0   ;;  %v3477_v1 = vld [vmem:[%s4456_s9] sm:$0xff]   ;;  %v3478_v2 = vld [vmem:[%s4456_s9 + $0x8] sm:$0xff]   ;;  %vm612_vm1 = vcmask 261120   ;;  %v676_v13 = vlaneseq }
  0x86   : > { %3702 = vsyncadd (%p4502_p5), [#allocation7], 4294967168  ;;  %3227 = vmatprep.subr.bf16.mxu0 %v3730_v0  ;;  %3231 = vmatprep.mubr.msk.bf16.mxu0 %vm3731_vm0, %v3730_v0  ;;  %p571_p1 = scmp.lt.s32.totalorder %s3050_s19, 7  ;;  %v586_v3 = vld [vmem:[%s497_s26] sm:$0xff]  ;;  %v587_v4 = vld [vmem:[%s497_s26 + $0x8] sm:$0xff]  ;;  %vm666_vm2 = vcmask 253952  }
  0x87   : > { %3235 = vmatprep.subr.bf16.mxu1 %v3730_v0  ;;  %3239 = vmatprep.mubr.msk.bf16.mxu1 %vm3731_vm0, %v3730_v0  ;;  %v3479_v5 = vld [vmem:[%s4452_s5] sm:$0xff]   ;;  %v588_v6 = vpack.c.bf16 %v587_v4, %v586_v3  ;;  %v3480_v7 = vld [vmem:[%s4452_s5 + $0x8] sm:$0xff]   ;;  %v3732_v11 = vmov 1966171168   ;;  %v658_v15 = vld [vmem:[%s4000_s27] sm:$0x1] }
  0x88   : > { %s4518_s19 = smov (!%p571_p1, %s3050_s19), 7  ;;  %3228 = vmatpush3.bf16.msra.mxu0 %v3477_v1  ;;  %3236 = vmatpush3.bf16.msra.mxu1 %v3479_v5  ;;  %v674_v12 = vunpack.c.l.s4 %v3732_v11  ;;  %v4053_v14 = vld [vmem:[%s4458_s11] sm:$0x1]  ;;  %v677_v19 = vshrl.u32 %v676_v13, 7  ;;  %v659_v20 = vld [vmem:[%s4000_s27 + $0x1] sm:$0x1] }
  0x89   : > { %s3051_s24 = sshll.u32 %s4518_s19, 3  ;;  %3229 = vmatprep.subr.bf16.mxu0 %v3730_v0  ;;  %3237 = vmatprep.subr.bf16.mxu1 %v3730_v0  ;;  %v3054_v16 = vld [vmem:[%s4457_s10] ss:$0 sm:$0xff]  ;;  %v660_v17 = vmul.f32 %v658_v15, %v4053_v14  ;;  %v661_v25 = vmul.f32 %v659_v20, %v4053_v14  ;;  %vm982_vm3 = vcmask 64512   ;;  %s3733_s19 = smov 120   ;;  %vm1769_vm4 = vcmask 1043456  }
  0x8a   : > { %s574_s25 = scalar_lea.vmem %s4447_s0, %s3051_s24  ;;  %v675_v18 = vunpack.c.0.s8 %v674_v12  ;;  %s580_s29 = scalar_lea.vmem %s4448_s1, %s3051_s24 }
  0x8b   : > { %v839_v8 = vld [vmem:[%s574_s25] sm:$0xff]  ;;  %v840_v9 = vld [vmem:[%s574_s25 + $0x8] sm:$0xff]  ;;  %s4503_s4 = sld [smem:[#allocation22_spill]]  ;;  %s3734_s23 = smov 112  }
  0x8c   : > { %3230 = vmatpush3.bf16.msra.mxu0 %v3478_v2  ;;  %v4040_v10 = vpack.c.bf16 %v840_v9, %v839_v8  ;;  %3238 = vmatpush3.bf16.msra.mxu1 %v3480_v7  ;;  %v4062_v27 = vsub.s32 %v675_v18, %v677_v19  ;;  %s4504_s21 = sld [smem:[#allocation23_spill]]  ;;  %s3735_s24 = smov 104  }
  0x8d   : > { %3243 = vmatprep.subr.bf16.mxu0 %v3730_v0  ;;  %3251 = vmatprep.subr.mxu1 %v3730_v0  ;;  %s4505_s2 = sld [smem:[#allocation24_spill]]  ;;  %s4506_s27 = sld [smem:[#allocation18_spill]] }
  0x8e   : > { %s3159_s13 = sshll.u32 %s3835_s17, 8  ;;  %s569_s18 = scalar_lea.vmem [#allocation9], %s3046_s20 }
  0x8f   : > { %3232 = vmatmul.mubr.msk.bf16.vlgmr.msra.gmra.mrb[0].mxu0 %vm612_vm1, %v588_v6  ;;  %3240 = vmatmul.mubr.msk.bf16.vlgmr.msra.gmra.mrb[0].mxu1 %vm612_vm1, %v4040_v10  ;;  %s2906_s14 = sshll.u32 %s569_s18, 4  ;;  %s4507_s25 = sld [smem:[#allocation25_spill]]  ;;  %s4402_s14 = int_to_ptr.vmem [resolvable:$true] %s2906_s14 }
  0x90   : > { %3247 = vmatprep.mubr.msk.bf16.mxu0 %vm3731_vm0, %v3730_v0  ;;  %3253 = vmatprep.mubr.msk.f32.mxu1 %vm3731_vm0, %v3730_v0  ;;  %s2893_s17 = scalar_lea.sflag [#allocation5], %s3988_s28  ;;  %s3647_s20 = scalar_lea.vmem %s4402_s14, 256 }
  0x91   : > { %p3648_p2 = scmp.ne.s32.totalorder %s4402_s14, %s3647_s20 }
  0x93   : > { %p4508_p4 = scmp.ne.s32.totalorder %s4506_s27, 0 }
  0x95   : > { %s4400_s8 = scalar_lea.hbm %s4507_s25, %s3159_s13  ;;  %p3649_p12 = pnand %p3648_p2, %p4508_p4 }
  0x97   : > { %p3650_p0 = pneg %p3649_p12 }
 0x162   : > { %v650_v21 = vpop.f32.mrb[0].mxu0  ;;  %v4064_v31 = vpop.f32.mrb[0].mxu1 }
 0x163   : > { %v651_v22 = vadd.f32 %v3054_v16, %v650_v21  ;;  %v3233_v23 = vpop.f32.mrb[1].mxu0  ;;  %v3241_v32 = vpop.f32.mrb[1].mxu1 }
 0x164   : > { %v653_v24 = vpop.f32.mrb[2].mxu0  ;;  %v4067_v34 = vpop.f32.mrb[2].mxu1 }
 0x165   : > { %v662_v26 = vadd.f32 %v660_v17, %v651_v22  ;;  %v751_v28 = vcombine.high %v651_v22, %v651_v22  ;;  %v654_v29 = vadd.f32 %v3054_v16, %v653_v24  ;;  %v3234_v30 = vpop.f32.mrb[3].mxu0  ;;  %v3242_v37 = vpop.f32.mrb[3].mxu1  ;;  %v679_v39 = vrot.slane %v651_v22, %v4062_v27 }
 0x167   : > { %3495 = vtanh.f32 %v662_v26  ;;  %v758_v33 = vrot.slane %v751_v28, %v4062_v27  ;;  %v663_v35 = vadd.f32 %v661_v25, %v654_v29  ;;  %v766_v36 = vcombine.high %v654_v29, %v654_v29 }
 0x168   : > { %v701_v43 = vrot.slane %v654_v29, %v4062_v27  ;;  %v680_v44 = vcombine.high %v679_v39, %v679_v39  ;;  %v687_v55 = vrot.slane %v679_v39, %v4062_v27 }
 0x169   : > { %v791_v38 = vcombine.high %v758_v33, %v758_v33  ;;  %3497 = vtanh.f32 %v663_v35  ;;  %v773_v40 = vrot.slane %v766_v36, %v4062_v27  ;;  %v765_v13 = vrot.slane %v758_v33, %v4062_v27 }
 0x16a   : > { %v702_v47 = vcombine.high %v701_v43, %v701_v43  ;;  %v694_v49 = vrot.slane %v680_v44, %v4062_v27  ;;  %v709_v57 = vrot.slane %v701_v43, %v4062_v27  ;;  %v727_v59 = vcombine.high %v687_v55, %v687_v55 }
 0x16b   : > { %v4072_v41 = vrot.slane %v791_v38, %v4062_v27  ;;  %v799_v42 = vcombine.high %v773_v40, %v773_v40  ;;  %v780_v18 = vrot.slane %v773_v40, %v4062_v27  ;;  %v817_v28 = vcombine.high %v765_v13, %v765_v13 }
 0x16c   : > { %v716_v53 = vrot.slane %v702_v47, %v4062_v27  ;;  %v728_v63 = vcombine.high %v709_v57, %v709_v57  ;;  %v739_v4 = vcombine.high %v694_v49, %v694_v49 }
 0x16d   : > { %v4076_v45 = vrot.slane %v799_v42, %v4062_v27  ;;  %v818_v33 = vcombine.high %v780_v18, %v780_v18  ;;  %v829_v38 = vcombine.high %v4072_v41, %v4072_v41 }
 0x16e   : > { %v740_v8 = vcombine.high %v716_v53, %v716_v53 }
 0x16f   : > { %v830_v43 = vcombine.high %v4076_v45, %v4076_v45 }
 0x171   : > { %v3496_v46 = vpop.eup %3495 }
 0x172   : > { %667 = vst.msk [vmem:[#allocation2] sm:$0x1] %vm666_vm2, %v3496_v46  ;;  %v669_v48 = vmul.f32 %v3496_v46, %v4053_v14 }
 0x173   : > { %v3498_v50 = vpop.eup %3497 }
 0x174   : > { %v719_v51 = vadd.f32 %v694_v49, %v669_v48  ;;  %668 = vst.msk [vmem:[#allocation2 + $0x8] sm:$0x1] %vm666_vm2, %v3498_v50  ;;  %v670_v52 = vmul.f32 %v3498_v50, %v4053_v14  ;;  %v842_v50 = vld [vmem:[%s580_s29] sm:$0xff] }
 0x176   : > { %3499 = vtanh.f32 %v719_v51  ;;  %v720_v54 = vadd.f32 %v716_v53, %v670_v52  ;;  %v843_v51 = vld [vmem:[%s580_s29 + $0x8] sm:$0xff]  ;;  %v4160_v53 = vld [vmem:[#allocation8] sm:$0xff] }
 0x177   : > { %v4153_v52 = vpack.c.bf16 %v843_v51, %v842_v50 }
 0x178   : > { %3501 = vtanh.f32 %v720_v54 }
 0x180   : > { %v3500_v56 = vpop.eup %3499 }
 0x181   : > { %723 = vst.msk [vmem:[#allocation2 + $0x1] sm:$0x1] %vm666_vm2, %v3500_v56  ;;  %v725_v58 = vmul.f32 %v3500_v56, %v4053_v14 }
 0x182   : > { %v3502_v60 = vpop.eup %3501 }
 0x183   : > { %v731_v61 = vadd.f32 %v727_v59, %v725_v58  ;;  %724 = vst.msk [vmem:[#allocation2 + $0x9] sm:$0x1] %vm666_vm2, %v3502_v60  ;;  %v726_v62 = vmul.f32 %v3502_v60, %v4053_v14 }
 0x185   : > { %3503 = vtanh.f32 %v731_v61  ;;  %v732_v1 = vadd.f32 %v728_v63, %v726_v62 }
 0x187   : > { %3505 = vtanh.f32 %v732_v1 }
 0x18f   : > { %v3504_v2 = vpop.eup %3503 }
 0x190   : > { %735 = vst.msk [vmem:[#allocation2 + $0x2] sm:$0x1] %vm666_vm2, %v3504_v2  ;;  %v737_v3 = vmul.f32 %v3504_v2, %v4053_v14 }
 0x191   : > { %v3506_v5 = vpop.eup %3505 }
 0x192   : > { %v743_v6 = vadd.f32 %v739_v4, %v737_v3  ;;  %736 = vst.msk [vmem:[#allocation2 + $0xa] sm:$0x1] %vm666_vm2, %v3506_v5  ;;  %v738_v7 = vmul.f32 %v3506_v5, %v4053_v14 }
 0x194   : > { %3507 = vtanh.f32 %v743_v6  ;;  %v744_v9 = vadd.f32 %v740_v8, %v738_v7 }
 0x196   : > { %3509 = vtanh.f32 %v744_v9 }
 0x19e   : > { %v3508_v11 = vpop.eup %3507 }
 0x19f   : > { %v749_v12 = vmul.f32 %v3508_v11, %v4053_v14  ;;  %747 = vst.msk [vmem:[#allocation2 + $0x3] sm:$0x1] %vm666_vm2, %v3508_v11 }
 0x1a0   : > { %v3510_v15 = vpop.eup %3509 }
 0x1a1   : > { %v783_v16 = vadd.f32 %v765_v13, %v749_v12  ;;  %v750_v17 = vmul.f32 %v3510_v15, %v4053_v14  ;;  %748 = vst.msk [vmem:[#allocation2 + $0xb] sm:$0x1] %vm666_vm2, %v3510_v15  ;;  %v3062_v13 = vld [vmem:[%s4503_s4] ss:$0 sm:$0xff] }
 0x1a3   : > { %3511 = vtanh.f32 %v783_v16  ;;  %v784_v19 = vadd.f32 %v780_v18, %v750_v17 }
 0x1a5   : > { %3513 = vtanh.f32 %v784_v19 }
 0x1ad   : > { %v3512_v20 = vpop.eup %3511 }
 0x1ae   : > { %787 = vst.msk [vmem:[#allocation2 + $0x4] sm:$0x1] %vm666_vm2, %v3512_v20  ;;  %v789_v21 = vmul.f32 %v3512_v20, %v4053_v14 }
 0x1af   : > { %v3514_v22 = vpop.eup %3513 }
 0x1b0   : > { %v809_v23 = vadd.f32 %v4072_v41, %v789_v21  ;;  %788 = vst.msk [vmem:[#allocation2 + $0xc] sm:$0x1] %vm666_vm2, %v3514_v22  ;;  %v790_v24 = vmul.f32 %v3514_v22, %v4053_v14  ;;  %v3058_v41 = vld [vmem:[%s4453_s6] ss:$0 sm:$0xff]  ;;  %v3483_v21 = vld [vmem:[%s4452_s5 + $0x10] sm:$0xff]  }
 0x1b1   : > { %v910_v49 = vadd.f32 %v3058_v41, %v4067_v34  ;;  %v3482_v34 = vld [vmem:[%s4454_s7 + $0x8] sm:$0xff]  }
 0x1b2   : > { %3515 = vtanh.f32 %v809_v23  ;;  %v810_v25 = vadd.f32 %v4076_v45, %v790_v24  ;;  %v3484_v24 = vld [vmem:[%s4452_s5 + $0x18] sm:$0xff]  }
 0x1b4   : > { %3517 = vtanh.f32 %v810_v25  ;;  %v3485_v25 = vld [vmem:[%s4454_s7 + $0x10] sm:$0xff]  }
 0x1bc   : > { %v3516_v26 = vpop.eup %3515 }
 0x1bd   : > { %v815_v27 = vmul.f32 %v3516_v26, %v4053_v14  ;;  %813 = vst.msk [vmem:[#allocation2 + $0x5] sm:$0x1] %vm666_vm2, %v3516_v26 }
 0x1be   : > { %v3518_v29 = vpop.eup %3517 }
 0x1bf   : > { %v821_v30 = vadd.f32 %v817_v28, %v815_v27  ;;  %v816_v32 = vmul.f32 %v3518_v29, %v4053_v14  ;;  %814 = vst.msk [vmem:[#allocation2 + $0xd] sm:$0x1] %vm666_vm2, %v3518_v29  ;;  %v3486_v27 = vld [vmem:[%s4454_s7 + $0x18] sm:$0xff]  }
 0x1c1   : > { %3519 = vtanh.f32 %v821_v30  ;;  %v822_v35 = vadd.f32 %v818_v33, %v816_v32 }
 0x1c3   : > { %3521 = vtanh.f32 %v822_v35 }
 0x1cb   : > { %v3520_v36 = vpop.eup %3519 }
 0x1cc   : > { %v827_v37 = vmul.f32 %v3520_v36, %v4053_v14  ;;  %825 = vst.msk [vmem:[#allocation2 + $0x6] sm:$0x1] %vm666_vm2, %v3520_v36 }
 0x1cd   : > { %v3522_v39 = vpop.eup %3521 }
 0x1ce   : > { %v833_v40 = vadd.f32 %v829_v38, %v827_v37  ;;  %v828_v42 = vmul.f32 %v3522_v39, %v4053_v14  ;;  %826 = vst.msk [vmem:[#allocation2 + $0xe] sm:$0x1] %vm666_vm2, %v3522_v39  ;;  %v907_v14 = vadd.f32 %v3058_v41, %v4064_v31  ;;  %v3481_v31 = vld [vmem:[%s4454_s7] sm:$0xff]  }
 0x1cf   : > { %3244 = vmatpush3.bf16.msra.mxu0 %v3481_v31  ;;  %v3077_v37 = vld [vmem:[%s4453_s6 + $0x1] ss:$0 sm:$0xff] }
 0x1d0   : > { %3523 = vtanh.f32 %v833_v40  ;;  %v834_v44 = vadd.f32 %v830_v43, %v828_v42  ;;  %3245 = vmatprep.subr.bf16.mxu0 %v3730_v0  ;;  %v3086_v43 = vld [vmem:[%s4503_s4 + $0x1] ss:$0 sm:$0xff] }
 0x1d2   : > { %3525 = vtanh.f32 %v834_v44 }
 0x1d3   : > { %3246 = vmatpush3.bf16.msra.mxu0 %v3482_v34 }
 0x1d4   : > { %3261 = vmatprep.subr.mxu0 %v3730_v0 }
 0x1d6   : > { %3248 = vmatmul.mubr.msk.bf16.vlgmr.msra.gmra.mrb[4].mxu0 %vm612_vm1, %v4153_v52 }
 0x1d7   : > { %3263 = vmatprep.mubr.msk.f32.mxu0 %vm3731_vm0, %v3730_v0 }
 0x1da   : > { %v3524_v46 = vpop.eup %3523 }
 0x1db   : > { %837 = vst.msk [vmem:[#allocation2 + $0x7] sm:$0x1] %vm666_vm2, %v3524_v46 }
 0x1dc   : > { %v3526_v47 = vpop.eup %3525 }
 0x1dd   : > { %838 = vst.msk [vmem:[#allocation2 + $0xf] sm:$0x1] %vm666_vm2, %v3526_v47 }
 0x1e2   : > { %v4124_v45 = vld [vmem:[#allocation2] sm:$0xff] }
 0x1e3   : > { %3252 = vmatpush3.xpose.msk.msra.mxu1 %vm982_vm3, %v4124_v45 }
 0x1e4   : > { %3256 = vmatprep.subr.mxu1 %v3730_v0  ;;  %v4130_v48 = vld [vmem:[#allocation2 + $0x8] sm:$0xff] }
 0x1e6   : > { %3254 = vmatmul.mubr.msk.f32.vlgmr.msra.gmra.mrb[4].mxu1 %vm982_vm3, %v907_v14 }
 0x1e7   : > { %3257 = vmatpush3.xpose.msk.msra.mxu1 %vm982_vm3, %v4130_v48  ;;  %3258 = vmatprep.mubr.msk.f32.mxu1 %vm3731_vm0, %v3730_v0 }
 0x1e8   : > { %3266 = vmatprep.subr.mxu1 %v3730_v0 }
 0x1ea   : > { %3259 = vmatmul.mubr.msk.f32.vlgmr.msra.gmra.mrb[6].mxu1 %vm982_vm3, %v910_v49 }
 0x1eb   : > { %3268 = vmatprep.mubr.msk.f32.mxu1 %vm3731_vm0, %v3730_v0 }
 0x2a9   : > { %v973_v9 = vpop.f32.mrb[4].mxu0 }
 0x2aa   : > { %v3249_v11 = vpop.f32.mrb[5].mxu0  ;;  %v974_v16 = vadd.f32 %v3062_v13, %v973_v9 }
 0x2ab   : > { %v976_v12 = vpop.f32.mrb[6].mxu0  ;;  %v1304_v11 = vld [vmem:[%s4504_s21] sm:$0xf] }
 0x2ac   : > { %v3250_v15 = vpop.f32.mrb[7].mxu0  ;;  %v977_v17 = vadd.f32 %v3062_v13, %v976_v12  ;;  %3262 = vmatpush3.msra.mxu0 %v974_v16  ;;  %v1818_v16 = vsel %vm1769_vm4, %v1304_v11, 0 }
 0x2ad   : > { %3271 = vmatprep.subr.bf16.mxu0 %v3730_v0 }
 0x2ae   : > { %3267 = vmatpush3.msra.mxu1 %v977_v17  ;;  %v3487_v17 = vld [vmem:[%s4454_s7 + $0x20] sm:$0xff]  }
 0x2af   : > { %3279 = vmatprep.subr.bf16.mxu1 %v3730_v0 }
 0x2b9   : > { %v1055_v54 = vpop.f32.mrb[4].mxu1 }
 0x2ba   : > { %v1056_v55 = vadd.f32 %v1055_v54, %v4160_v53  ;;  %v3255_v56 = vpop.f32.mrb[5].mxu1 }
 0x2bc   : > { %v1135_v57 = vsel %vm982_vm3, %v1056_v55, -inf }
 0x2bd   : > { %1136 = vmax.xlane.f32.xlu0 %v1135_v57  ;;  %v1131_v58 = vpop.f32.mrb[6].mxu1 }
 0x2be   : > { %v1132_v59 = vadd.f32 %v1131_v58, %v4160_v53  ;;  %v3260_v60 = vpop.f32.mrb[7].mxu1 }
 0x2c0   : > { %v1138_v61 = vsel %vm982_vm3, %v1132_v59, -inf }
 0x2c1   : > { %1139 = vmax.xlane.f32.xlu1 %v1138_v61 }
 0x34a   : > { %v1137_v62 = vpop.xlane.xlu0 %1136 }
 0x34b   : > { %v1141_v63 = vsub.f32 %v1056_v55, %v1137_v62 }
 0x34d   : > { %v1143_v1 = vmul.f32 1.442695, %v1141_v63 }
 0x34e   : > { %v1140_v2 = vpop.xlane.xlu1 %1139 }
 0x34f   : > { %3527 = vpow2.f32 %v1143_v1  ;;  %v1142_v3 = vsub.f32 %v1132_v59, %v1140_v2 }
 0x351   : > { %v1145_v4 = vmul.f32 1.442695, %v1142_v3 }
 0x353   : > { %3529 = vpow2.f32 %v1145_v4 }
 0x359   : > { %v3528_v5 = vpop.eup %3527 }
 0x35a   : > { %v1147_v6 = vsel %vm982_vm3, %v3528_v5, 0.0 }
 0x35b   : > { %1148 = vadd.xlane.f32.xlu0 %v1147_v6 }
 0x35d   : > { %v3530_v7 = vpop.eup %3529 }
 0x35e   : > { %v1150_v8 = vsel %vm982_vm3, %v3530_v7, 0.0 }
 0x35f   : > { %1151 = vadd.xlane.f32.xlu1 %v1150_v8 }
 0x370   : > { %1518 = vrot.lane.b32.xlu1 %v4130_v48, %s3733_s19 }
 0x371   : > { %1440 = vrot.lane.b32.xlu0 %v4124_v45, %s3733_s19 }
 0x3e8   : > { %v1149_v18 = vpop.xlane.xlu0 %1148 }
 0x3e9   : > { %3531 = vrcp.f32 %v1149_v18  ;;  %v3488_v18 = vld [vmem:[%s4454_s7 + $0x28] sm:$0xff]  }
 0x3ec   : > { %v1152_v19 = vpop.xlane.xlu1 %1151  ;;  %v1441_v28 = vpop.permute.xlu0 %1440 }
 0x3ed   : > { %3533 = vrcp.f32 %v1152_v19 }
 0x3f0   : > { %v1519_v29 = vpop.permute.xlu1 %1518 }
 0x3f3   : > { %v3532_v20 = vpop.eup %3531 }
 0x3f4   : > { %v1155_v22 = vmul.f32 %v3532_v20, %v3528_v5  ;;  %v3096_v20 = vld [vmem:[%s4504_s21 + $0x4] sm:$0xf] }
 0x3f6   : > { %3264 = vmatmul.mubr.msk.f32.vlgmr.msra.gmra.mrb[8].mxu0 %vm982_vm3, %v1155_v22 }
 0x3f7   : > { %v3534_v23 = vpop.eup %3533  ;;  %3272 = vmatpush3.bf16.msra.mxu0 %v3483_v21  ;;  %3275 = vmatprep.mubr.msk.bf16.mxu0 %vm3731_vm0, %v3730_v0  ;;  %v1771_v21 = vsel %vm1769_vm4, %v3096_v20, 0 }
 0x3f8   : > { %v1156_v26 = vmul.f32 %v3534_v23, %v3530_v7  ;;  %3273 = vmatprep.subr.bf16.mxu0 %v3730_v0 }
 0x3fa   : > { %3269 = vmatmul.mubr.msk.f32.vlgmr.msra.gmra.mrb[8].mxu1 %vm982_vm3, %v1156_v26 }
 0x3fb   : > { %3274 = vmatpush3.bf16.msra.mxu0 %v3484_v24  ;;  %3280 = vmatpush3.bf16.msra.mxu1 %v3485_v25  ;;  %v3489_v25 = vld [vmem:[%s4452_s5 + $0x20] sm:$0xff]  }
 0x3fc   : > { %3281 = vmatprep.subr.bf16.mxu1 %v3730_v0  ;;  %3287 = vmatprep.subr.mxu0 %v3730_v0 }
 0x3fd   : > { %3283 = vmatprep.mubr.msk.bf16.mxu1 %vm3731_vm0, %v3730_v0 }
 0x3fe   : > { %3276 = vmatmul.mubr.msk.bf16.vlgmr.msra.gmra.mrb[12].mxu0 %vm612_vm1, %v4040_v10 }
 0x3ff   : > { %3282 = vmatpush3.bf16.msra.mxu1 %v3486_v27  ;;  %3289 = vmatprep.mubr.msk.f32.mxu0 %vm3731_vm0, %v3730_v0 }
 0x400   : > { %3292 = vmatprep.subr.mxu1 %v3730_v0 }
 0x402   : > { %3284 = vmatmul.mubr.msk.bf16.vlgmr.msra.gmra.mrb[12].mxu1 %vm612_vm1, %v4153_v52 }
 0x403   : > { %3294 = vmatprep.mubr.msk.f32.mxu1 %vm3731_vm0, %v3730_v0 }
 0x404   : > { %3288 = vmatpush3.xpose.msk.msra.mxu0 %vm982_vm3, %v1441_v28 }
 0x405   : > { %3297 = vmatprep.subr.mxu0 %v3730_v0 }
 0x408   : > { %3293 = vmatpush3.xpose.msk.msra.mxu1 %vm982_vm3, %v1519_v29  ;;  %v3490_v29 = vld [vmem:[%s4452_s5 + $0x28] sm:$0xff]  }
 0x409   : > { %3302 = vmatprep.subr.mxu1 %v3730_v0 }
 0x4c9   : > { %v4209_v30 = vpop.f32.mrb[8].mxu0 }
 0x4ca   : > { %v3265_v32 = vpop.f32.mrb[9].mxu0 }
 0x4cd   : > { %v4211_v33 = vpop.f32.mrb[8].mxu1 }
 0x4ce   : > { %v1303_v35 = vpack.c.bf16 %v4211_v33, %v4209_v30  ;;  %v3270_v36 = vpop.f32.mrb[9].mxu1 }
 0x4d1   : > { %v1364_v38 = vpop.f32.mrb[12].mxu0 }
 0x4d2   : > { %v1365_v39 = vadd.f32 %v3077_v37, %v1364_v38  ;;  %v3277_v40 = vpop.f32.mrb[13].mxu0 }
 0x4d3   : > { %v1367_v42 = vpop.f32.mrb[14].mxu0 }
 0x4d4   : > { %v1368_v44 = vadd.f32 %v3077_v37, %v1367_v42  ;;  %v3278_v46 = vpop.f32.mrb[15].mxu0  ;;  %3290 = vmatmul.mubr.msk.f32.vlgmr.msra.gmra.mrb[10].mxu0 %vm982_vm3, %v1365_v39 }
 0x4d5   : > { %v1430_v47 = vpop.f32.mrb[12].mxu1  ;;  %3299 = vmatprep.mubr.msk.f32.mxu0 %vm3731_vm0, %v3730_v0 }
 0x4d6   : > { %3295 = vmatmul.mubr.msk.f32.vlgmr.msra.gmra.mrb[10].mxu1 %vm982_vm3, %v1368_v44  ;;  %v1431_v41 = vadd.f32 %v3086_v43, %v1430_v47  ;;  %v3285_v14 = vpop.f32.mrb[13].mxu1 }
 0x4d7   : > { %v1433_v49 = vpop.f32.mrb[14].mxu1  ;;  %3304 = vmatprep.mubr.msk.f32.mxu1 %vm3731_vm0, %v3730_v0  ;;  %v3104_v14 = vld [vmem:[%s4453_s6 + $0x2] ss:$0 sm:$0xff] }
 0x4d8   : > { %v1434_v31 = vadd.f32 %v3086_v43, %v1433_v49  ;;  %v3286_v50 = vpop.f32.mrb[15].mxu1  ;;  %3298 = vmatpush3.msra.mxu0 %v1431_v41  ;;  %v3113_v41 = vld [vmem:[%s4503_s4 + $0x2] ss:$0 sm:$0xff] }
 0x4d9   : > { %3307 = vmatprep.subr.bf16.mxu0 %v3730_v0 }
 0x4da   : > { %3303 = vmatpush3.msra.mxu1 %v1434_v31 }
 0x4db   : > { %3313 = vmatprep.subr.bf16.mxu1 %v3730_v0 }
 0x5a7   : > { %v1513_v51 = vpop.f32.mrb[10].mxu0 }
 0x5a8   : > { %v1514_v34 = vadd.f32 %v1513_v51, %v4160_v53  ;;  %v3291_v54 = vpop.f32.mrb[11].mxu0 }
 0x5a9   : > { %v1591_v55 = vpop.f32.mrb[10].mxu1 }
 0x5aa   : > { %v1592_v56 = vadd.f32 %v1591_v55, %v4160_v53  ;;  %v3296_v57 = vpop.f32.mrb[11].mxu1  ;;  %v1595_v58 = vsel %vm982_vm3, %v1514_v34, -inf }
 0x5ab   : > { %1596 = vmax.xlane.f32.xlu1 %v1595_v58 }
 0x5ac   : > { %v1598_v59 = vsel %vm982_vm3, %v1592_v56, -inf }
 0x5ad   : > { %1599 = vmax.xlane.f32.xlu0 %v1598_v59 }
 0x638   : > { %v1597_v60 = vpop.xlane.xlu1 %1596 }
 0x639   : > { %v1601_v61 = vsub.f32 %v1514_v34, %v1597_v60 }
 0x63a   : > { %v1600_v62 = vpop.xlane.xlu0 %1599 }
 0x63b   : > { %v1603_v63 = vmul.f32 1.442695, %v1601_v61  ;;  %v1602_v1 = vsub.f32 %v1592_v56, %v1600_v62 }
 0x63d   : > { %3535 = vpow2.f32 %v1603_v63  ;;  %v1605_v2 = vmul.f32 1.442695, %v1602_v1 }
 0x63f   : > { %3537 = vpow2.f32 %v1605_v2 }
 0x647   : > { %v3536_v3 = vpop.eup %3535 }
 0x648   : > { %v1607_v4 = vsel %vm982_vm3, %v3536_v3, 0.0 }
 0x649   : > { %v3538_v5 = vpop.eup %3537  ;;  %1608 = vadd.xlane.f32.xlu0 %v1607_v4 }
 0x64a   : > { %v1610_v6 = vsel %vm982_vm3, %v3538_v5, 0.0 }
 0x64b   : > { %1611 = vadd.xlane.f32.xlu1 %v1610_v6 }
 0x65c   : > { %2074 = vrot.lane.b32.xlu1 %v4130_v48, %s3734_s23 }
 0x65f   : > { %1996 = vrot.lane.b32.xlu0 %v4124_v45, %s3734_s23  ;;  %s3736_s23 = smov [#allocation9]  }
 0x660   : > { %s3651_s19 = sshll.u32 %s3736_s23, 4  ;;  %s3652_s19 = int_to_ptr.vmem [resolvable:$false] %s3651_s19 }
 0x661   : > { %p3654_p3 = scmp.lt.s32.totalorder %s4402_s14, %s3652_s19 }
 0x6d6   : > { %v1609_v7 = vpop.xlane.xlu0 %1608 }
 0x6d7   : > { %3539 = vrcp.f32 %v1609_v7 }
 0x6d8   : > { %v1612_v8 = vpop.xlane.xlu1 %1611 }
 0x6d9   : > { %3541 = vrcp.f32 %v1612_v8 }
 0x6dc   : > { %v2075_v19 = vpop.permute.xlu1 %2074 }
 0x6e1   : > { %v3540_v9 = vpop.eup %3539 }
 0x6e2   : > { %v1615_v12 = vmul.f32 %v3540_v9, %v3536_v3 }
 0x6e3   : > { %v3542_v13 = vpop.eup %3541 }
 0x6e4   : > { %v1616_v15 = vmul.f32 %v3542_v13, %v3538_v5  ;;  %3300 = vmatmul.mubr.msk.f32.vlgmr.msra.gmra.mrb[16].mxu0 %vm982_vm3, %v1615_v12 }
 0x6e5   : > { %3309 = vmatprep.mubr.msk.bf16.mxu0 %vm3731_vm0, %v3730_v0  ;;  %3308 = vmatpush3.bf16.msra.mxu0 %v1771_v21  ;;  %v3123_v21 = vld [vmem:[%s4504_s21 + $0x8] sm:$0xf] }
 0x6e6   : > { %3305 = vmatmul.mubr.msk.f32.vlgmr.msra.gmra.mrb[16].mxu1 %vm982_vm3, %v1616_v15  ;;  %3319 = vmatprep.subr.bf16.mxu0 %v3730_v0 }
 0x6e7   : > { %3314 = vmatpush3.bf16.msra.mxu1 %v1818_v16  ;;  %3315 = vmatprep.mubr.msk.bf16.mxu1 %vm3731_vm0, %v3730_v0 }
 0x6e8   : > { %3327 = vmatprep.subr.bf16.mxu1 %v3730_v0 }
 0x6ea   : > { %3316 = vmatmul.mubr.msk.bf16.vlgmr.msra.gmra.mrb[20].mxu1 %vm982_vm3, %v1303_v35  ;;  %v1997_v35 = vpop.permute.xlu0 %1996 }
 0x6eb   : > { %3328 = vmatpush3.bf16.msra.mxu1 %v3487_v17  ;;  %3331 = vmatprep.mubr.msk.bf16.mxu1 %vm3731_vm0, %v3730_v0 }
 0x6ec   : > { %3329 = vmatprep.subr.bf16.mxu1 %v3730_v0 }
 0x6ef   : > { %3330 = vmatpush3.bf16.msra.mxu1 %v3488_v18 }
 0x6f0   : > { %3340 = vmatprep.subr.mxu1 %v3730_v0 }
 0x6f2   : > { %3332 = vmatmul.mubr.msk.bf16.vlgmr.msra.gmra.mrb[24].mxu1 %vm612_vm1, %v4153_v52 }
 0x6f3   : > { %3342 = vmatprep.mubr.msk.f32.mxu1 %vm3731_vm0, %v3730_v0 }
 0x6f8   : > { %3341 = vmatpush3.xpose.msk.msra.mxu1 %vm982_vm3, %v2075_v19  ;;  %v3491_v19 = vld [vmem:[%s4452_s5 + $0x30] sm:$0xff]  }
 0x6f9   : > { %3350 = vmatprep.subr.mxu1 %v3730_v0 }
 0x7b7   : > { %v1686_v22 = vpop.f32.mrb[16].mxu0 }
 0x7b8   : > { %v3301_v23 = vpop.f32.mrb[17].mxu0 }
 0x7b9   : > { %v1759_v24 = vpop.f32.mrb[16].mxu1 }
 0x7ba   : > { %v1763_v26 = vpack.c.bf16 %v1759_v24, %v1686_v22  ;;  %v3306_v27 = vpop.f32.mrb[17].mxu1  ;;  %v2326_v22 = vsel %vm1769_vm4, %v3123_v21, 0 }
 0x7bc   : > { %3310 = vmatmul.mubr.msk.bf16.vlgmr.msra.gmra.mrb[20].mxu0 %vm982_vm3, %v1763_v26 }
 0x7bd   : > { %3320 = vmatpush3.bf16.msra.mxu0 %v3489_v25  ;;  %v1854_v28 = vpop.f32.mrb[20].mxu1  ;;  %3323 = vmatprep.mubr.msk.bf16.mxu0 %vm3731_vm0, %v3730_v0  ;;  %v3493_v25 = vld [vmem:[%s4454_s7 + $0x30] sm:$0xff]  }
 0x7be   : > { %v3317_v30 = vpop.f32.mrb[21].mxu1  ;;  %3321 = vmatprep.subr.bf16.mxu0 %v3730_v0 }
 0x7bf   : > { %v1857_v32 = vpop.f32.mrb[22].mxu1 }
 0x7c0   : > { %v3318_v33 = vpop.f32.mrb[23].mxu1 }
 0x7c1   : > { %3322 = vmatpush3.bf16.msra.mxu0 %v3490_v29  ;;  %v3130_v29 = vld [vmem:[%s4453_s6 + $0x3] ss:$0 sm:$0xff] }
 0x7c2   : > { %3335 = vmatprep.subr.mxu0 %v3730_v0 }
 0x7c4   : > { %3324 = vmatmul.mubr.msk.bf16.vlgmr.msra.gmra.mrb[24].mxu0 %vm612_vm1, %v4040_v10 }
 0x7c5   : > { %3337 = vmatprep.mubr.msk.f32.mxu0 %vm3731_vm0, %v3730_v0  ;;  %v1986_v36 = vpop.f32.mrb[24].mxu1 }
 0x7c6   : > { %v3333_v37 = vpop.f32.mrb[25].mxu1  ;;  %v1987_v31 = vadd.f32 %v3113_v41, %v1986_v36 }
 0x7c7   : > { %v1989_v38 = vpop.f32.mrb[26].mxu1 }
 0x7c8   : > { %v3334_v39 = vpop.f32.mrb[27].mxu1  ;;  %v1990_v54 = vadd.f32 %v3113_v41, %v1989_v38  ;;  %v3139_v41 = vld [vmem:[%s4503_s4 + $0x3] ss:$0 sm:$0xff] }
 0x7ca   : > { %3336 = vmatpush3.xpose.msk.msra.mxu0 %vm982_vm3, %v1997_v35 }
 0x7cb   : > { %3345 = vmatprep.subr.mxu0 %v3730_v0 }
 0x88f   : > { %v1807_v40 = vpop.f32.mrb[20].mxu0 }
 0x890   : > { %v4290_v42 = vadd.f32 %v1854_v28, %v1807_v40  ;;  %v3311_v43 = vpop.f32.mrb[21].mxu0  ;;  %v3494_v28 = vld [vmem:[%s4454_s7 + $0x38] sm:$0xff]  }
 0x891   : > { %v1810_v44 = vpop.f32.mrb[22].mxu0 }
 0x892   : > { %v4292_v46 = vadd.f32 %v1857_v32, %v1810_v44  ;;  %v3312_v47 = vpop.f32.mrb[23].mxu0 }
 0x897   : > { %v1920_v49 = vpop.f32.mrb[24].mxu0 }
 0x898   : > { %v1921_v50 = vadd.f32 %v3104_v14, %v1920_v49  ;;  %v3325_v51 = vpop.f32.mrb[25].mxu0 }
 0x899   : > { %v1923_v34 = vpop.f32.mrb[26].mxu0 }
 0x89a   : > { %v1924_v55 = vadd.f32 %v3104_v14, %v1923_v34  ;;  %v3326_v56 = vpop.f32.mrb[27].mxu0  ;;  %3338 = vmatmul.mubr.msk.f32.vlgmr.msra.gmra.mrb[18].mxu0 %vm982_vm3, %v1921_v50 }
 0x89b   : > { %3346 = vmatpush3.msra.mxu0 %v1987_v31  ;;  %3347 = vmatprep.mubr.msk.f32.mxu0 %vm3731_vm0, %v3730_v0 }
 0x89c   : > { %3343 = vmatmul.mubr.msk.f32.vlgmr.msra.gmra.mrb[18].mxu1 %vm982_vm3, %v1924_v55  ;;  %3355 = vmatprep.subr.bf16.mxu0 %v3730_v0 }
 0x89d   : > { %3351 = vmatpush3.msra.mxu1 %v1990_v54  ;;  %3352 = vmatprep.mubr.msk.f32.mxu1 %vm3731_vm0, %v3730_v0 }
 0x89e   : > { %3361 = vmatprep.subr.bf16.mxu1 %v3730_v0 }
 0x96d   : > { %v2069_v57 = vpop.f32.mrb[18].mxu0 }
 0x96e   : > { %v2070_v58 = vadd.f32 %v2069_v57, %v4160_v53  ;;  %v3339_v59 = vpop.f32.mrb[19].mxu0 }
 0x96f   : > { %v2147_v60 = vpop.f32.mrb[18].mxu1 }
 0x970   : > { %v2148_v61 = vadd.f32 %v2147_v60, %v4160_v53  ;;  %v3344_v62 = vpop.f32.mrb[19].mxu1  ;;  %v2151_v63 = vsel %vm982_vm3, %v2070_v58, -inf }
 0x971   : > { %2152 = vmax.xlane.f32.xlu1 %v2151_v63 }
 0x972   : > { %v2154_v1 = vsel %vm982_vm3, %v2148_v61, -inf }
 0x973   : > { %2155 = vmax.xlane.f32.xlu0 %v2154_v1 }
 0x9fe   : > { %v2153_v2 = vpop.xlane.xlu1 %2152 }
 0x9ff   : > { %v2157_v3 = vsub.f32 %v2070_v58, %v2153_v2 }
 0xa00   : > { %v2156_v4 = vpop.xlane.xlu0 %2155 }
 0xa01   : > { %v2159_v5 = vmul.f32 1.442695, %v2157_v3  ;;  %v2158_v6 = vsub.f32 %v2148_v61, %v2156_v4 }
 0xa03   : > { %3543 = vpow2.f32 %v2159_v5  ;;  %v2161_v7 = vmul.f32 1.442695, %v2158_v6 }
 0xa05   : > { %3545 = vpow2.f32 %v2161_v7 }
 0xa0d   : > { %v3544_v8 = vpop.eup %3543 }
 0xa0e   : > { %v2163_v9 = vsel %vm982_vm3, %v3544_v8, 0.0 }
 0xa0f   : > { %v3546_v11 = vpop.eup %3545  ;;  %2164 = vadd.xlane.f32.xlu0 %v2163_v9 }
 0xa10   : > { %v2166_v12 = vsel %vm982_vm3, %v3546_v11, 0.0 }
 0xa11   : > { %2167 = vadd.xlane.f32.xlu1 %v2166_v12 }
 0xa22   : > { %2584 = vrot.lane.b32.xlu1 %v4130_v48, %s3735_s24 }
 0xa25   : > { %2506 = vrot.lane.b32.xlu0 %v4124_v45, %s3735_s24  ;;  %v3492_v45 = vld [vmem:[%s4452_s5 + $0x38] sm:$0xff]   ;;  %s3653_s24 = scalar_lea.vmem %s3652_s19, 512 }
 0xa26   : > { %p3655_p13 = scmp.lt.s32.totalorder %s3653_s24, %s3647_s20 }
 0xa28   : > { %p3656_p7 = por %p3655_p13, %p3654_p3 }
 0xa2a   : > { %p3657_p9 = pnand %p3656_p7, %p3650_p0 }
 0xa9c   : > { %v2165_v13 = vpop.xlane.xlu0 %2164 }
 0xa9d   : > { %3547 = vrcp.f32 %v2165_v13  ;;  %v3149_v13 = vld [vmem:[%s4504_s21 + $0xc] sm:$0xf] }
 0xa9e   : > { %v2168_v15 = vpop.xlane.xlu1 %2167 }
 0xa9f   : > { %3549 = vrcp.f32 %v2168_v15  ;;  %v2836_v15 = vsel %vm1769_vm4, %v3149_v13, 0 }
 0xaa0   : > { %v2507_v48 = vpop.permute.xlu0 %2506 }
 0xaa2   : > { %v2585_v37 = vpop.permute.xlu1 %2584 }
 0xaa7   : > { %v3548_v16 = vpop.eup %3547 }
 0xaa8   : > { %v2171_v17 = vmul.f32 %v3548_v16, %v3544_v8 }
 0xaa9   : > { %v3550_v18 = vpop.eup %3549 }
 0xaaa   : > { %v2172_v20 = vmul.f32 %v3550_v18, %v3546_v11  ;;  %3348 = vmatmul.mubr.msk.f32.vlgmr.msra.gmra.mrb[28].mxu0 %vm982_vm3, %v2171_v17 }
 0xaab   : > { %3357 = vmatprep.mubr.msk.bf16.mxu0 %vm3731_vm0, %v3730_v0  ;;  %3356 = vmatpush3.bf16.msra.mxu0 %v2326_v22 }
 0xaac   : > { %3353 = vmatmul.mubr.msk.f32.vlgmr.msra.gmra.mrb[28].mxu1 %vm982_vm3, %v2172_v20  ;;  %3369 = vmatprep.subr.bf16.mxu0 %v3730_v0 }
 0xaad   : > { %3362 = vmatpush3.bf16.msra.mxu1 %v3491_v19  ;;  %3365 = vmatprep.mubr.msk.bf16.mxu1 %vm3731_vm0, %v3730_v0 }
 0xaae   : > { %3363 = vmatprep.subr.bf16.mxu1 %v3730_v0 }
 0xab1   : > { %3364 = vmatpush3.bf16.msra.mxu1 %v3492_v45  ;;  %v3151_v45 = vld [vmem:[%s4505_s2] ss:$0 sm:$0xff] }
 0xab2   : > { %3377 = vmatprep.subr.mxu1 %v3730_v0 }
 0xab4   : > { %3366 = vmatmul.mubr.msk.bf16.vlgmr.msra.gmra.mrb[32].mxu1 %vm612_vm1, %v4040_v10 }
 0xab5   : > { %3379 = vmatprep.mubr.msk.f32.mxu1 %vm3731_vm0, %v3730_v0 }
 0xaba   : > { %3378 = vmatpush3.xpose.msk.msra.mxu1 %vm982_vm3, %v2507_v48 }
 0xabb   : > { %3387 = vmatprep.subr.mxu1 %v3730_v0 }
 0xb7d   : > { %v2242_v23 = vpop.f32.mrb[28].mxu0 }
 0xb7e   : > { %v3349_v24 = vpop.f32.mrb[29].mxu0 }
 0xb7f   : > { %v2315_v10 = vpop.f32.mrb[28].mxu1 }
 0xb80   : > { %v2319_v26 = vpack.c.bf16 %v2315_v10, %v2242_v23  ;;  %v3354_v27 = vpop.f32.mrb[29].mxu1 }
 0xb82   : > { %3358 = vmatmul.mubr.msk.bf16.vlgmr.msra.gmra.mrb[32].mxu0 %vm982_vm3, %v2319_v26 }
 0xb83   : > { %3370 = vmatpush3.bf16.msra.mxu0 %v3493_v25  ;;  %3373 = vmatprep.mubr.msk.bf16.mxu0 %vm3731_vm0, %v3730_v0 }
 0xb84   : > { %3371 = vmatprep.subr.bf16.mxu0 %v3730_v0 }
 0xb87   : > { %v2430_v30 = vpop.f32.mrb[32].mxu1  ;;  %3372 = vmatpush3.bf16.msra.mxu0 %v3494_v28 }
 0xb88   : > { %v2431_v32 = vadd.f32 %v3130_v29, %v2430_v30  ;;  %v3367_v33 = vpop.f32.mrb[33].mxu1  ;;  %3382 = vmatprep.subr.mxu0 %v3730_v0 }
 0xb89   : > { %v2433_v35 = vpop.f32.mrb[34].mxu1 }
 0xb8a   : > { %3380 = vmatmul.mubr.msk.f32.vlgmr.msra.gmra.mrb[30].mxu1 %vm982_vm3, %v2431_v32  ;;  %3374 = vmatmul.mubr.msk.bf16.vlgmr.msra.gmra.mrb[36].mxu0 %vm612_vm1, %v4153_v52  ;;  %v3368_v36 = vpop.f32.mrb[35].mxu1  ;;  %v2434_v38 = vadd.f32 %v3130_v29, %v2433_v35 }
 0xb8b   : > { %3384 = vmatprep.mubr.msk.f32.mxu0 %vm3731_vm0, %v3730_v0  ;;  %3389 = vmatprep.mubr.msk.f32.mxu1 %vm3731_vm0, %v3730_v0 }
 0xb90   : > { %3383 = vmatpush3.xpose.msk.msra.mxu0 %vm982_vm3, %v2585_v37 }
 0xb91   : > { %3392 = vmatprep.subr.mxu0 %v3730_v0 }
 0xb93   : > { %3385 = vmatmul.mubr.msk.f32.vlgmr.msra.gmra.mrb[30].mxu0 %vm982_vm3, %v2434_v38 }
 0xb94   : > { %3394 = vmatprep.mubr.msk.f32.mxu0 %vm3731_vm0, %v3730_v0 }
 0xc55   : > { %v2362_v39 = vpop.f32.mrb[32].mxu0 }
 0xc56   : > { %v2369_v52 = vadd.f32 %v2362_v39, %v4290_v42  ;;  %v3359_v40 = vpop.f32.mrb[33].mxu0 }
 0xc57   : > { %v2365_v43 = vpop.f32.mrb[34].mxu0 }
 0xc58   : > { %v4369_v44 = vadd.f32 %v2365_v43, %v4292_v46  ;;  %v3360_v47 = vpop.f32.mrb[35].mxu0 }
 0xc5d   : > { %v2579_v14 = vpop.f32.mrb[30].mxu1  ;;  %v2496_v49 = vpop.f32.mrb[36].mxu0 }
 0xc5e   : > { %v2580_v31 = vadd.f32 %v2579_v14, %v4160_v53  ;;  %v2497_v50 = vadd.f32 %v3139_v41, %v2496_v49  ;;  %v3375_v51 = vpop.f32.mrb[37].mxu0  ;;  %v3381_v34 = vpop.f32.mrb[31].mxu1 }
 0xc5f   : > { %v2499_v54 = vpop.f32.mrb[38].mxu0 }
 0xc60   : > { %v2661_v42 = vsel %vm982_vm3, %v2580_v31, -inf  ;;  %v2500_v55 = vadd.f32 %v3139_v41, %v2499_v54  ;;  %v3376_v56 = vpop.f32.mrb[39].mxu0  ;;  %3388 = vmatpush3.msra.mxu1 %v2497_v50 }
 0xc61   : > { %2662 = vmax.xlane.f32.xlu1 %v2661_v42  ;;  %3397 = vmatprep.subr.bf16.mxu1 %v3730_v0 }
 0xc62   : > { %3393 = vmatpush3.msra.mxu0 %v2500_v55 }
 0xc66   : > { %v2657_v46 = vpop.f32.mrb[30].mxu0 }
 0xc67   : > { %v2658_v57 = vadd.f32 %v2657_v46, %v4160_v53  ;;  %v3386_v58 = vpop.f32.mrb[31].mxu0 }
 0xc69   : > { %v2664_v59 = vsel %vm982_vm3, %v2658_v57, -inf }
 0xc6a   : > { %2665 = vmax.xlane.f32.xlu0 %v2664_v59 }
 0xcee   : > { %v2663_v60 = vpop.xlane.xlu1 %2662 }
 0xcef   : > { %v2667_v61 = vsub.f32 %v2580_v31, %v2663_v60 }
 0xcf1   : > { %v2669_v62 = vmul.f32 1.442695, %v2667_v61 }
 0xcf3   : > { %3551 = vpow2.f32 %v2669_v62 }
 0xcf7   : > { %v2666_v63 = vpop.xlane.xlu0 %2665 }
 0xcf8   : > { %v2668_v1 = vsub.f32 %v2658_v57, %v2666_v63 }
 0xcfa   : > { %v2671_v2 = vmul.f32 1.442695, %v2668_v1 }
 0xcfc   : > { %3553 = vpow2.f32 %v2671_v2 }
 0xcfd   : > { %v3552_v3 = vpop.eup %3551 }
 0xcfe   : > { %v2673_v4 = vsel %vm982_vm3, %v3552_v3, 0.0 }
 0xcff   : > { %2674 = vadd.xlane.f32.xlu0 %v2673_v4 }
 0xd06   : > { %v3554_v5 = vpop.eup %3553 }
 0xd07   : > { %v2676_v6 = vsel %vm982_vm3, %v3554_v5, 0.0 }
 0xd08   : > { %2677 = vadd.xlane.f32.xlu1 %v2676_v6 }
 0xd8c   : > { %v2675_v53 = vpop.xlane.xlu0 %2674 }
 0xd8d   : > { %3555 = vrcp.f32 %v2675_v53 }
 0xd95   : > { %v2678_v7 = vpop.xlane.xlu1 %2677 }
 0xd96   : > { %3557 = vrcp.f32 %v2678_v7 }
 0xd97   : > { %v3556_v8 = vpop.eup %3555 }
 0xd98   : > { %v2681_v9 = vmul.f32 %v3556_v8, %v3552_v3 }
 0xd9a   : > { %3390 = vmatmul.mubr.msk.f32.vlgmr.msra.gmra.mrb[36].mxu1 %vm982_vm3, %v2681_v9 }
 0xd9b   : > { %3399 = vmatprep.mubr.msk.bf16.mxu1 %vm3731_vm0, %v3730_v0  ;;  %3398 = vmatpush3.bf16.msra.mxu1 %v2836_v15 }
 0xda0   : > { %v3558_v11 = vpop.eup %3557 }
 0xda1   : > { %v2682_v12 = vmul.f32 %v3558_v11, %v3554_v5 }
 0xda3   : > { %3395 = vmatmul.mubr.msk.f32.vlgmr.msra.gmra.mrb[40].mxu0 %vm982_vm3, %v2682_v12 }
 0xe6d   : > { %v2752_v16 = vpop.f32.mrb[36].mxu1 }
 0xe6e   : > { %v3391_v17 = vpop.f32.mrb[37].mxu1 }
 0xe76   : > { %v2825_v18 = vpop.f32.mrb[40].mxu0 }
 0xe77   : > { %v2829_v19 = vpack.c.bf16 %v2825_v18, %v2752_v16  ;;  %v3396_v20 = vpop.f32.mrb[41].mxu0 }
 0xe79   : > { %3400 = vmatmul.mubr.msk.bf16.vlgmr.msra.gmra.mrb[40].mxu1 %vm982_vm3, %v2829_v19 }
 0xf4c   : > { %v2872_v0 = vpop.f32.mrb[40].mxu1 }
 0xf4d   : > { %v2879_v48 = vadd.f32 %v2872_v0, %v2369_v52  ;;  %v3401_v21 = vpop.f32.mrb[41].mxu1 }
 0xf4e   : > { %v2875_v22 = vpop.f32.mrb[42].mxu1 }
 0xf4f   : > { %v2888_v23 = vadd.f32 %v3151_v45, %v2879_v48  ;;  %v2880_v24 = vadd.f32 %v2875_v22, %v4369_v44  ;;  %v3402_v10 = vpop.f32.mrb[43].mxu1 }
 0xf51   : > { %2890 = vst.msk [vmem:[%s569_s18] sm:$0xff] %vm612_vm1, %v2888_v23  ;;  %v2889_v25 = vadd.f32 %v3151_v45, %v2880_v24 }
 0xf53   : > { %2891 = vst.msk [vmem:[%s569_s18 + $0x8] sm:$0xff] %vm612_vm1, %v2889_v25 }
 0xf54   : > { %3660 = shalt.err (!%p3657_p9)
}
 0xf55   : > { %s3661_s26 = scalar_lea.hbm %s4400_s8, 256  ;;  %s3665_s2 = scalar_lea.hbm %s4507_s25, 1024 }
 0xf56   : > { %p3662_p10 = scmp.ne.s32.totalorder %s4400_s8, %s3661_s26  ;;  %p3666_p6 = scmp.lt.u32.totalorder %s4400_s8, %s4507_s25 }
 0xf57   : > { %p3667_p5 = scmp.lt.u32.totalorder %s3665_s2, %s3661_s26  ;;  %p3669_p2 = scmp.lt.u32.totalorder %s3661_s26, %s4400_s8 }
 0xf58   : > { %p3663_p11 = pnand %p3662_p10, %p4508_p4 }
 0xf59   : > { %p3668_p1 = por %p3667_p5, %p3666_p6 }
 0xf5a   : > { %p3664_p8 = pneg %p3663_p11 }
 0xf5b   : > { %p3670_p12 = por %p3669_p2, %p3668_p1 }
 0xf5d   : > { %p3671_p0 = pnand %p3670_p12, %p3664_p8 }
 0xf5f   : > { %3674 = shalt.err (!%p3671_p0)
}
 0xf60   : > { %s3737_s29 = smov 128   ;;  %s3738_s15 = smov 8  }
 0xf61   : > { %3411 = dma.vmem_to_hbm [thread:$0]  (%p4508_p4), %s4402_s14, 256, %s4400_s8, %s2893_s17, %s3737_s29, %s3737_s29, %s3738_s15  }
 0xf62 PF: > { %s4509_s20 = sld [smem:[#allocation14_spill]]  ;;  %s4510_s23 = sld [smem:[#allocation19_spill]] }
 0xf63   : > { %p3431_p3 = scmp.ge.s32.totalorder %s3721_s16, 2 }
 0xf68   : > { %s2921_s19 = sand.u32 1, %s4509_s20   ;;  %p4511_p13 = scmp.ne.s32.totalorder %s4510_s23, 0 }
 0xf69   : > { %s2922_s24 = scalar_lea.sflag [#allocation5], %s2921_s19 }
 0xf6a   : > { %p3425_p7 = pnand %p3431_p3, %p4511_p13 }
 0xf6c   : > { %3704 = dma.done.wait (!%p3425_p7), %s2922_s24, 256  }
 0xf6d   : > { %3706 = vsyncadd (!%p3425_p7), %s2922_s24, 4294967040  ;;  %s4512_s16 = sld [smem:[#allocation16_spill]]  ;;  %s4513_s26 = sld [smem:[#allocation15_spill]] }
 0xf6e   : > { %s4514_s15 = sld [smem:[#allocation17_spill]]  ;;  %s4515_s29 = smov %s3713_s30 }
 0xf73   : > { %p30_p9 = scmp.ge.s32.totalorder %s4512_s16, 6   ;;  %s4516_s30 = smov %s4513_s26 }
 0xf75   :  { %32 = sbr.rel (!%p30_p9) target bundleno = 14 (0xe), region = 159 }
 0xf7c   :  { %2927 = vsyncpa [#allocation4], 1 }
 0xf7d   :  { %2929 = vsyncpa [#allocation4 + $0x1], 1 }
 0xf7e   :  { %2930 = vsyncpa [#allocation7], 1 }
 0xf7f   :  { %2932 = vsyncpa [#allocation7 + $0x1], 1 }
 0xf80   :  { %2933 = vsyncpa [#allocation5], 1 }
 0xf81   :  { %2935 = vsyncpa [#allocation5 + $0x1], 1 }

// kernel: tpu_custom_call.1
= control target key start
LH: loop header
LB: loop body
LE: loop exit
PB: predicated region body
PF: predicated region fallthrough
CT: control target
= control target key end

     0   :  { %s4447_s0 = inlined_call_operand.vmem [shape: f32[8,8,32], index: 0, kind: input, shape index: {}]   ;;  %s4448_s1 = inlined_call_operand.vmem [shape: f32[8,8,32], index: 1, kind: input, shape index: {}]   ;;  %s4449_s2 = inlined_call_operand.hbm [shape: f32[8,8,32], index: 2, kind: input, shape index: {}]   ;;  %s4450_s3 = inlined_call_operand.hbm [shape: f32[8,1,32], index: 3, kind: input, shape index: {}]   ;;  %s4451_s4 = inlined_call_operand.hbm [shape: f32[1,8,8], index: 4, kind: input, shape index: {}]   ;;  %s4452_s5 = inlined_call_operand.vmem [shape: bf16[4,32,8], index: 5, kind: input, shape index: {}]   ;;  %s4453_s6 = inlined_call_operand.vmem [shape: f32[4,1,8], index: 6, kind: input, shape index: {}]   ;;  %s4454_s7 = inlined_call_operand.vmem [shape: bf16[4,32,8], index: 7, kind: input, shape index: {}]   ;;  %s4455_s8 = inlined_call_operand.vmem [shape: f32[4,1,8], index: 8, kind: input, shape index: {}]   ;;  %s4456_s9 = inlined_call_operand.vmem [shape: bf16[32,32], index: 9, kind: input, shape index: {}]   ;;  %s4457_s10 = inlined_call_operand.vmem [shape: f32[1,32], index: 10, kind: input, shape index: {}]   ;;  %s4458_s11 = inlined_call_operand.vmem [shape: f32[1,1,32], index: 11, kind: input, shape index: {}]   ;;  %s4459_s12 = inlined_call_operand.vmem [shape: bf16[4,8,32], index: 12, kind: input, shape index: {}]   ;;  %s4460_s13 = inlined_call_operand.vmem [shape: f32[1,32], index: 13, kind: input, shape index: {}]   ;;  %s4461_s14 = inlined_call_operand.hbm [shape: f32[8,8,32], index: 14, kind: output, shape index: {}]  }
   0x1   :  { %4477 = sst [smem:[#allocation20_spill]] %s4449_s2 }
   0x2   :  { %4478 = sst [smem:[#allocation21_spill]] %s4451_s4 }
   0x3   :  { %4479 = sst [smem:[#allocation22_spill]] %s4455_s8 }
   0x4   :  { %4480 = sst [smem:[#allocation23_spill]] %s4459_s12 }
   0x5   :  { %4481 = sst [smem:[#allocation24_spill]] %s4460_s13 }
   0x6   :  { %4482 = sst [smem:[#allocation25_spill]] %s4461_s14 }
   0x7   :  { %19 = vsyncpa [#allocation4], 0 }
   0x8   :  { %21 = vsyncpa [#allocation4 + $0x1], 0 }
   0x9   :  { %22 = vsyncpa [#allocation7], 0 }
   0xa   :  { %24 = vsyncpa [#allocation7 + $0x1], 0 }
   0xb   :  { %25 = vsyncpa [#allocation5], 0 }
   0xc   :  { %27 = vsyncpa [#allocation5 + $0x1], 0  ;;  %s3814_s29 = smov 0   ;;  %s3816_s30 = smov 0  }
   0xd   :  { %s3818_s15 = smov 0   ;;  %s3820_s16 = smov 0  }
   0xe LB: > { %4483 = sst [smem:[#allocation14_spill]] %s3709_s29  ;;  %s3835_s17 = sadd.s32 4294967295, %s3721_s16   ;;  %s3721_s16 = sphi %s3820_s16, %s4512_s16   ;;  %s3717_s15 = sphi %s3818_s15, %s4514_s15   ;;  %s3713_s30 = sphi %s3816_s30, %s4516_s30   ;;  %s3709_s29 = sphi %s3814_s29, %s4515_s29  }
   0xf   : > { %4484 = sst [smem:[#allocation15_spill]] %s3717_s15  ;;  %s3035_s18 = sadd.s32 4294967294, %s3721_s16  }
  0x10   : > { %s3839_s19 = sadd.s32 1, %s3721_s16   ;;  %s92_s20 = sadd.s32 1, %s3717_s15 }
  0x11   : > { %4485 = sst [smem:[#allocation16_spill]] %s3839_s19  ;;  %s89_s21 = ssub.s32 %s3721_s16, %s3839_s19 }
  0x12   : > { %p99_p0 = scmp.ne.s32.totalorder %s3717_s15, %s3713_s30  ;;  %p90_p1 = scmp.eq.s32.totalorder %s89_s21, 0 }
  0x13   : > { %p100_p2 = scmp.eq.s32.totalorder %s3721_s16, 0  ;;  %p105_p3 = scmp.ne.s32.totalorder %s3713_s30, %s3709_s29 }
  0x14   : > { %p4470_p4 = scmp.eq.s32.totalorder %s3835_s17, 0  ;;  %p365_p7 = scmp.eq.s32.totalorder %s3835_s17, 3 }
  0x15   : > { %s3851_s22 = scalar_select %p90_p1, %s3717_s15, %s92_s20  }
  0x16   : > { %p3853_p5 = por %p100_p2, %p99_p0  ;;  %p3859_p6 = por %p4470_p4, %p105_p3 }
  0x17   : > { %4486 = sst [smem:[#allocation17_spill]] %s3851_s22  ;;  %p371_p8 = scmp.eq.s32.totalorder %s3035_s18, 3 }
  0x18   : > { %s4488_s24 = scalar_select %p3859_p6, 1, 0 }
  0x19   : > { %p3036_p9 = scmp.ge.s32.totalorder %s3721_s16, 1  ;;  %p378_p10 = scmp.lt.s32.totalorder %s3721_s16, 5 }
  0x1a   : > { %p3866_p11 = por %p365_p7, %p99_p0  ;;  %p3870_p12 = por %p371_p8, %p105_p3 }
  0x1b   : > { %p3874_p13 = pnand %p3036_p9, %p378_p10  ;;  %s3723_s28 = smov [#allocation8]  }
  0x1c   : > { %s4489_s25 = scalar_select %p3866_p11, 1, 0 }
  0x1d   : > { %s4491_s26 = scalar_select %p3870_p12, 1, 0 }
  0x1e   : > { %4490 = sst [smem:[#allocation18_spill]] %s4489_s25  ;;  %p3413_p1 = pneg %p3874_p13 }
  0x1f   : > { %4492 = sst [smem:[#allocation19_spill]] %s4491_s26  ;;  %s391_s20 = sshll.u32 %s3723_s28, 4  ;;  %s392_s20 = int_to_ptr.vmem [resolvable:$true] %s391_s20 }
  0x20   : > { %s4493_s27 = scalar_select %p3874_p13, 1, 0 }
  0x21   : > { %p3429_p2 = scmp.lt.s32.totalorder %s3721_s16, 4  ;;  %p3883_p0 = pnand %p3413_p1, %p4470_p4 }
  0x22   : > { %s3888_s21 = sand.u32 1, %s3717_s15   ;;  %s4496_s4 = sld [smem:[#allocation21_spill]] }
  0x23   : > { %p3892_p3 = pnand %p3429_p2, %p3853_p5  ;;  %s3039_s19 = sshll.u32 %s3888_s21, 4 }
  0x24   : > { %p3561_p8 = pneg %p3883_p0 }
  0x25   : > { %s4495_s22 = scalar_select %p3892_p3, 1, 0 }
  0x28   : > { %s3559_s28 = scalar_lea.hbm %s4496_s4, 128 }
  0x29   : > { %p3560_p7 = scmp.ne.s32.totalorder %s4496_s4, %s3559_s28  ;;  %p3566_p5 = scmp.lt.u32.totalorder %s3559_s28, %s4496_s4 }
  0x2b   : > { %p3562_p9 = pnand %p3561_p8, %p3560_p7 }
  0x2d   : > { %p3563_p10 = pneg %p3562_p9 }
  0x2f   : > { %p3568_p1 = pnand %p3566_p5, %p3563_p10 }
  0x31   : > { %3571 = shalt.err (!%p3568_p1)
}
  0x32   : > { %s3572_s13 = scalar_lea.vmem %s392_s20, 128  ;;  %p3580_p11 = scmp.lt.s32.totalorder %s392_s20, %s392_s20 }
  0x33   : > { %p3573_p2 = scmp.ne.s32.totalorder %s392_s20, %s3572_s13  ;;  %p3581_p6 = scmp.lt.s32.totalorder %s3572_s13, %s3572_s13 }
  0x35   : > { %p3575_p4 = pnand %p3573_p2, %p3561_p8  ;;  %p3582_p13 = por %p3581_p6, %p3580_p11 }
  0x37   : > { %p3576_p12 = pneg %p3575_p4 }
  0x39   : > { %p3583_p3 = pnand %p3582_p13, %p3576_p12 }
  0x3b   : > { %3586 = shalt.err (!%p3583_p3)
}
  0x3c   : > { %3416 = dma.hbm_to_vmem [thread:$0]  (!%p3883_p0), %s4496_s4, 128, %s392_s20, [#allocation7]  }
  0x3d   : > { %s3157_s15 = sshll.u32 %s3721_s16, 8  ;;  %s451_s25 = scalar_lea.vmem [#allocation3], %s3039_s19 }
  0x3e   : > { %s458_s26 = sshll.u32 %s451_s25, 4  ;;  %s4497_s2 = sld [smem:[#allocation20_spill]]  ;;  %s3919_s26 = int_to_ptr.vmem [resolvable:$true] %s458_s26 }
  0x3f   : > { %s448_s18 = scalar_lea.sflag [#allocation4], %s3888_s21  ;;  %p4498_p6 = scmp.ne.s32.totalorder %s4495_s22, 0 }
  0x41   : > { %p3589_p11 = pneg %p4498_p6 }
  0x44   : > { %s3917_s13 = scalar_lea.hbm %s4497_s2, %s3157_s15  ;;  %s3592_s29 = scalar_lea.hbm %s4497_s2, 1024 }
  0x45   : > { %s3587_s14 = scalar_lea.hbm %s3917_s13, 256  ;;  %p3593_p0 = scmp.lt.u32.totalorder %s3917_s13, %s4497_s2 }
  0x46   : > { %p3588_p4 = scmp.ne.s32.totalorder %s3917_s13, %s3587_s14  ;;  %p3594_p3 = scmp.lt.u32.totalorder %s3592_s29, %s3587_s14 }
  0x47   : > { %p3596_p8 = scmp.lt.u32.totalorder %s3587_s14, %s3917_s13 }
  0x48   : > { %p3590_p12 = pnand %p3589_p11, %p3588_p4  ;;  %p3595_p7 = por %p3594_p3, %p3593_p0 }
  0x4a   : > { %p3591_p13 = pneg %p3590_p12  ;;  %p3597_p9 = por %p3596_p8, %p3595_p7 }
  0x4c   : > { %p3598_p10 = pnand %p3597_p9, %p3591_p13 }
  0x4e   : > { %3601 = shalt.err (!%p3598_p10)
}
  0x4f   : > { %s3602_s28 = scalar_lea.vmem %s3919_s26, 256  ;;  %s3724_s23 = smov [#allocation3]  }
  0x50   : > { %p3603_p5 = scmp.ne.s32.totalorder %s3919_s26, %s3602_s28  ;;  %s3607_s19 = sshll.u32 %s3724_s23, 4  ;;  %s3608_s19 = int_to_ptr.vmem [resolvable:$false] %s3607_s19 }
  0x51   : > { %s3609_s20 = scalar_lea.vmem %s3608_s19, 512  ;;  %p3610_p4 = scmp.lt.s32.totalorder %s3919_s26, %s3608_s19 }
  0x52   : > { %p3605_p1 = pnand %p3603_p5, %p3589_p11  ;;  %p3611_p12 = scmp.lt.s32.totalorder %s3609_s20, %s3602_s28 }
  0x54   : > { %p3606_p2 = pneg %p3605_p1  ;;  %p3612_p0 = por %p3611_p12, %p3610_p4 }
  0x56   : > { %p3613_p3 = pnand %p3612_p0, %p3606_p2 }
  0x58   : > { %3616 = shalt.err (!%p3613_p3)
}
  0x59   : > { %s3725_s14 = smov 128   ;;  %s3726_s29 = smov 8  }
  0x5a   : > { %3420 = dma.hbm_to_vmem [thread:$0]  (!%p4498_p6), %s3917_s13, 256, %s3919_s26, %s448_s18, %s3725_s14, %s3725_s14, %s3726_s29  }
  0x5b   : > { %s468_s15 = sand.u32 1, %s3721_s16   ;;  %s3042_s25 = sshll.u32 %s3888_s21, 1 }
  0x5c   : > { %s3158_s23 = sshll.u32 %s3721_s16, 5  ;;  %s472_s28 = scalar_lea.vmem [#allocation6], %s3042_s25 }
  0x5d   : > { %s479_s19 = sshll.u32 %s472_s28, 4  ;;  %s3955_s4 = scalar_lea.hbm %s4450_s3, %s3158_s23  ;;  %s3957_s19 = int_to_ptr.vmem [resolvable:$true] %s479_s19 }
  0x5e   : > { %s3959_s12 = scalar_lea.sflag [#allocation7], %s468_s15  ;;  %s3617_s8 = scalar_lea.hbm %s3955_s4, 32 }
  0x5f   : > { %p3618_p13 = scmp.ne.s32.totalorder %s3955_s4, %s3617_s8  ;;  %s3622_s2 = scalar_lea.hbm %s4450_s3, 128 }
  0x60   : > { %p3623_p9 = scmp.lt.u32.totalorder %s3955_s4, %s4450_s3  ;;  %p3624_p10 = scmp.lt.u32.totalorder %s3622_s2, %s3617_s8 }
  0x61   : > { %p3620_p7 = pnand %p3618_p13, %p3589_p11  ;;  %p3626_p1 = scmp.lt.u32.totalorder %s3617_s8, %s3955_s4 }
  0x62   : > { %p3625_p5 = por %p3624_p10, %p3623_p9 }
  0x63   : > { %p3621_p8 = pneg %p3620_p7 }
  0x64   : > { %p3627_p2 = por %p3626_p1, %p3625_p5 }
  0x66   : > { %p3628_p4 = pnand %p3627_p2, %p3621_p8 }
  0x68   : > { %3631 = shalt.err (!%p3628_p4)
}
  0x69   : > { %s3632_s14 = scalar_lea.vmem %s3957_s19, 32  ;;  %s3727_s29 = smov [#allocation6]  }
  0x6a   : > { %p3633_p12 = scmp.ne.s32.totalorder %s3957_s19, %s3632_s14  ;;  %s3637_s15 = sshll.u32 %s3727_s29, 4  ;;  %s3638_s15 = int_to_ptr.vmem [resolvable:$false] %s3637_s15 }
  0x6b   : > { %s3639_s25 = scalar_lea.vmem %s3638_s15, 64  ;;  %p3640_p13 = scmp.lt.s32.totalorder %s3957_s19, %s3638_s15 }
  0x6c   : > { %p3635_p0 = pnand %p3633_p12, %p3589_p11  ;;  %p3641_p7 = scmp.lt.s32.totalorder %s3639_s25, %s3632_s14 }
  0x6e   : > { %p3636_p3 = pneg %p3635_p0  ;;  %p3642_p9 = por %p3641_p7, %p3640_p13 }
  0x70   : > { %p3643_p10 = pnand %p3642_p9, %p3636_p3 }
  0x72   : > { %3646 = shalt.err (!%p3643_p10)
}
  0x73   : > { %s3728_s8 = smov 16   ;;  %s3729_s23 = smov 1  }
  0x74   : > { %3423 = dma.hbm_to_vmem [thread:$0]  (!%p4498_p6), %s3955_s4, 32, %s3957_s19, %s3959_s12, %s3728_s8, %s3728_s8, %s3729_s23  }
  0x75   : > { %p4499_p11 = scmp.ne.s32.totalorder %s4493_s27, 0 }
  0x76   : > { %s3988_s28 = sand.u32 (!%p4499_p11), 1, %s3713_s30   ;;  %p4500_p8 = scmp.ne.s32.totalorder (!%p4499_p11), %s4488_s24, 0 }
  0x77   : > { %491 = sbr.rel (%p4499_p11) target bundleno = 3938 (0xf62), region = 76  ;;  %s3046_s20 = sshll.u32 (!%p4499_p11), %s3988_s28, 4 }
  0x78   : > { %s494_s21 = scalar_lea.sflag (!%p4499_p11), [#allocation4], %s3988_s28  ;;  %s497_s26 = scalar_lea.vmem (!%p4499_p11), [#allocation3], %s3046_s20 }
  0x7e   : > { %3692 = dma.done.wait (%p4500_p8), %s494_s21, 256  }
  0x7f   : > { %3694 = vsyncadd (%p4500_p8), %s494_s21, 4294967040  ;;  %s502_s4 = sand.u32 1, %s3835_s17   ;;  %s3047_s12 = sshll.u32 %s3988_s28, 1 }
  0x80   : > { %s503_s22 = scalar_lea.sflag [#allocation7], %s502_s4  ;;  %s4000_s27 = scalar_lea.vmem [#allocation6], %s3047_s12 }
  0x81   : > { %3696 = dma.done.wait (%p4500_p8), %s503_s22, 32  }
  0x82   : > { %3698 = vsyncadd (%p4500_p8), %s503_s22, 4294967264  ;;  %p4501_p6 = scmp.eq.s32.totalorder %s3835_s17, 0 }
  0x84   : > { %3700 = dma.done.wait (%p4501_p6), [#allocation7], 128   ;;  %p4502_p5 = pmov %p4501_p6 }
  0x85   : > { %s3050_s19 = sshll.u32 %s3835_s17, 1  ;;  %v3730_v0 = vmov 0.0   ;;  %vm3731_vm0 = vmmov 0   ;;  %v3477_v1 = vld [vmem:[%s4456_s9] sm:$0xff]   ;;  %v3478_v2 = vld [vmem:[%s4456_s9 + $0x8] sm:$0xff]   ;;  %vm612_vm1 = vcmask 261120   ;;  %v676_v13 = vlaneseq }
  0x86   : > { %3702 = vsyncadd (%p4502_p5), [#allocation7], 4294967168  ;;  %3227 = vmatprep.subr.bf16.mxu0 %v3730_v0  ;;  %3231 = vmatprep.mubr.msk.bf16.mxu0 %vm3731_vm0, %v3730_v0  ;;  %p571_p1 = scmp.lt.s32.totalorder %s3050_s19, 7  ;;  %v586_v3 = vld [vmem:[%s497_s26] sm:$0xff]  ;;  %v587_v4 = vld [vmem:[%s497_s26 + $0x8] sm:$0xff]  ;;  %vm666_vm2 = vcmask 253952  }
  0x87   : > { %3235 = vmatprep.subr.bf16.mxu1 %v3730_v0  ;;  %3239 = vmatprep.mubr.msk.bf16.mxu1 %vm3731_vm0, %v3730_v0  ;;  %v3479_v5 = vld [vmem:[%s4452_s5] sm:$0xff]   ;;  %v588_v6 = vpack.c.bf16 %v587_v4, %v586_v3  ;;  %v3480_v7 = vld [vmem:[%s4452_s5 + $0x8] sm:$0xff]   ;;  %v3732_v11 = vmov 1966171168   ;;  %v658_v15 = vld [vmem:[%s4000_s27] sm:$0x1] }
  0x88   : > { %s4518_s19 = smov (!%p571_p1, %s3050_s19), 7  ;;  %3228 = vmatpush3.bf16.msra.mxu0 %v3477_v1  ;;  %3236 = vmatpush3.bf16.msra.mxu1 %v3479_v5  ;;  %v674_v12 = vunpack.c.l.s4 %v3732_v11  ;;  %v4053_v14 = vld [vmem:[%s4458_s11] sm:$0x1]  ;;  %v677_v19 = vshrl.u32 %v676_v13, 7  ;;  %v659_v20 = vld [vmem:[%s4000_s27 + $0x1] sm:$0x1] }
  0x89   : > { %s3051_s24 = sshll.u32 %s4518_s19, 3  ;;  %3229 = vmatprep.subr.bf16.mxu0 %v3730_v0  ;;  %3237 = vmatprep.subr.bf16.mxu1 %v3730_v0  ;;  %v3054_v16 = vld [vmem:[%s4457_s10] ss:$0 sm:$0xff]  ;;  %v660_v17 = vmul.f32 %v658_v15, %v4053_v14  ;;  %v661_v25 = vmul.f32 %v659_v20, %v4053_v14  ;;  %vm982_vm3 = vcmask 64512   ;;  %s3733_s19 = smov 120   ;;  %vm1769_vm4 = vcmask 1043456  }
  0x8a   : > { %s574_s25 = scalar_lea.vmem %s4447_s0, %s3051_s24  ;;  %v675_v18 = vunpack.c.0.s8 %v674_v12  ;;  %s580_s29 = scalar_lea.vmem %s4448_s1, %s3051_s24 }
  0x8b   : > { %v839_v8 = vld [vmem:[%s574_s25] sm:$0xff]  ;;  %v840_v9 = vld [vmem:[%s574_s25 + $0x8] sm:$0xff]  ;;  %s4503_s4 = sld [smem:[#allocation22_spill]]  ;;  %s3734_s23 = smov 112  }
  0x8c   : > { %3230 = vmatpush3.bf16.msra.mxu0 %v3478_v2  ;;  %v4040_v10 = vpack.c.bf16 %v840_v9, %v839_v8  ;;  %3238 = vmatpush3.bf16.msra.mxu1 %v3480_v7  ;;  %v4062_v27 = vsub.s32 %v675_v18, %v677_v19  ;;  %s4504_s21 = sld [smem:[#allocation23_spill]]  ;;  %s3735_s24 = smov 104  }
  0x8d   : > { %3243 = vmatprep.subr.bf16.mxu0 %v3730_v0  ;;  %3251 = vmatprep.subr.mxu1 %v3730_v0  ;;  %s4505_s2 = sld [smem:[#allocation24_spill]]  ;;  %s4506_s27 = sld [smem:[#allocation18_spill]] }
  0x8e   : > { %s3159_s13 = sshll.u32 %s3835_s17, 8  ;;  %s569_s18 = scalar_lea.vmem [#allocation9], %s3046_s20 }
  0x8f   : > { %3232 = vmatmul.mubr.msk.bf16.vlgmr.msra.gmra.mrb[0].mxu0 %vm612_vm1, %v588_v6  ;;  %3240 = vmatmul.mubr.msk.bf16.vlgmr.msra.gmra.mrb[0].mxu1 %vm612_vm1, %v4040_v10  ;;  %s2906_s14 = sshll.u32 %s569_s18, 4  ;;  %s4507_s25 = sld [smem:[#allocation25_spill]]  ;;  %s4402_s14 = int_to_ptr.vmem [resolvable:$true] %s2906_s14 }
  0x90   : > { %3247 = vmatprep.mubr.msk.bf16.mxu0 %vm3731_vm0, %v3730_v0  ;;  %3253 = vmatprep.mubr.msk.f32.mxu1 %vm3731_vm0, %v3730_v0  ;;  %s2893_s17 = scalar_lea.sflag [#allocation5], %s3988_s28  ;;  %s3647_s20 = scalar_lea.vmem %s4402_s14, 256 }
  0x91   : > { %p3648_p2 = scmp.ne.s32.totalorder %s4402_s14, %s3647_s20 }
  0x93   : > { %p4508_p4 = scmp.ne.s32.totalorder %s4506_s27, 0 }
  0x95   : > { %s4400_s8 = scalar_lea.hbm %s4507_s25, %s3159_s13  ;;  %p3649_p12 = pnand %p3648_p2, %p4508_p4 }
  0x97   : > { %p3650_p0 = pneg %p3649_p12 }
 0x162   : > { %v650_v21 = vpop.f32.mrb[0].mxu0  ;;  %v4064_v31 = vpop.f32.mrb[0].mxu1 }
 0x163   : > { %v651_v22 = vadd.f32 %v3054_v16, %v650_v21  ;;  %v3233_v23 = vpop.f32.mrb[1].mxu0  ;;  %v3241_v32 = vpop.f32.mrb[1].mxu1 }
 0x164   : > { %v653_v24 = vpop.f32.mrb[2].mxu0  ;;  %v4067_v34 = vpop.f32.mrb[2].mxu1 }
 0x165   : > { %v662_v26 = vadd.f32 %v660_v17, %v651_v22  ;;  %v751_v28 = vcombine.high %v651_v22, %v651_v22  ;;  %v654_v29 = vadd.f32 %v3054_v16, %v653_v24  ;;  %v3234_v30 = vpop.f32.mrb[3].mxu0  ;;  %v3242_v37 = vpop.f32.mrb[3].mxu1  ;;  %v679_v39 = vrot.slane %v651_v22, %v4062_v27 }
 0x167   : > { %3495 = vtanh.f32 %v662_v26  ;;  %v758_v33 = vrot.slane %v751_v28, %v4062_v27  ;;  %v663_v35 = vadd.f32 %v661_v25, %v654_v29  ;;  %v766_v36 = vcombine.high %v654_v29, %v654_v29 }
 0x168   : > { %v701_v43 = vrot.slane %v654_v29, %v4062_v27  ;;  %v680_v44 = vcombine.high %v679_v39, %v679_v39  ;;  %v687_v55 = vrot.slane %v679_v39, %v4062_v27 }
 0x169   : > { %v791_v38 = vcombine.high %v758_v33, %v758_v33  ;;  %3497 = vtanh.f32 %v663_v35  ;;  %v773_v40 = vrot.slane %v766_v36, %v4062_v27  ;;  %v765_v13 = vrot.slane %v758_v33, %v4062_v27 }
 0x16a   : > { %v702_v47 = vcombine.high %v701_v43, %v701_v43  ;;  %v694_v49 = vrot.slane %v680_v44, %v4062_v27  ;;  %v709_v57 = vrot.slane %v701_v43, %v4062_v27  ;;  %v727_v59 = vcombine.high %v687_v55, %v687_v55 }
 0x16b   : > { %v4072_v41 = vrot.slane %v791_v38, %v4062_v27  ;;  %v799_v42 = vcombine.high %v773_v40, %v773_v40  ;;  %v780_v18 = vrot.slane %v773_v40, %v4062_v27  ;;  %v817_v28 = vcombine.high %v765_v13, %v765_v13 }
 0x16c   : > { %v716_v53 = vrot.slane %v702_v47, %v4062_v27  ;;  %v728_v63 = vcombine.high %v709_v57, %v709_v57  ;;  %v739_v4 = vcombine.high %v694_v49, %v694_v49 }
 0x16d   : > { %v4076_v45 = vrot.slane %v799_v42, %v4062_v27  ;;  %v818_v33 = vcombine.high %v780_v18, %v780_v18  ;;  %v829_v38 = vcombine.high %v4072_v41, %v4072_v41 }
 0x16e   : > { %v740_v8 = vcombine.high %v716_v53, %v716_v53 }
 0x16f   : > { %v830_v43 = vcombine.high %v4076_v45, %v4076_v45 }
 0x171   : > { %v3496_v46 = vpop.eup %3495 }
 0x172   : > { %667 = vst.msk [vmem:[#allocation2] sm:$0x1] %vm666_vm2, %v3496_v46  ;;  %v669_v48 = vmul.f32 %v3496_v46, %v4053_v14 }
 0x173   : > { %v3498_v50 = vpop.eup %3497 }
 0x174   : > { %v719_v51 = vadd.f32 %v694_v49, %v669_v48  ;;  %668 = vst.msk [vmem:[#allocation2 + $0x8] sm:$0x1] %vm666_vm2, %v3498_v50  ;;  %v670_v52 = vmul.f32 %v3498_v50, %v4053_v14  ;;  %v842_v50 = vld [vmem:[%s580_s29] sm:$0xff] }
 0x176   : > { %3499 = vtanh.f32 %v719_v51  ;;  %v720_v54 = vadd.f32 %v716_v53, %v670_v52  ;;  %v843_v51 = vld [vmem:[%s580_s29 + $0x8] sm:$0xff]  ;;  %v4160_v53 = vld [vmem:[#allocation8] sm:$0xff] }
 0x177   : > { %v4153_v52 = vpack.c.bf16 %v843_v51, %v842_v50 }
 0x178   : > { %3501 = vtanh.f32 %v720_v54 }
 0x180   : > { %v3500_v56 = vpop.eup %3499 }
 0x181   : > { %723 = vst.msk [vmem:[#allocation2 + $0x1] sm:$0x1] %vm666_vm2, %v3500_v56  ;;  %v725_v58 = vmul.f32 %v3500_v56, %v4053_v14 }
 0x182   : > { %v3502_v60 = vpop.eup %3501 }
 0x183   : > { %v731_v61 = vadd.f32 %v727_v59, %v725_v58  ;;  %724 = vst.msk [vmem:[#allocation2 + $0x9] sm:$0x1] %vm666_vm2, %v3502_v60  ;;  %v726_v62 = vmul.f32 %v3502_v60, %v4053_v14 }
 0x185   : > { %3503 = vtanh.f32 %v731_v61  ;;  %v732_v1 = vadd.f32 %v728_v63, %v726_v62 }
 0x187   : > { %3505 = vtanh.f32 %v732_v1 }
 0x18f   : > { %v3504_v2 = vpop.eup %3503 }
 0x190   : > { %735 = vst.msk [vmem:[#allocation2 + $0x2] sm:$0x1] %vm666_vm2, %v3504_v2  ;;  %v737_v3 = vmul.f32 %v3504_v2, %v4053_v14 }
 0x191   : > { %v3506_v5 = vpop.eup %3505 }
 0x192   : > { %v743_v6 = vadd.f32 %v739_v4, %v737_v3  ;;  %736 = vst.msk [vmem:[#allocation2 + $0xa] sm:$0x1] %vm666_vm2, %v3506_v5  ;;  %v738_v7 = vmul.f32 %v3506_v5, %v4053_v14 }
 0x194   : > { %3507 = vtanh.f32 %v743_v6  ;;  %v744_v9 = vadd.f32 %v740_v8, %v738_v7 }
 0x196   : > { %3509 = vtanh.f32 %v744_v9 }
 0x19e   : > { %v3508_v11 = vpop.eup %3507 }
 0x19f   : > { %v749_v12 = vmul.f32 %v3508_v11, %v4053_v14  ;;  %747 = vst.msk [vmem:[#allocation2 + $0x3] sm:$0x1] %vm666_vm2, %v3508_v11 }
 0x1a0   : > { %v3510_v15 = vpop.eup %3509 }
 0x1a1   : > { %v783_v16 = vadd.f32 %v765_v13, %v749_v12  ;;  %v750_v17 = vmul.f32 %v3510_v15, %v4053_v14  ;;  %748 = vst.msk [vmem:[#allocation2 + $0xb] sm:$0x1] %vm666_vm2, %v3510_v15  ;;  %v3062_v13 = vld [vmem:[%s4503_s4] ss:$0 sm:$0xff] }
 0x1a3   : > { %3511 = vtanh.f32 %v783_v16  ;;  %v784_v19 = vadd.f32 %v780_v18, %v750_v17 }
 0x1a5   : > { %3513 = vtanh.f32 %v784_v19 }
 0x1ad   : > { %v3512_v20 = vpop.eup %3511 }
 0x1ae   : > { %787 = vst.msk [vmem:[#allocation2 + $0x4] sm:$0x1] %vm666_vm2, %v3512_v20  ;;  %v789_v21 = vmul.f32 %v3512_v20, %v4053_v14 }
 0x1af   : > { %v3514_v22 = vpop.eup %3513 }
 0x1b0   : > { %v809_v23 = vadd.f32 %v4072_v41, %v789_v21  ;;  %788 = vst.msk [vmem:[#allocation2 + $0xc] sm:$0x1] %vm666_vm2, %v3514_v22  ;;  %v790_v24 = vmul.f32 %v3514_v22, %v4053_v14  ;;  %v3058_v41 = vld [vmem:[%s4453_s6] ss:$0 sm:$0xff]  ;;  %v3483_v21 = vld [vmem:[%s4452_s5 + $0x10] sm:$0xff]  }
 0x1b1   : > { %v910_v49 = vadd.f32 %v3058_v41, %v4067_v34  ;;  %v3482_v34 = vld [vmem:[%s4454_s7 + $0x8] sm:$0xff]  }
 0x1b2   : > { %3515 = vtanh.f32 %v809_v23  ;;  %v810_v25 = vadd.f32 %v4076_v45, %v790_v24  ;;  %v3484_v24 = vld [vmem:[%s4452_s5 + $0x18] sm:$0xff]  }
 0x1b4   : > { %3517 = vtanh.f32 %v810_v25  ;;  %v3485_v25 = vld [vmem:[%s4454_s7 + $0x10] sm:$0xff]  }
 0x1bc   : > { %v3516_v26 = vpop.eup %3515 }
 0x1bd   : > { %v815_v27 = vmul.f32 %v3516_v26, %v4053_v14  ;;  %813 = vst.msk [vmem:[#allocation2 + $0x5] sm:$0x1] %vm666_vm2, %v3516_v26 }
 0x1be   : > { %v3518_v29 = vpop.eup %3517 }
 0x1bf   : > { %v821_v30 = vadd.f32 %v817_v28, %v815_v27  ;;  %v816_v32 = vmul.f32 %v3518_v29, %v4053_v14  ;;  %814 = vst.msk [vmem:[#allocation2 + $0xd] sm:$0x1] %vm666_vm2, %v3518_v29  ;;  %v3486_v27 = vld [vmem:[%s4454_s7 + $0x18] sm:$0xff]  }
 0x1c1   : > { %3519 = vtanh.f32 %v821_v30  ;;  %v822_v35 = vadd.f32 %v818_v33, %v816_v32 }
 0x1c3   : > { %3521 = vtanh.f32 %v822_v35 }
 0x1cb   : > { %v3520_v36 = vpop.eup %3519 }
 0x1cc   : > { %v827_v37 = vmul.f32 %v3520_v36, %v4053_v14  ;;  %825 = vst.msk [vmem:[#allocation2 + $0x6] sm:$0x1] %vm666_vm2, %v3520_v36 }
 0x1cd   : > { %v3522_v39 = vpop.eup %3521 }
 0x1ce   : > { %v833_v40 = vadd.f32 %v829_v38, %v827_v37  ;;  %v828_v42 = vmul.f32 %v3522_v39, %v4053_v14  ;;  %826 = vst.msk [vmem:[#allocation2 + $0xe] sm:$0x1] %vm666_vm2, %v3522_v39  ;;  %v907_v14 = vadd.f32 %v3058_v41, %v4064_v31  ;;  %v3481_v31 = vld [vmem:[%s4454_s7] sm:$0xff]  }
 0x1cf   : > { %3244 = vmatpush3.bf16.msra.mxu0 %v3481_v31  ;;  %v3077_v37 = vld [vmem:[%s4453_s6 + $0x1] ss:$0 sm:$0xff] }
 0x1d0   : > { %3523 = vtanh.f32 %v833_v40  ;;  %v834_v44 = vadd.f32 %v830_v43, %v828_v42  ;;  %3245 = vmatprep.subr.bf16.mxu0 %v3730_v0  ;;  %v3086_v43 = vld [vmem:[%s4503_s4 + $0x1] ss:$0 sm:$0xff] }
 0x1d2   : > { %3525 = vtanh.f32 %v834_v44 }
 0x1d3   : > { %3246 = vmatpush3.bf16.msra.mxu0 %v3482_v34 }
 0x1d4   : > { %3261 = vmatprep.subr.mxu0 %v3730_v0 }
 0x1d6   : > { %3248 = vmatmul.mubr.msk.bf16.vlgmr.msra.gmra.mrb[4].mxu0 %vm612_vm1, %v4153_v52 }
 0x1d7   : > { %3263 = vmatprep.mubr.msk.f32.mxu0 %vm3731_vm0, %v3730_v0 }
 0x1da   : > { %v3524_v46 = vpop.eup %3523 }
 0x1db   : > { %837 = vst.msk [vmem:[#allocation2 + $0x7] sm:$0x1] %vm666_vm2, %v3524_v46 }
 0x1dc   : > { %v3526_v47 = vpop.eup %3525 }
 0x1dd   : > { %838 = vst.msk [vmem:[#allocation2 + $0xf] sm:$0x1] %vm666_vm2, %v3526_v47 }
 0x1e2   : > { %v4124_v45 = vld [vmem:[#allocation2] sm:$0xff] }
 0x1e3   : > { %3252 = vmatpush3.xpose.msk.msra.mxu1 %vm982_vm3, %v4124_v45 }
 0x1e4   : > { %3256 = vmatprep.subr.mxu1 %v3730_v0  ;;  %v4130_v48 = vld [vmem:[#allocation2 + $0x8] sm:$0xff] }
 0x1e6   : > { %3254 = vmatmul.mubr.msk.f32.vlgmr.msra.gmra.mrb[4].mxu1 %vm982_vm3, %v907_v14 }
 0x1e7   : > { %3257 = vmatpush3.xpose.msk.msra.mxu1 %vm982_vm3, %v4130_v48  ;;  %3258 = vmatprep.mubr.msk.f32.mxu1 %vm3731_vm0, %v3730_v0 }
 0x1e8   : > { %3266 = vmatprep.subr.mxu1 %v3730_v0 }
 0x1ea   : > { %3259 = vmatmul.mubr.msk.f32.vlgmr.msra.gmra.mrb[6].mxu1 %vm982_vm3, %v910_v49 }
 0x1eb   : > { %3268 = vmatprep.mubr.msk.f32.mxu1 %vm3731_vm0, %v3730_v0 }
 0x2a9   : > { %v973_v9 = vpop.f32.mrb[4].mxu0 }
 0x2aa   : > { %v3249_v11 = vpop.f32.mrb[5].mxu0  ;;  %v974_v16 = vadd.f32 %v3062_v13, %v973_v9 }
 0x2ab   : > { %v976_v12 = vpop.f32.mrb[6].mxu0  ;;  %v1304_v11 = vld [vmem:[%s4504_s21] sm:$0xf] }
 0x2ac   : > { %v3250_v15 = vpop.f32.mrb[7].mxu0  ;;  %v977_v17 = vadd.f32 %v3062_v13, %v976_v12  ;;  %3262 = vmatpush3.msra.mxu0 %v974_v16  ;;  %v1818_v16 = vsel %vm1769_vm4, %v1304_v11, 0 }
 0x2ad   : > { %3271 = vmatprep.subr.bf16.mxu0 %v3730_v0 }
 0x2ae   : > { %3267 = vmatpush3.msra.mxu1 %v977_v17  ;;  %v3487_v17 = vld [vmem:[%s4454_s7 + $0x20] sm:$0xff]  }
 0x2af   : > { %3279 = vmatprep.subr.bf16.mxu1 %v3730_v0 }
 0x2b9   : > { %v1055_v54 = vpop.f32.mrb[4].mxu1 }
 0x2ba   : > { %v1056_v55 = vadd.f32 %v1055_v54, %v4160_v53  ;;  %v3255_v56 = vpop.f32.mrb[5].mxu1 }
 0x2bc   : > { %v1135_v57 = vsel %vm982_vm3, %v1056_v55, -inf }
 0x2bd   : > { %1136 = vmax.xlane.f32.xlu0 %v1135_v57  ;;  %v1131_v58 = vpop.f32.mrb[6].mxu1 }
 0x2be   : > { %v1132_v59 = vadd.f32 %v1131_v58, %v4160_v53  ;;  %v3260_v60 = vpop.f32.mrb[7].mxu1 }
 0x2c0   : > { %v1138_v61 = vsel %vm982_vm3, %v1132_v59, -inf }
 0x2c1   : > { %1139 = vmax.xlane.f32.xlu1 %v1138_v61 }
 0x34a   : > { %v1137_v62 = vpop.xlane.xlu0 %1136 }
 0x34b   : > { %v1141_v63 = vsub.f32 %v1056_v55, %v1137_v62 }
 0x34d   : > { %v1143_v1 = vmul.f32 1.442695, %v1141_v63 }
 0x34e   : > { %v1140_v2 = vpop.xlane.xlu1 %1139 }
 0x34f   : > { %3527 = vpow2.f32 %v1143_v1  ;;  %v1142_v3 = vsub.f32 %v1132_v59, %v1140_v2 }
 0x351   : > { %v1145_v4 = vmul.f32 1.442695, %v1142_v3 }
 0x353   : > { %3529 = vpow2.f32 %v1145_v4 }
 0x359   : > { %v3528_v5 = vpop.eup %3527 }
 0x35a   : > { %v1147_v6 = vsel %vm982_vm3, %v3528_v5, 0.0 }
 0x35b   : > { %1148 = vadd.xlane.f32.xlu0 %v1147_v6 }
 0x35d   : > { %v3530_v7 = vpop.eup %3529 }
 0x35e   : > { %v1150_v8 = vsel %vm982_vm3, %v3530_v7, 0.0 }
 0x35f   : > { %1151 = vadd.xlane.f32.xlu1 %v1150_v8 }
 0x370   : > { %1518 = vrot.lane.b32.xlu1 %v4130_v48, %s3733_s19 }
 0x371   : > { %1440 = vrot.lane.b32.xlu0 %v4124_v45, %s3733_s19 }
 0x3e8   : > { %v1149_v18 = vpop.xlane.xlu0 %1148 }
 0x3e9   : > { %3531 = vrcp.f32 %v1149_v18  ;;  %v3488_v18 = vld [vmem:[%s4454_s7 + $0x28] sm:$0xff]  }
 0x3ec   : > { %v1152_v19 = vpop.xlane.xlu1 %1151  ;;  %v1441_v28 = vpop.permute.xlu0 %1440 }
 0x3ed   : > { %3533 = vrcp.f32 %v1152_v19 }
 0x3f0   : > { %v1519_v29 = vpop.permute.xlu1 %1518 }
 0x3f3   : > { %v3532_v20 = vpop.eup %3531 }
 0x3f4   : > { %v1155_v22 = vmul.f32 %v3532_v20, %v3528_v5  ;;  %v3096_v20 = vld [vmem:[%s4504_s21 + $0x4] sm:$0xf] }
 0x3f6   : > { %3264 = vmatmul.mubr.msk.f32.vlgmr.msra.gmra.mrb[8].mxu0 %vm982_vm3, %v1155_v22 }
 0x3f7   : > { %v3534_v23 = vpop.eup %3533  ;;  %3272 = vmatpush3.bf16.msra.mxu0 %v3483_v21  ;;  %3275 = vmatprep.mubr.msk.bf16.mxu0 %vm3731_vm0, %v3730_v0  ;;  %v1771_v21 = vsel %vm1769_vm4, %v3096_v20, 0 }
 0x3f8   : > { %v1156_v26 = vmul.f32 %v3534_v23, %v3530_v7  ;;  %3273 = vmatprep.subr.bf16.mxu0 %v3730_v0 }
 0x3fa   : > { %3269 = vmatmul.mubr.msk.f32.vlgmr.msra.gmra.mrb[8].mxu1 %vm982_vm3, %v1156_v26 }
 0x3fb   : > { %3274 = vmatpush3.bf16.msra.mxu0 %v3484_v24  ;;  %3280 = vmatpush3.bf16.msra.mxu1 %v3485_v25  ;;  %v3489_v25 = vld [vmem:[%s4452_s5 + $0x20] sm:$0xff]  }
 0x3fc   : > { %3281 = vmatprep.subr.bf16.mxu1 %v3730_v0  ;;  %3287 = vmatprep.subr.mxu0 %v3730_v0 }
 0x3fd   : > { %3283 = vmatprep.mubr.msk.bf16.mxu1 %vm3731_vm0, %v3730_v0 }
 0x3fe   : > { %3276 = vmatmul.mubr.msk.bf16.vlgmr.msra.gmra.mrb[12].mxu0 %vm612_vm1, %v4040_v10 }
 0x3ff   : > { %3282 = vmatpush3.bf16.msra.mxu1 %v3486_v27  ;;  %3289 = vmatprep.mubr.msk.f32.mxu0 %vm3731_vm0, %v3730_v0 }
 0x400   : > { %3292 = vmatprep.subr.mxu1 %v3730_v0 }
 0x402   : > { %3284 = vmatmul.mubr.msk.bf16.vlgmr.msra.gmra.mrb[12].mxu1 %vm612_vm1, %v4153_v52 }
 0x403   : > { %3294 = vmatprep.mubr.msk.f32.mxu1 %vm3731_vm0, %v3730_v0 }
 0x404   : > { %3288 = vmatpush3.xpose.msk.msra.mxu0 %vm982_vm3, %v1441_v28 }
 0x405   : > { %3297 = vmatprep.subr.mxu0 %v3730_v0 }
 0x408   : > { %3293 = vmatpush3.xpose.msk.msra.mxu1 %vm982_vm3, %v1519_v29  ;;  %v3490_v29 = vld [vmem:[%s4452_s5 + $0x28] sm:$0xff]  }
 0x409   : > { %3302 = vmatprep.subr.mxu1 %v3730_v0 }
 0x4c9   : > { %v4209_v30 = vpop.f32.mrb[8].mxu0 }
 0x4ca   : > { %v3265_v32 = vpop.f32.mrb[9].mxu0 }
 0x4cd   : > { %v4211_v33 = vpop.f32.mrb[8].mxu1 }
 0x4ce   : > { %v1303_v35 = vpack.c.bf16 %v4211_v33, %v4209_v30  ;;  %v3270_v36 = vpop.f32.mrb[9].mxu1 }
 0x4d1   : > { %v1364_v38 = vpop.f32.mrb[12].mxu0 }
 0x4d2   : > { %v1365_v39 = vadd.f32 %v3077_v37, %v1364_v38  ;;  %v3277_v40 = vpop.f32.mrb[13].mxu0 }
 0x4d3   : > { %v1367_v42 = vpop.f32.mrb[14].mxu0 }
 0x4d4   : > { %v1368_v44 = vadd.f32 %v3077_v37, %v1367_v42  ;;  %v3278_v46 = vpop.f32.mrb[15].mxu0  ;;  %3290 = vmatmul.mubr.msk.f32.vlgmr.msra.gmra.mrb[10].mxu0 %vm982_vm3, %v1365_v39 }
 0x4d5   : > { %v1430_v47 = vpop.f32.mrb[12].mxu1  ;;  %3299 = vmatprep.mubr.msk.f32.mxu0 %vm3731_vm0, %v3730_v0 }
 0x4d6   : > { %3295 = vmatmul.mubr.msk.f32.vlgmr.msra.gmra.mrb[10].mxu1 %vm982_vm3, %v1368_v44  ;;  %v1431_v41 = vadd.f32 %v3086_v43, %v1430_v47  ;;  %v3285_v14 = vpop.f32.mrb[13].mxu1 }
 0x4d7   : > { %v1433_v49 = vpop.f32.mrb[14].mxu1  ;;  %3304 = vmatprep.mubr.msk.f32.mxu1 %vm3731_vm0, %v3730_v0  ;;  %v3104_v14 = vld [vmem:[%s4453_s6 + $0x2] ss:$0 sm:$0xff] }
 0x4d8   : > { %v1434_v31 = vadd.f32 %v3086_v43, %v1433_v49  ;;  %v3286_v50 = vpop.f32.mrb[15].mxu1  ;;  %3298 = vmatpush3.msra.mxu0 %v1431_v41  ;;  %v3113_v41 = vld [vmem:[%s4503_s4 + $0x2] ss:$0 sm:$0xff] }
 0x4d9   : > { %3307 = vmatprep.subr.bf16.mxu0 %v3730_v0 }
 0x4da   : > { %3303 = vmatpush3.msra.mxu1 %v1434_v31 }
 0x4db   : > { %3313 = vmatprep.subr.bf16.mxu1 %v3730_v0 }
 0x5a7   : > { %v1513_v51 = vpop.f32.mrb[10].mxu0 }
 0x5a8   : > { %v1514_v34 = vadd.f32 %v1513_v51, %v4160_v53  ;;  %v3291_v54 = vpop.f32.mrb[11].mxu0 }
 0x5a9   : > { %v1591_v55 = vpop.f32.mrb[10].mxu1 }
 0x5aa   : > { %v1592_v56 = vadd.f32 %v1591_v55, %v4160_v53  ;;  %v3296_v57 = vpop.f32.mrb[11].mxu1  ;;  %v1595_v58 = vsel %vm982_vm3, %v1514_v34, -inf }
 0x5ab   : > { %1596 = vmax.xlane.f32.xlu1 %v1595_v58 }
 0x5ac   : > { %v1598_v59 = vsel %vm982_vm3, %v1592_v56, -inf }
 0x5ad   : > { %1599 = vmax.xlane.f32.xlu0 %v1598_v59 }
 0x638   : > { %v1597_v60 = vpop.xlane.xlu1 %1596 }
 0x639   : > { %v1601_v61 = vsub.f32 %v1514_v34, %v1597_v60 }
 0x63a   : > { %v1600_v62 = vpop.xlane.xlu0 %1599 }
 0x63b   : > { %v1603_v63 = vmul.f32 1.442695, %v1601_v61  ;;  %v1602_v1 = vsub.f32 %v1592_v56, %v1600_v62 }
 0x63d   : > { %3535 = vpow2.f32 %v1603_v63  ;;  %v1605_v2 = vmul.f32 1.442695, %v1602_v1 }
 0x63f   : > { %3537 = vpow2.f32 %v1605_v2 }
 0x647   : > { %v3536_v3 = vpop.eup %3535 }
 0x648   : > { %v1607_v4 = vsel %vm982_vm3, %v3536_v3, 0.0 }
 0x649   : > { %v3538_v5 = vpop.eup %3537  ;;  %1608 = vadd.xlane.f32.xlu0 %v1607_v4 }
 0x64a   : > { %v1610_v6 = vsel %vm982_vm3, %v3538_v5, 0.0 }
 0x64b   : > { %1611 = vadd.xlane.f32.xlu1 %v1610_v6 }
 0x65c   : > { %2074 = vrot.lane.b32.xlu1 %v4130_v48, %s3734_s23 }
 0x65f   : > { %1996 = vrot.lane.b32.xlu0 %v4124_v45, %s3734_s23  ;;  %s3736_s23 = smov [#allocation9]  }
 0x660   : > { %s3651_s19 = sshll.u32 %s3736_s23, 4  ;;  %s3652_s19 = int_to_ptr.vmem [resolvable:$false] %s3651_s19 }
 0x661   : > { %p3654_p3 = scmp.lt.s32.totalorder %s4402_s14, %s3652_s19 }
 0x6d6   : > { %v1609_v7 = vpop.xlane.xlu0 %1608 }
 0x6d7   : > { %3539 = vrcp.f32 %v1609_v7 }
 0x6d8   : > { %v1612_v8 = vpop.xlane.xlu1 %1611 }
 0x6d9   : > { %3541 = vrcp.f32 %v1612_v8 }
 0x6dc   : > { %v2075_v19 = vpop.permute.xlu1 %2074 }
 0x6e1   : > { %v3540_v9 = vpop.eup %3539 }
 0x6e2   : > { %v1615_v12 = vmul.f32 %v3540_v9, %v3536_v3 }
 0x6e3   : > { %v3542_v13 = vpop.eup %3541 }
 0x6e4   : > { %v1616_v15 = vmul.f32 %v3542_v13, %v3538_v5  ;;  %3300 = vmatmul.mubr.msk.f32.vlgmr.msra.gmra.mrb[16].mxu0 %vm982_vm3, %v1615_v12 }
 0x6e5   : > { %3309 = vmatprep.mubr.msk.bf16.mxu0 %vm3731_vm0, %v3730_v0  ;;  %3308 = vmatpush3.bf16.msra.mxu0 %v1771_v21  ;;  %v3123_v21 = vld [vmem:[%s4504_s21 + $0x8] sm:$0xf] }
 0x6e6   : > { %3305 = vmatmul.mubr.msk.f32.vlgmr.msra.gmra.mrb[16].mxu1 %vm982_vm3, %v1616_v15  ;;  %3319 = vmatprep.subr.bf16.mxu0 %v3730_v0 }
 0x6e7   : > { %3314 = vmatpush3.bf16.msra.mxu1 %v1818_v16  ;;  %3315 = vmatprep.mubr.msk.bf16.mxu1 %vm3731_vm0, %v3730_v0 }
 0x6e8   : > { %3327 = vmatprep.subr.bf16.mxu1 %v3730_v0 }
 0x6ea   : > { %3316 = vmatmul.mubr.msk.bf16.vlgmr.msra.gmra.mrb[20].mxu1 %vm982_vm3, %v1303_v35  ;;  %v1997_v35 = vpop.permute.xlu0 %1996 }
 0x6eb   : > { %3328 = vmatpush3.bf16.msra.mxu1 %v3487_v17  ;;  %3331 = vmatprep.mubr.msk.bf16.mxu1 %vm3731_vm0, %v3730_v0 }
 0x6ec   : > { %3329 = vmatprep.subr.bf16.mxu1 %v3730_v0 }
 0x6ef   : > { %3330 = vmatpush3.bf16.msra.mxu1 %v3488_v18 }
 0x6f0   : > { %3340 = vmatprep.subr.mxu1 %v3730_v0 }
 0x6f2   : > { %3332 = vmatmul.mubr.msk.bf16.vlgmr.msra.gmra.mrb[24].mxu1 %vm612_vm1, %v4153_v52 }
 0x6f3   : > { %3342 = vmatprep.mubr.msk.f32.mxu1 %vm3731_vm0, %v3730_v0 }
 0x6f8   : > { %3341 = vmatpush3.xpose.msk.msra.mxu1 %vm982_vm3, %v2075_v19  ;;  %v3491_v19 = vld [vmem:[%s4452_s5 + $0x30] sm:$0xff]  }
 0x6f9   : > { %3350 = vmatprep.subr.mxu1 %v3730_v0 }
 0x7b7   : > { %v1686_v22 = vpop.f32.mrb[16].mxu0 }
 0x7b8   : > { %v3301_v23 = vpop.f32.mrb[17].mxu0 }
 0x7b9   : > { %v1759_v24 = vpop.f32.mrb[16].mxu1 }
 0x7ba   : > { %v1763_v26 = vpack.c.bf16 %v1759_v24, %v1686_v22  ;;  %v3306_v27 = vpop.f32.mrb[17].mxu1  ;;  %v2326_v22 = vsel %vm1769_vm4, %v3123_v21, 0 }
 0x7bc   : > { %3310 = vmatmul.mubr.msk.bf16.vlgmr.msra.gmra.mrb[20].mxu0 %vm982_vm3, %v1763_v26 }
 0x7bd   : > { %3320 = vmatpush3.bf16.msra.mxu0 %v3489_v25  ;;  %v1854_v28 = vpop.f32.mrb[20].mxu1  ;;  %3323 = vmatprep.mubr.msk.bf16.mxu0 %vm3731_vm0, %v3730_v0  ;;  %v3493_v25 = vld [vmem:[%s4454_s7 + $0x30] sm:$0xff]  }
 0x7be   : > { %v3317_v30 = vpop.f32.mrb[21].mxu1  ;;  %3321 = vmatprep.subr.bf16.mxu0 %v3730_v0 }
 0x7bf   : > { %v1857_v32 = vpop.f32.mrb[22].mxu1 }
 0x7c0   : > { %v3318_v33 = vpop.f32.mrb[23].mxu1 }
 0x7c1   : > { %3322 = vmatpush3.bf16.msra.mxu0 %v3490_v29  ;;  %v3130_v29 = vld [vmem:[%s4453_s6 + $0x3] ss:$0 sm:$0xff] }
 0x7c2   : > { %3335 = vmatprep.subr.mxu0 %v3730_v0 }
 0x7c4   : > { %3324 = vmatmul.mubr.msk.bf16.vlgmr.msra.gmra.mrb[24].mxu0 %vm612_vm1, %v4040_v10 }
 0x7c5   : > { %3337 = vmatprep.mubr.msk.f32.mxu0 %vm3731_vm0, %v3730_v0  ;;  %v1986_v36 = vpop.f32.mrb[24].mxu1 }
 0x7c6   : > { %v3333_v37 = vpop.f32.mrb[25].mxu1  ;;  %v1987_v31 = vadd.f32 %v3113_v41, %v1986_v36 }
 0x7c7   : > { %v1989_v38 = vpop.f32.mrb[26].mxu1 }
 0x7c8   : > { %v3334_v39 = vpop.f32.mrb[27].mxu1  ;;  %v1990_v54 = vadd.f32 %v3113_v41, %v1989_v38  ;;  %v3139_v41 = vld [vmem:[%s4503_s4 + $0x3] ss:$0 sm:$0xff] }
 0x7ca   : > { %3336 = vmatpush3.xpose.msk.msra.mxu0 %vm982_vm3, %v1997_v35 }
 0x7cb   : > { %3345 = vmatprep.subr.mxu0 %v3730_v0 }
 0x88f   : > { %v1807_v40 = vpop.f32.mrb[20].mxu0 }
 0x890   : > { %v4290_v42 = vadd.f32 %v1854_v28, %v1807_v40  ;;  %v3311_v43 = vpop.f32.mrb[21].mxu0  ;;  %v3494_v28 = vld [vmem:[%s4454_s7 + $0x38] sm:$0xff]  }
 0x891   : > { %v1810_v44 = vpop.f32.mrb[22].mxu0 }
 0x892   : > { %v4292_v46 = vadd.f32 %v1857_v32, %v1810_v44  ;;  %v3312_v47 = vpop.f32.mrb[23].mxu0 }
 0x897   : > { %v1920_v49 = vpop.f32.mrb[24].mxu0 }
 0x898   : > { %v1921_v50 = vadd.f32 %v3104_v14, %v1920_v49  ;;  %v3325_v51 = vpop.f32.mrb[25].mxu0 }
 0x899   : > { %v1923_v34 = vpop.f32.mrb[26].mxu0 }
 0x89a   : > { %v1924_v55 = vadd.f32 %v3104_v14, %v1923_v34  ;;  %v3326_v56 = vpop.f32.mrb[27].mxu0  ;;  %3338 = vmatmul.mubr.msk.f32.vlgmr.msra.gmra.mrb[18].mxu0 %vm982_vm3, %v1921_v50 }
 0x89b   : > { %3346 = vmatpush3.msra.mxu0 %v1987_v31  ;;  %3347 = vmatprep.mubr.msk.f32.mxu0 %vm3731_vm0, %v3730_v0 }
 0x89c   : > { %3343 = vmatmul.mubr.msk.f32.vlgmr.msra.gmra.mrb[18].mxu1 %vm982_vm3, %v1924_v55  ;;  %3355 = vmatprep.subr.bf16.mxu0 %v3730_v0 }
 0x89d   : > { %3351 = vmatpush3.msra.mxu1 %v1990_v54  ;;  %3352 = vmatprep.mubr.msk.f32.mxu1 %vm3731_vm0, %v3730_v0 }
 0x89e   : > { %3361 = vmatprep.subr.bf16.mxu1 %v3730_v0 }
 0x96d   : > { %v2069_v57 = vpop.f32.mrb[18].mxu0 }
 0x96e   : > { %v2070_v58 = vadd.f32 %v2069_v57, %v4160_v53  ;;  %v3339_v59 = vpop.f32.mrb[19].mxu0 }
 0x96f   : > { %v2147_v60 = vpop.f32.mrb[18].mxu1 }
 0x970   : > { %v2148_v61 = vadd.f32 %v2147_v60, %v4160_v53  ;;  %v3344_v62 = vpop.f32.mrb[19].mxu1  ;;  %v2151_v63 = vsel %vm982_vm3, %v2070_v58, -inf }
 0x971   : > { %2152 = vmax.xlane.f32.xlu1 %v2151_v63 }
 0x972   : > { %v2154_v1 = vsel %vm982_vm3, %v2148_v61, -inf }
 0x973   : > { %2155 = vmax.xlane.f32.xlu0 %v2154_v1 }
 0x9fe   : > { %v2153_v2 = vpop.xlane.xlu1 %2152 }
 0x9ff   : > { %v2157_v3 = vsub.f32 %v2070_v58, %v2153_v2 }
 0xa00   : > { %v2156_v4 = vpop.xlane.xlu0 %2155 }
 0xa01   : > { %v2159_v5 = vmul.f32 1.442695, %v2157_v3  ;;  %v2158_v6 = vsub.f32 %v2148_v61, %v2156_v4 }
 0xa03   : > { %3543 = vpow2.f32 %v2159_v5  ;;  %v2161_v7 = vmul.f32 1.442695, %v2158_v6 }
 0xa05   : > { %3545 = vpow2.f32 %v2161_v7 }
 0xa0d   : > { %v3544_v8 = vpop.eup %3543 }
 0xa0e   : > { %v2163_v9 = vsel %vm982_vm3, %v3544_v8, 0.0 }
 0xa0f   : > { %v3546_v11 = vpop.eup %3545  ;;  %2164 = vadd.xlane.f32.xlu0 %v2163_v9 }
 0xa10   : > { %v2166_v12 = vsel %vm982_vm3, %v3546_v11, 0.0 }
 0xa11   : > { %2167 = vadd.xlane.f32.xlu1 %v2166_v12 }
 0xa22   : > { %2584 = vrot.lane.b32.xlu1 %v4130_v48, %s3735_s24 }
 0xa25   : > { %2506 = vrot.lane.b32.xlu0 %v4124_v45, %s3735_s24  ;;  %v3492_v45 = vld [vmem:[%s4452_s5 + $0x38] sm:$0xff]   ;;  %s3653_s24 = scalar_lea.vmem %s3652_s19, 512 }
 0xa26   : > { %p3655_p13 = scmp.lt.s32.totalorder %s3653_s24, %s3647_s20 }
 0xa28   : > { %p3656_p7 = por %p3655_p13, %p3654_p3 }
 0xa2a   : > { %p3657_p9 = pnand %p3656_p7, %p3650_p0 }
 0xa9c   : > { %v2165_v13 = vpop.xlane.xlu0 %2164 }
 0xa9d   : > { %3547 = vrcp.f32 %v2165_v13  ;;  %v3149_v13 = vld [vmem:[%s4504_s21 + $0xc] sm:$0xf] }
 0xa9e   : > { %v2168_v15 = vpop.xlane.xlu1 %2167 }
 0xa9f   : > { %3549 = vrcp.f32 %v2168_v15  ;;  %v2836_v15 = vsel %vm1769_vm4, %v3149_v13, 0 }
 0xaa0   : > { %v2507_v48 = vpop.permute.xlu0 %2506 }
 0xaa2   : > { %v2585_v37 = vpop.permute.xlu1 %2584 }
 0xaa7   : > { %v3548_v16 = vpop.eup %3547 }
 0xaa8   : > { %v2171_v17 = vmul.f32 %v3548_v16, %v3544_v8 }
 0xaa9   : > { %v3550_v18 = vpop.eup %3549 }
 0xaaa   : > { %v2172_v20 = vmul.f32 %v3550_v18, %v3546_v11  ;;  %3348 = vmatmul.mubr.msk.f32.vlgmr.msra.gmra.mrb[28].mxu0 %vm982_vm3, %v2171_v17 }
 0xaab   : > { %3357 = vmatprep.mubr.msk.bf16.mxu0 %vm3731_vm0, %v3730_v0  ;;  %3356 = vmatpush3.bf16.msra.mxu0 %v2326_v22 }
 0xaac   : > { %3353 = vmatmul.mubr.msk.f32.vlgmr.msra.gmra.mrb[28].mxu1 %vm982_vm3, %v2172_v20  ;;  %3369 = vmatprep.subr.bf16.mxu0 %v3730_v0 }
 0xaad   : > { %3362 = vmatpush3.bf16.msra.mxu1 %v3491_v19  ;;  %3365 = vmatprep.mubr.msk.bf16.mxu1 %vm3731_vm0, %v3730_v0 }
 0xaae   : > { %3363 = vmatprep.subr.bf16.mxu1 %v3730_v0 }
 0xab1   : > { %3364 = vmatpush3.bf16.msra.mxu1 %v3492_v45  ;;  %v3151_v45 = vld [vmem:[%s4505_s2] ss:$0 sm:$0xff] }
 0xab2   : > { %3377 = vmatprep.subr.mxu1 %v3730_v0 }
 0xab4   : > { %3366 = vmatmul.mubr.msk.bf16.vlgmr.msra.gmra.mrb[32].mxu1 %vm612_vm1, %v4040_v10 }
 0xab5   : > { %3379 = vmatprep.mubr.msk.f32.mxu1 %vm3731_vm0, %v3730_v0 }
 0xaba   : > { %3378 = vmatpush3.xpose.msk.msra.mxu1 %vm982_vm3, %v2507_v48 }
 0xabb   : > { %3387 = vmatprep.subr.mxu1 %v3730_v0 }
 0xb7d   : > { %v2242_v23 = vpop.f32.mrb[28].mxu0 }
 0xb7e   : > { %v3349_v24 = vpop.f32.mrb[29].mxu0 }
 0xb7f   : > { %v2315_v10 = vpop.f32.mrb[28].mxu1 }
 0xb80   : > { %v2319_v26 = vpack.c.bf16 %v2315_v10, %v2242_v23  ;;  %v3354_v27 = vpop.f32.mrb[29].mxu1 }
 0xb82   : > { %3358 = vmatmul.mubr.msk.bf16.vlgmr.msra.gmra.mrb[32].mxu0 %vm982_vm3, %v2319_v26 }
 0xb83   : > { %3370 = vmatpush3.bf16.msra.mxu0 %v3493_v25  ;;  %3373 = vmatprep.mubr.msk.bf16.mxu0 %vm3731_vm0, %v3730_v0 }
 0xb84   : > { %3371 = vmatprep.subr.bf16.mxu0 %v3730_v0 }
 0xb87   : > { %v2430_v30 = vpop.f32.mrb[32].mxu1  ;;  %3372 = vmatpush3.bf16.msra.mxu0 %v3494_v28 }
 0xb88   : > { %v2431_v32 = vadd.f32 %v3130_v29, %v2430_v30  ;;  %v3367_v33 = vpop.f32.mrb[33].mxu1  ;;  %3382 = vmatprep.subr.mxu0 %v3730_v0 }
 0xb89   : > { %v2433_v35 = vpop.f32.mrb[34].mxu1 }
 0xb8a   : > { %3380 = vmatmul.mubr.msk.f32.vlgmr.msra.gmra.mrb[30].mxu1 %vm982_vm3, %v2431_v32  ;;  %3374 = vmatmul.mubr.msk.bf16.vlgmr.msra.gmra.mrb[36].mxu0 %vm612_vm1, %v4153_v52  ;;  %v3368_v36 = vpop.f32.mrb[35].mxu1  ;;  %v2434_v38 = vadd.f32 %v3130_v29, %v2433_v35 }
 0xb8b   : > { %3384 = vmatprep.mubr.msk.f32.mxu0 %vm3731_vm0, %v3730_v0  ;;  %3389 = vmatprep.mubr.msk.f32.mxu1 %vm3731_vm0, %v3730_v0 }
 0xb90   : > { %3383 = vmatpush3.xpose.msk.msra.mxu0 %vm982_vm3, %v2585_v37 }
 0xb91   : > { %3392 = vmatprep.subr.mxu0 %v3730_v0 }
 0xb93   : > { %3385 = vmatmul.mubr.msk.f32.vlgmr.msra.gmra.mrb[30].mxu0 %vm982_vm3, %v2434_v38 }
 0xb94   : > { %3394 = vmatprep.mubr.msk.f32.mxu0 %vm3731_vm0, %v3730_v0 }
 0xc55   : > { %v2362_v39 = vpop.f32.mrb[32].mxu0 }
 0xc56   : > { %v2369_v52 = vadd.f32 %v2362_v39, %v4290_v42  ;;  %v3359_v40 = vpop.f32.mrb[33].mxu0 }
 0xc57   : > { %v2365_v43 = vpop.f32.mrb[34].mxu0 }
 0xc58   : > { %v4369_v44 = vadd.f32 %v2365_v43, %v4292_v46  ;;  %v3360_v47 = vpop.f32.mrb[35].mxu0 }
 0xc5d   : > { %v2579_v14 = vpop.f32.mrb[30].mxu1  ;;  %v2496_v49 = vpop.f32.mrb[36].mxu0 }
 0xc5e   : > { %v2580_v31 = vadd.f32 %v2579_v14, %v4160_v53  ;;  %v2497_v50 = vadd.f32 %v3139_v41, %v2496_v49  ;;  %v3375_v51 = vpop.f32.mrb[37].mxu0  ;;  %v3381_v34 = vpop.f32.mrb[31].mxu1 }
 0xc5f   : > { %v2499_v54 = vpop.f32.mrb[38].mxu0 }
 0xc60   : > { %v2661_v42 = vsel %vm982_vm3, %v2580_v31, -inf  ;;  %v2500_v55 = vadd.f32 %v3139_v41, %v2499_v54  ;;  %v3376_v56 = vpop.f32.mrb[39].mxu0  ;;  %3388 = vmatpush3.msra.mxu1 %v2497_v50 }
 0xc61   : > { %2662 = vmax.xlane.f32.xlu1 %v2661_v42  ;;  %3397 = vmatprep.subr.bf16.mxu1 %v3730_v0 }
 0xc62   : > { %3393 = vmatpush3.msra.mxu0 %v2500_v55 }
 0xc66   : > { %v2657_v46 = vpop.f32.mrb[30].mxu0 }
 0xc67   : > { %v2658_v57 = vadd.f32 %v2657_v46, %v4160_v53  ;;  %v3386_v58 = vpop.f32.mrb[31].mxu0 }
 0xc69   : > { %v2664_v59 = vsel %vm982_vm3, %v2658_v57, -inf }
 0xc6a   : > { %2665 = vmax.xlane.f32.xlu0 %v2664_v59 }
 0xcee   : > { %v2663_v60 = vpop.xlane.xlu1 %2662 }
 0xcef   : > { %v2667_v61 = vsub.f32 %v2580_v31, %v2663_v60 }
 0xcf1   : > { %v2669_v62 = vmul.f32 1.442695, %v2667_v61 }
 0xcf3   : > { %3551 = vpow2.f32 %v2669_v62 }
 0xcf7   : > { %v2666_v63 = vpop.xlane.xlu0 %2665 }
 0xcf8   : > { %v2668_v1 = vsub.f32 %v2658_v57, %v2666_v63 }
 0xcfa   : > { %v2671_v2 = vmul.f32 1.442695, %v2668_v1 }
 0xcfc   : > { %3553 = vpow2.f32 %v2671_v2 }
 0xcfd   : > { %v3552_v3 = vpop.eup %3551 }
 0xcfe   : > { %v2673_v4 = vsel %vm982_vm3, %v3552_v3, 0.0 }
 0xcff   : > { %2674 = vadd.xlane.f32.xlu0 %v2673_v4 }
 0xd06   : > { %v3554_v5 = vpop.eup %3553 }
 0xd07   : > { %v2676_v6 = vsel %vm982_vm3, %v3554_v5, 0.0 }
 0xd08   : > { %2677 = vadd.xlane.f32.xlu1 %v2676_v6 }
 0xd8c   : > { %v2675_v53 = vpop.xlane.xlu0 %2674 }
 0xd8d   : > { %3555 = vrcp.f32 %v2675_v53 }
 0xd95   : > { %v2678_v7 = vpop.xlane.xlu1 %2677 }
 0xd96   : > { %3557 = vrcp.f32 %v2678_v7 }
 0xd97   : > { %v3556_v8 = vpop.eup %3555 }
 0xd98   : > { %v2681_v9 = vmul.f32 %v3556_v8, %v3552_v3 }
 0xd9a   : > { %3390 = vmatmul.mubr.msk.f32.vlgmr.msra.gmra.mrb[36].mxu1 %vm982_vm3, %v2681_v9 }
 0xd9b   : > { %3399 = vmatprep.mubr.msk.bf16.mxu1 %vm3731_vm0, %v3730_v0  ;;  %3398 = vmatpush3.bf16.msra.mxu1 %v2836_v15 }
 0xda0   : > { %v3558_v11 = vpop.eup %3557 }
 0xda1   : > { %v2682_v12 = vmul.f32 %v3558_v11, %v3554_v5 }
 0xda3   : > { %3395 = vmatmul.mubr.msk.f32.vlgmr.msra.gmra.mrb[40].mxu0 %vm982_vm3, %v2682_v12 }
 0xe6d   : > { %v2752_v16 = vpop.f32.mrb[36].mxu1 }
 0xe6e   : > { %v3391_v17 = vpop.f32.mrb[37].mxu1 }
 0xe76   : > { %v2825_v18 = vpop.f32.mrb[40].mxu0 }
 0xe77   : > { %v2829_v19 = vpack.c.bf16 %v2825_v18, %v2752_v16  ;;  %v3396_v20 = vpop.f32.mrb[41].mxu0 }
 0xe79   : > { %3400 = vmatmul.mubr.msk.bf16.vlgmr.msra.gmra.mrb[40].mxu1 %vm982_vm3, %v2829_v19 }
 0xf4c   : > { %v2872_v0 = vpop.f32.mrb[40].mxu1 }
 0xf4d   : > { %v2879_v48 = vadd.f32 %v2872_v0, %v2369_v52  ;;  %v3401_v21 = vpop.f32.mrb[41].mxu1 }
 0xf4e   : > { %v2875_v22 = vpop.f32.mrb[42].mxu1 }
 0xf4f   : > { %v2888_v23 = vadd.f32 %v3151_v45, %v2879_v48  ;;  %v2880_v24 = vadd.f32 %v2875_v22, %v4369_v44  ;;  %v3402_v10 = vpop.f32.mrb[43].mxu1 }
 0xf51   : > { %2890 = vst.msk [vmem:[%s569_s18] sm:$0xff] %vm612_vm1, %v2888_v23  ;;  %v2889_v25 = vadd.f32 %v3151_v45, %v2880_v24 }
 0xf53   : > { %2891 = vst.msk [vmem:[%s569_s18 + $0x8] sm:$0xff] %vm612_vm1, %v2889_v25 }
 0xf54   : > { %3660 = shalt.err (!%p3657_p9)
}
 0xf55   : > { %s3661_s26 = scalar_lea.hbm %s4400_s8, 256  ;;  %s3665_s2 = scalar_lea.hbm %s4507_s25, 1024 }
 0xf56   : > { %p3662_p10 = scmp.ne.s32.totalorder %s4400_s8, %s3661_s26  ;;  %p3666_p6 = scmp.lt.u32.totalorder %s4400_s8, %s4507_s25 }
 0xf57   : > { %p3667_p5 = scmp.lt.u32.totalorder %s3665_s2, %s3661_s26  ;;  %p3669_p2 = scmp.lt.u32.totalorder %s3661_s26, %s4400_s8 }
 0xf58   : > { %p3663_p11 = pnand %p3662_p10, %p4508_p4 }
 0xf59   : > { %p3668_p1 = por %p3667_p5, %p3666_p6 }
 0xf5a   : > { %p3664_p8 = pneg %p3663_p11 }
 0xf5b   : > { %p3670_p12 = por %p3669_p2, %p3668_p1 }
 0xf5d   : > { %p3671_p0 = pnand %p3670_p12, %p3664_p8 }
 0xf5f   : > { %3674 = shalt.err (!%p3671_p0)
}
 0xf60   : > { %s3737_s29 = smov 128   ;;  %s3738_s15 = smov 8  }
 0xf61   : > { %3411 = dma.vmem_to_hbm [thread:$0]  (%p4508_p4), %s4402_s14, 256, %s4400_s8, %s2893_s17, %s3737_s29, %s3737_s29, %s3738_s15  }
 0xf62 PF: > { %s4509_s20 = sld [smem:[#allocation14_spill]]  ;;  %s4510_s23 = sld [smem:[#allocation19_spill]] }
 0xf63   : > { %p3431_p3 = scmp.ge.s32.totalorder %s3721_s16, 2 }
 0xf68   : > { %s2921_s19 = sand.u32 1, %s4509_s20   ;;  %p4511_p13 = scmp.ne.s32.totalorder %s4510_s23, 0 }
 0xf69   : > { %s2922_s24 = scalar_lea.sflag [#allocation5], %s2921_s19 }
 0xf6a   : > { %p3425_p7 = pnand %p3431_p3, %p4511_p13 }
 0xf6c   : > { %3704 = dma.done.wait (!%p3425_p7), %s2922_s24, 256  }
 0xf6d   : > { %3706 = vsyncadd (!%p3425_p7), %s2922_s24, 4294967040  ;;  %s4512_s16 = sld [smem:[#allocation16_spill]]  ;;  %s4513_s26 = sld [smem:[#allocation15_spill]] }
 0xf6e   : > { %s4514_s15 = sld [smem:[#allocation17_spill]]  ;;  %s4515_s29 = smov %s3713_s30 }
 0xf73   : > { %p30_p9 = scmp.ge.s32.totalorder %s4512_s16, 6   ;;  %s4516_s30 = smov %s4513_s26 }
 0xf75   :  { %32 = sbr.rel (!%p30_p9) target bundleno = 14 (0xe), region = 159 }
 0xf7c   :  { %2927 = vsyncpa [#allocation4], 1 }
 0xf7d   :  { %2929 = vsyncpa [#allocation4 + $0x1], 1 }
 0xf7e   :  { %2930 = vsyncpa [#allocation7], 1 }
 0xf7f   :  { %2932 = vsyncpa [#allocation7 + $0x1], 1 }
 0xf80   :  { %2933 = vsyncpa [#allocation5], 1 }
 0xf81   :  { %2935 = vsyncpa [#allocation5 + $0x1], 1 }

</bundles_post_ra>
